<compile_context>
chip_gen: v5e
topology: v5e:2x2
jax: 0.10.0
libtpu: 0.0.40
codegen_flags: <defaults>
</compile_context>

<pallas_src>
import jax
import jax.numpy as jnp
from jax.experimental import pallas as pl
from jax.experimental.pallas import tpu as pltpu

# Explicit scoped-VMEM budget (fits v5e/v6e 128 MiB and v7x 64 MiB parts).
VMEM_LIMIT = 32 * 1024 * 1024


# ---------------------------------------------------------------------------
# BERT stand-in: one transformer encoder layer (masked self-attn + FFN + LN),
# gridded over batch ("parallel"), bf16 matmul inputs, f32 elementwise math.
# TODO(synk): at real BERT sizes (D=768, S=512) this should become a
# flash-attention-style tiling over (q, kv) blocks instead of one S x S score
# matrix per batch element.
# ---------------------------------------------------------------------------
def bert_layer_kernel(x_ref, mbias_ref, wqkv_ref, wo_ref, w1_ref, b1_ref,
                      w2_ref, b2_ref, out_ref):
    x = x_ref[0].astype(jnp.float32)                 # (S, D)
    x_bf = x.astype(jnp.bfloat16)
    D = x.shape[-1]

    # Fused Q/K/V projection: one (S,D) x (D,3D) MXU matmul, then lane slices.
    # 1/sqrt(D) scale is already folded into the Q columns of wqkv.
    qkv = jnp.dot(x_bf, wqkv_ref[...], preferred_element_type=jnp.float32)
    q = qkv[:, 0:D]
    k = qkv[:, D:2 * D]
    v = qkv[:, 2 * D:3 * D]

    scores = jnp.einsum('qd,kd->qk', q.astype(jnp.bfloat16),
                        k.astype(jnp.bfloat16),
                        preferred_element_type=jnp.float32)           # (S, S)
    scores = scores + mbias_ref[0]                   # (1, S) additive key mask
    scores = scores - jnp.max(scores, axis=-1, keepdims=True)
    e = jnp.exp(scores)
    # softmax denominator on the EUP (approx reciprocal), not the VALU divide
    p = e * pl.reciprocal(jnp.sum(e, axis=-1, keepdims=True), approx=True)

    ctx = jnp.dot(p.astype(jnp.bfloat16), v.astype(jnp.bfloat16),
                  preferred_element_type=jnp.float32)                 # (S, D)
    attn = jnp.dot(ctx.astype(jnp.bfloat16), wo_ref[...],
                   preferred_element_type=jnp.float32)

    h = x + attn
    mu = jnp.mean(h, axis=-1, keepdims=True)
    var = jnp.mean((h - mu) ** 2, axis=-1, keepdims=True)
    h = (h - mu) * jax.lax.rsqrt(var + 1e-12)

    ff = jnp.dot(h.astype(jnp.bfloat16), w1_ref[...],
                 preferred_element_type=jnp.float32) + b1_ref[...]
    # TODO(synk): HF BERT default is exact (erf) GELU; tanh approximation used.
    ff = jax.nn.gelu(ff, approximate=True)
    ff = jnp.dot(ff.astype(jnp.bfloat16), w2_ref[...],
                 preferred_element_type=jnp.float32) + b2_ref[...]

    y = h + ff
    mu2 = jnp.mean(y, axis=-1, keepdims=True)
    var2 = jnp.mean((y - mu2) ** 2, axis=-1, keepdims=True)
    out_ref[0] = ((y - mu2) * jax.lax.rsqrt(var2 + 1e-12)).astype(out_ref.dtype)


def bert_encoder(emb, attention_mask, p):
    B, S, D = emb.shape
    scale = 1.0 / jnp.sqrt(jnp.float32(D))
    # Fold the attention scale into W_q, fuse Q|K|V weights, cast matmul
    # operands to bf16 once in the wrapper.
    wqkv = jnp.concatenate([p['wq'] * scale, p['wk'], p['wv']],
                           axis=1).astype(jnp.bfloat16)
    wo = p['wo'].astype(jnp.bfloat16)
    w1 = p['w1'].astype(jnp.bfloat16)
    w2 = p['w2'].astype(jnp.bfloat16)
    # Additive key-mask bias: 0 on valid tokens, -1e9 on padding.
    mask_bias = ((attention_mask.astype(jnp.float32) - 1.0)
                 * jnp.float32(1e9)).reshape(B, 1, S)

    flops = (2 * B * S * D * (3 * D)          # qkv
             + 4 * B * S * S * D              # scores + ctx
             + 2 * B * S * D * D              # output proj
             + 4 * B * S * D * (4 * D))       # ffn
    transcendentals = B * S * S + B * S * 4 * D
    bytes_accessed = (4 * B * S * D + 4 * B * S
                      + 2 * (D * 3 * D + D * D + D * 4 * D + 4 * D * D)
                      + 4 * (4 * D + D)
                      + 4 * B * S * D)

    return pl.pallas_call(
        bert_layer_kernel,
        out_shape=jax.ShapeDtypeStruct((B, S, D), jnp.float32),
        grid_spec=pltpu.PrefetchScalarGridSpec(
            num_scalar_prefetch=0,
            grid=(B,),
            in_specs=[
                pl.BlockSpec((1, S, D), lambda b: (b, 0, 0)),
                pl.BlockSpec((1, 1, S), lambda b: (b, 0, 0)),
                pl.BlockSpec((D, 3 * D), lambda b: (0, 0)),
                pl.BlockSpec((D, D), lambda b: (0, 0)),
                pl.BlockSpec((D, 4 * D), lambda b: (0, 0)),
                pl.BlockSpec((1, 4 * D), lambda b: (0, 0)),
                pl.BlockSpec((4 * D, D), lambda b: (0, 0)),
                pl.BlockSpec((1, D), lambda b: (0, 0)),
            ],
            out_specs=pl.BlockSpec((1, S, D), lambda b: (b, 0, 0)),
        ),
        compiler_params=pltpu.CompilerParams(
            dimension_semantics=("parallel",),      # batch tiles -> both v7x TCs
            vmem_limit_bytes=VMEM_LIMIT),
        cost_estimate=pl.CostEstimate(flops=flops,
                                      transcendentals=transcendentals,
                                      bytes_accessed=bytes_accessed),
    )(emb, mask_bias, wqkv, wo, w1, p['b1'], w2, p['b2'])


# ---------------------------------------------------------------------------
# LSTM, stage 1: hoisted input projection gates_x = x @ W_ih + b for ALL
# timesteps at once (grid-parallel over sequence chunks; one big MXU matmul).
# ---------------------------------------------------------------------------
def lstm_gates_kernel(x_ref, wih_ref, b_ref, gx_ref):
    x = x_ref[...].astype(jnp.bfloat16)              # (B, T, D)
    g = jnp.einsum('btd,dg->btg', x, wih_ref[...],
                   preferred_element_type=jnp.float32)
    gx_ref[...] = g + b_ref[...]                     # bias add stays in f32


# ---------------------------------------------------------------------------
# LSTM, stage 2: sequential recurrence over time CHUNKS (fused with the
# classifier head).  Only h_{t-1} @ W_hh remains on the serial critical path;
# the inner time loop is fully unrolled to amortize per-grid-step overhead.
# Gate columns are pre-packed (i, f, o, g): one contiguous sigmoid range
# [0:3H] and one tanh range [3H:4H], both 128-lane aligned for H = 128.
# ---------------------------------------------------------------------------
def lstm_rec_kernel(gx_ref, whh_ref, fcw_ref, fcb_ref, out_ref, h_sc, c_sc):
    ci = pl.program_id(0)
    H = h_sc.shape[-1]

    @pl.when(ci == 0)
    def _():
        h_sc[...] = jnp.zeros_like(h_sc)
        c_sc[...] = jnp.zeros_like(c_sc)

    gx = gx_ref[...]                                 # (B, T, 4H) precomputed
    whh = whh_ref[...]                               # (H, 4H) bf16
    T = gx.shape[1]

    h = h_sc[...]
    c = c_sc[...]
    for t in range(T):                               # fully unrolled chunk
        gates = gx[:, t, :] + jnp.dot(h.astype(jnp.bfloat16), whh,
                                      preferred_element_type=jnp.float32)
        sig = jax.nn.sigmoid(gates[:, 0:3 * H])
        i_g = sig[:, 0:H]
        f_g = sig[:, H:2 * H]
        o_g = sig[:, 2 * H:3 * H]
        g_g = jnp.tanh(gates[:, 3 * H:4 * H])
        c = f_g * c + i_g * g_g
        h = o_g * jnp.tanh(c)
    h_sc[...] = h
    c_sc[...] = c

    @pl.when(ci == pl.num_programs(0) - 1)
    def _():
        # dropout(p=0.5) is identity at inference; fc on the final hidden state.
        out_ref[...] = (jnp.dot(h.astype(jnp.bfloat16), fcw_ref[...],
                                preferred_element_type=jnp.float32)
                        + fcb_ref[...]).astype(out_ref.dtype)


def lstm_fc(hidden_states, w_ih, w_hh, b_lstm, fc_w, fc_b, t_chunk=8):
    B, S, D = hidden_states.shape
    H = w_hh.shape[0]
    O = fc_w.shape[1]
    G = 4 * H
    assert S % t_chunk == 0
    n_chunks = S // t_chunk

    # Reorder PyTorch LSTM gate blocks (i, f, g, o) -> (i, f, o, g).
    def reorder(w):
        i, f, g, o = jnp.split(w, 4, axis=-1)
        return jnp.concatenate([i, f, o, g], axis=-1)

    w_ih_r = reorder(w_ih).astype(jnp.bfloat16)
    w_hh_r = reorder(w_hh).astype(jnp.bfloat16)
    b_r = reorder(b_lstm).astype(jnp.float32)

    # Lane-dense classifier head: pad O up to 128 lanes, slice in the wrapper.
    O_pad = max(128, ((O + 127) // 128) * 128)
    fc_w_pad = jnp.zeros((H, O_pad), jnp.float32).at[:, :O].set(fc_w).astype(jnp.bfloat16)
    fc_b_pad = jnp.zeros((1, O_pad), jnp.float32).at[:, :O].set(fc_b)

    # Stage 1: grid-parallel input projection for all timesteps (batch-major,
    # no activation transpose anywhere in the wrapper).
    gates_x = pl.pallas_call(
        lstm_gates_kernel,
        out_shape=jax.ShapeDtypeStruct((B, S, G), jnp.float32),
        grid_spec=pltpu.PrefetchScalarGridSpec(
            num_scalar_prefetch=0,
            grid=(n_chunks,),
            in_specs=[
                pl.BlockSpec((B, t_chunk, D), lambda c: (0, c, 0)),
                pl.BlockSpec((D, G), lambda c: (0, 0)),
                pl.BlockSpec((1, G), lambda c: (0, 0)),
            ],
            out_specs=pl.BlockSpec((B, t_chunk, G), lambda c: (0, c, 0)),
        ),
        compiler_params=pltpu.CompilerParams(
            dimension_semantics=("parallel",),
            vmem_limit_bytes=VMEM_LIMIT),
        cost_estimate=pl.CostEstimate(
            flops=2 * B * S * D * G,
            transcendentals=0,
            bytes_accessed=4 * B * S * D + 2 * D * G + 4 * G + 4 * B * S * G),
    )(hidden_states, w_ih_r, b_r)

    # Stage 2: sequential recurrence over time chunks + fused fc head.
    # TODO(synk): on v7x, add a leading 'parallel' batch-split grid axis so
    # each TensorCore runs an independent half-batch recurrence (needs batch
    # padded to a multiple of 8 sublanes per split to satisfy block tiling).
    out_pad = pl.pallas_call(
        lstm_rec_kernel,
        out_shape=jax.ShapeDtypeStruct((B, O_pad), jnp.float32),
        grid_spec=pltpu.PrefetchScalarGridSpec(
            num_scalar_prefetch=0,
            grid=(n_chunks,),
            in_specs=[
                pl.BlockSpec((B, t_chunk, G), lambda c: (0, c, 0)),
                pl.BlockSpec((H, G), lambda c: (0, 0)),
                pl.BlockSpec((H, O_pad), lambda c: (0, 0)),
                pl.BlockSpec((1, O_pad), lambda c: (0, 0)),
            ],
            out_specs=pl.BlockSpec((B, O_pad), lambda c: (0, 0)),
            scratch_shapes=[pltpu.VMEM((B, H), jnp.float32),
                            pltpu.VMEM((B, H), jnp.float32)],
        ),
        compiler_params=pltpu.CompilerParams(
            dimension_semantics=("arbitrary",),     # true recurrence -> sequential
            vmem_limit_bytes=VMEM_LIMIT),
        cost_estimate=pl.CostEstimate(
            flops=2 * S * B * H * G + 2 * B * H * O_pad,
            transcendentals=S * B * G,
            bytes_accessed=(4 * B * S * G + 2 * H * G + 2 * H * O_pad
                            + 4 * O_pad + 4 * B * O_pad)),
    )(gates_x, w_hh_r, fc_w_pad, fc_b_pad)

    return out_pad[:, :O]


# ---------------------------------------------------------------------------
# Deterministic parameter construction (PyTorch-style layouts; weights stored
# as [in_features, out_features], LSTM gates in torch order i, f, g, o).
# ---------------------------------------------------------------------------
def init_params(key, vocab, D, H, O):
    ks = jax.random.split(key, 12)
    s = 0.05
    return {
        'embed': jax.random.normal(ks[0], (vocab, D), jnp.float32) * s,
        'wq': jax.random.normal(ks[1], (D, D), jnp.float32) * s,
        'wk': jax.random.normal(ks[2], (D, D), jnp.float32) * s,
        'wv': jax.random.normal(ks[3], (D, D), jnp.float32) * s,
        'wo': jax.random.normal(ks[4], (D, D), jnp.float32) * s,
        'w1': jax.random.normal(ks[5], (D, 4 * D), jnp.float32) * s,
        'b1': jnp.zeros((1, 4 * D), jnp.float32),
        'w2': jax.random.normal(ks[6], (4 * D, D), jnp.float32) * s,
        'b2': jnp.zeros((1, D), jnp.float32),
        # LSTM: input->hidden, hidden->hidden, combined bias (b_ih + b_hh)
        'w_ih': jax.random.normal(ks[7], (D, 4 * H), jnp.float32) * s,
        'w_hh': jax.random.normal(ks[8], (H, 4 * H), jnp.float32) * s,
        'b_lstm': jax.random.normal(ks[9], (1, 4 * H), jnp.float32) * s,
        # classifier head
        'fc_w': jax.random.normal(ks[10], (H, O), jnp.float32) * s,
        'fc_b': jax.random.normal(ks[11], (1, O), jnp.float32) * s,
    }


@jax.jit
def bert_classifier_forward(params, input_ids, attention_mask):
    # frozen bert_model(input_ids, attention_mask).last_hidden_state
    emb = params['embed'][input_ids]                       # gather (plain JAX glue)
    hidden_states = bert_encoder(emb, attention_mask, params)   # (B, S, D)
    # LSTM over sequence -> hidden[-1] -> dropout(eval)=identity -> fc
    logits = lstm_fc(hidden_states, params['w_ih'], params['w_hh'],
                     params['b_lstm'], params['fc_w'], params['fc_b'])
    return logits


if __name__ == "__main__":
    key = jax.random.PRNGKey(0)
    B, S, VOCAB = 2, 8, 100
    D = 128   # bert_model.config.hidden_size (stand-in; lane-dense multiple of 128)
    H = 128   # hidden_dim (lane-dense)
    O = 4     # output_dim (padded to 128 inside the fc kernel, sliced outside)

    k_ids, k_par = jax.random.split(key)
    input_ids = jax.random.randint(k_ids, (B, S), 0, VOCAB)
    attention_mask = jnp.ones((B, S), jnp.float32).at[1, 6:].set(0.0)

    params = init_params(k_par, VOCAB, D, H, O)

    logits = bert_classifier_forward(params, input_ids, attention_mask)
    jax.block_until_ready(logits)
    assert logits.shape == (B, O) and logits.dtype == jnp.float32
    print("KERNEL_OK")
</pallas_src>

<mosaic_0001>
module attributes {stable_mosaic.version = 11 : i64} {
  func.func @bert_layer_kernel(%arg0: i32, %arg1: memref<1x8x128xf32, #tpu.memory_space<vmem>>, %arg2: memref<1x1x8xf32, #tpu.memory_space<vmem>>, %arg3: memref<128x384xbf16, #tpu.memory_space<vmem>>, %arg4: memref<128x128xbf16, #tpu.memory_space<vmem>>, %arg5: memref<128x512xbf16, #tpu.memory_space<vmem>>, %arg6: memref<1x512xf32, #tpu.memory_space<vmem>>, %arg7: memref<512x128xbf16, #tpu.memory_space<vmem>>, %arg8: memref<1x128xf32, #tpu.memory_space<vmem>>, %arg9: memref<1x8x128xf32, #tpu.memory_space<vmem>>) attributes {dimension_semantics = [#tpu.dimension_semantics<parallel>], iteration_bounds = array<i64: 2>, scalar_prefetch = 0 : i64, scratch_operands = 0 : i64, tpu.core_type = #tpu.core_type<tc>, window_params = [{transform_indices = @transform_0, window_bounds = array<i64: 1, 8, 128>}, {transform_indices = @transform_1, window_bounds = array<i64: 1, 1, 8>}, {pipeline_mode = #tpu.pipeline_mode<synchronous>, transform_indices = @transform_2, window_bounds = array<i64: 128, 384>}, {pipeline_mode = #tpu.pipeline_mode<synchronous>, transform_indices = @transform_3, window_bounds = array<i64: 128, 128>}, {pipeline_mode = #tpu.pipeline_mode<synchronous>, transform_indices = @transform_4, window_bounds = array<i64: 128, 512>}, {pipeline_mode = #tpu.pipeline_mode<synchronous>, transform_indices = @transform_5, window_bounds = array<i64: 1, 512>}, {pipeline_mode = #tpu.pipeline_mode<synchronous>, transform_indices = @transform_6, window_bounds = array<i64: 512, 128>}, {pipeline_mode = #tpu.pipeline_mode<synchronous>, transform_indices = @transform_7, window_bounds = array<i64: 1, 128>}, {transform_indices = @transform_8, window_bounds = array<i64: 1, 8, 128>}]} {
    %c0 = arith.constant 0 : index
    %c0_0 = arith.constant 0 : index
    %c0_1 = arith.constant 0 : index
    %0 = vector.load %arg1[%c0, %c0_0, %c0_1] : memref<1x8x128xf32, #tpu.memory_space<vmem>>, vector<1x8x128xf32>
    %1 = vector.shape_cast %0 : vector<1x8x128xf32> to vector<8x128xf32>
    %2 = arith.truncf %1 : vector<8x128xf32> to vector<8x128xbf16>
    %c0_2 = arith.constant 0 : index
    %c0_3 = arith.constant 0 : index
    %3 = vector.load %arg3[%c0_2, %c0_3] : memref<128x384xbf16, #tpu.memory_space<vmem>>, vector<128x384xbf16>
    %cst = arith.constant dense<0.000000e+00> : vector<8x384xf32>
    %4 = tpu.matmul %2, %3, %cst {dimension_numbers = #tpu.dot_dimension_numbers<[1], [0], [0], [1], [0, 0, 1, 1], [], []>} : vector<8x128xbf16>, vector<128x384xbf16>, vector<8x384xf32> -> vector<8x384xf32>
    %5 = vector.extract_strided_slice %4 {offsets = [0, 0], sizes = [8, 128], strides = [1, 1]} : vector<8x384xf32> to vector<8x128xf32>
    %6 = vector.extract_strided_slice %4 {offsets = [0, 128], sizes = [8, 128], strides = [1, 1]} : vector<8x384xf32> to vector<8x128xf32>
    %7 = vector.extract_strided_slice %4 {offsets = [0, 256], sizes = [8, 128], strides = [1, 1]} : vector<8x384xf32> to vector<8x128xf32>
    %8 = arith.truncf %5 : vector<8x128xf32> to vector<8x128xbf16>
    %9 = arith.truncf %6 : vector<8x128xf32> to vector<8x128xbf16>
    "tpu.trace_start"() <{level = 10 : i32, message = "qd,kd->qk"}> : () -> ()
    %cst_4 = arith.constant dense<0.000000e+00> : vector<8x8xf32>
    %10 = tpu.matmul %8, %9, %cst_4 {dimension_numbers = #tpu.dot_dimension_numbers<[1], [1], [0], [0], [0, 0, 1, 0], [], []>} : vector<8x128xbf16>, vector<8x128xbf16>, vector<8x8xf32> -> vector<8x8xf32>
    "tpu.trace_stop"() : () -> ()
    %c0_5 = arith.constant 0 : index
    %c0_6 = arith.constant 0 : index
    %c0_7 = arith.constant 0 : index
    %11 = vector.load %arg2[%c0_5, %c0_6, %c0_7] : memref<1x1x8xf32, #tpu.memory_space<vmem>>, vector<1x1x8xf32>
    %12 = vector.shape_cast %11 : vector<1x1x8xf32> to vector<1x8xf32>
    %13 = vector.broadcast %12 : vector<1x8xf32> to vector<8x8xf32>
    %14 = arith.addf %10, %13 : vector<8x8xf32>
    %cst_8 = arith.constant dense<0xFF800000> : vector<8xf32>
    %15 = vector.multi_reduction <maximumf>, %14, %cst_8 [1] : vector<8x8xf32> to vector<8xf32>
    %16 = vector.shape_cast %15 : vector<8xf32> to vector<8x1xf32>
    %17 = vector.broadcast %16 : vector<8x1xf32> to vector<8x8xf32>
    %18 = arith.subf %14, %17 : vector<8x8xf32>
    %19 = math.exp %18 : vector<8x8xf32>
    %cst_9 = arith.constant dense<0.000000e+00> : vector<8xf32>
    %20 = vector.multi_reduction <add>, %19, %cst_9 [1] : vector<8x8xf32> to vector<8xf32>
    %21 = vector.shape_cast %20 : vector<8xf32> to vector<8x1xf32>
    %22 = tpu.reciprocal %21 {approx = true} : vector<8x1xf32> -> vector<8x1xf32>
    %23 = vector.broadcast %22 : vector<8x1xf32> to vector<8x8xf32>
    %24 = arith.mulf %19, %23 : vector<8x8xf32>
    %25 = arith.truncf %24 : vector<8x8xf32> to vector<8x8xbf16>
    %26 = arith.truncf %7 : vector<8x128xf32> to vector<8x128xbf16>
    %cst_10 = arith.constant dense<0.000000e+00> : vector<8x128xf32>
    %27 = tpu.matmul %25, %26, %cst_10 {dimension_numbers = #tpu.dot_dimension_numbers<[1], [0], [0], [1], [0, 0, 1, 1], [], []>} : vector<8x8xbf16>, vector<8x128xbf16>, vector<8x128xf32> -> vector<8x128xf32>
    %28 = arith.truncf %27 : vector<8x128xf32> to vector<8x128xbf16>
    %c0_11 = arith.constant 0 : index
    %c0_12 = arith.constant 0 : index
    %29 = vector.load %arg4[%c0_11, %c0_12] : memref<128x128xbf16, #tpu.memory_space<vmem>>, vector<128x128xbf16>
    %cst_13 = arith.constant dense<0.000000e+00> : vector<8x128xf32>
    %30 = tpu.matmul %28, %29, %cst_13 {dimension_numbers = #tpu.dot_dimension_numbers<[1], [0], [0], [1], [0, 0, 1, 1], [], []>} : vector<8x128xbf16>, vector<128x128xbf16>, vector<8x128xf32> -> vector<8x128xf32>
    %31 = arith.addf %1, %30 : vector<8x128xf32>
    %cst_14 = arith.constant dense<0.000000e+00> : vector<8xf32>
    %32 = vector.multi_reduction <add>, %31, %cst_14 [1] : vector<8x128xf32> to vector<8xf32>
    %33 = vector.shape_cast %32 : vector<8xf32> to vector<8x1xf32>
    %cst_15 = arith.constant 1.280000e+02 : f32
    %34 = vector.broadcast %cst_15 : f32 to vector<8x1xf32>
    %35 = arith.divf %33, %34 : vector<8x1xf32>
    %36 = vector.broadcast %35 : vector<8x1xf32> to vector<8x128xf32>
    %37 = arith.subf %31, %36 : vector<8x128xf32>
    %38 = arith.mulf %37, %37 : vector<8x128xf32>
    %cst_16 = arith.constant dense<0.000000e+00> : vector<8xf32>
    %39 = vector.multi_reduction <add>, %38, %cst_16 [1] : vector<8x128xf32> to vector<8xf32>
    %40 = vector.shape_cast %39 : vector<8xf32> to vector<8x1xf32>
    %cst_17 = arith.constant 1.280000e+02 : f32
    %41 = vector.broadcast %cst_17 : f32 to vector<8x1xf32>
    %42 = arith.divf %40, %41 : vector<8x1xf32>
    %43 = vector.broadcast %35 : vector<8x1xf32> to vector<8x128xf32>
    %44 = arith.subf %31, %43 : vector<8x128xf32>
    %cst_18 = arith.constant 9.99999996E-13 : f32
    %45 = vector.broadcast %cst_18 : f32 to vector<8x1xf32>
    %46 = arith.addf %42, %45 : vector<8x1xf32>
    %47 = math.rsqrt %46 : vector<8x1xf32>
    %48 = vector.broadcast %47 : vector<8x1xf32> to vector<8x128xf32>
    %49 = arith.mulf %44, %48 : vector<8x128xf32>
    %50 = arith.truncf %49 : vector<8x128xf32> to vector<8x128xbf16>
    %c0_19 = arith.constant 0 : index
    %c0_20 = arith.constant 0 : index
    %51 = vector.load %arg5[%c0_19, %c0_20] : memref<128x512xbf16, #tpu.memory_space<vmem>>, vector<128x512xbf16>
    %cst_21 = arith.constant dense<0.000000e+00> : vector<8x512xf32>
    %52 = tpu.matmul %50, %51, %cst_21 {dimension_numbers = #tpu.dot_dimension_numbers<[1], [0], [0], [1], [0, 0, 1, 1], [], []>} : vector<8x128xbf16>, vector<128x512xbf16>, vector<8x512xf32> -> vector<8x512xf32>
    %c0_22 = arith.constant 0 : index
    %c0_23 = arith.constant 0 : index
    %53 = vector.load %arg6[%c0_22, %c0_23] : memref<1x512xf32, #tpu.memory_space<vmem>>, vector<1x512xf32>
    %54 = vector.broadcast %53 : vector<1x512xf32> to vector<8x512xf32>
    %55 = arith.addf %52, %54 : vector<8x512xf32>
    %56 = arith.mulf %55, %55 : vector<8x512xf32>
    %57 = arith.mulf %55, %56 : vector<8x512xf32>
    %cst_24 = arith.constant 4.471500e-02 : f32
    %58 = vector.broadcast %cst_24 : f32 to vector<8x512xf32>
    %59 = arith.mulf %58, %57 : vector<8x512xf32>
    %60 = arith.addf %55, %59 : vector<8x512xf32>
    %cst_25 = arith.constant 0.797884583 : f32
    %61 = vector.broadcast %cst_25 : f32 to vector<8x512xf32>
    %62 = arith.mulf %61, %60 : vector<8x512xf32>
    %63 = math.tanh %62 : vector<8x512xf32>
    %cst_26 = arith.constant 1.000000e+00 : f32
    %64 = vector.broadcast %cst_26 : f32 to vector<8x512xf32>
    %65 = arith.addf %64, %63 : vector<8x512xf32>
    %cst_27 = arith.constant 5.000000e-01 : f32
    %66 = vector.broadcast %cst_27 : f32 to vector<8x512xf32>
    %67 = arith.mulf %66, %65 : vector<8x512xf32>
    %68 = arith.mulf %55, %67 : vector<8x512xf32>
    %69 = arith.truncf %68 : vector<8x512xf32> to vector<8x512xbf16>
    %c0_28 = arith.constant 0 : index
    %c0_29 = arith.constant 0 : index
    %70 = vector.load %arg7[%c0_28, %c0_29] : memref<512x128xbf16, #tpu.memory_space<vmem>>, vector<512x128xbf16>
    %cst_30 = arith.constant dense<0.000000e+00> : vector<8x128xf32>
    %71 = tpu.matmul %69, %70, %cst_30 {dimension_numbers = #tpu.dot_dimension_numbers<[1], [0], [0], [1], [0, 0, 1, 1], [], []>} : vector<8x512xbf16>, vector<512x128xbf16>, vector<8x128xf32> -> vector<8x128xf32>
    %c0_31 = arith.constant 0 : index
    %c0_32 = arith.constant 0 : index
    %72 = vector.load %arg8[%c0_31, %c0_32] : memref<1x128xf32, #tpu.memory_space<vmem>>, vector<1x128xf32>
    %73 = vector.broadcast %72 : vector<1x128xf32> to vector<8x128xf32>
    %74 = arith.addf %71, %73 : vector<8x128xf32>
    %75 = arith.addf %49, %74 : vector<8x128xf32>
    %cst_33 = arith.constant dense<0.000000e+00> : vector<8xf32>
    %76 = vector.multi_reduction <add>, %75, %cst_33 [1] : vector<8x128xf32> to vector<8xf32>
    %77 = vector.shape_cast %76 : vector<8xf32> to vector<8x1xf32>
    %cst_34 = arith.constant 1.280000e+02 : f32
    %78 = vector.broadcast %cst_34 : f32 to vector<8x1xf32>
    %79 = arith.divf %77, %78 : vector<8x1xf32>
    %80 = vector.broadcast %79 : vector<8x1xf32> to vector<8x128xf32>
    %81 = arith.subf %75, %80 : vector<8x128xf32>
    %82 = arith.mulf %81, %81 : vector<8x128xf32>
    %cst_35 = arith.constant dense<0.000000e+00> : vector<8xf32>
    %83 = vector.multi_reduction <add>, %82, %cst_35 [1] : vector<8x128xf32> to vector<8xf32>
    %84 = vector.shape_cast %83 : vector<8xf32> to vector<8x1xf32>
    %cst_36 = arith.constant 1.280000e+02 : f32
    %85 = vector.broadcast %cst_36 : f32 to vector<8x1xf32>
    %86 = arith.divf %84, %85 : vector<8x1xf32>
    %87 = vector.broadcast %79 : vector<8x1xf32> to vector<8x128xf32>
    %88 = arith.subf %75, %87 : vector<8x128xf32>
    %cst_37 = arith.constant 9.99999996E-13 : f32
    %89 = vector.broadcast %cst_37 : f32 to vector<8x1xf32>
    %90 = arith.addf %86, %89 : vector<8x1xf32>
    %91 = math.rsqrt %90 : vector<8x1xf32>
    %92 = vector.broadcast %91 : vector<8x1xf32> to vector<8x128xf32>
    %93 = arith.mulf %88, %92 : vector<8x128xf32>
    %c0_38 = arith.constant 0 : index
    %c0_39 = arith.constant 0 : index
    %c0_40 = arith.constant 0 : index
    %94 = vector.load %arg9[%c0_38, %c0_39, %c0_40] : memref<1x8x128xf32, #tpu.memory_space<vmem>>, vector<1x8x128xf32>
    %95 = vector.shape_cast %94 : vector<1x8x128xf32> to vector<8x128xf32>
    %96 = vector.shape_cast %93 : vector<8x128xf32> to vector<1x8x128xf32>
    tpu.vector_store %arg9[%c0_38, %c0_39, %c0_40], %96 {strides = array<i32>} : memref<1x8x128xf32, #tpu.memory_space<vmem>>, vector<1x8x128xf32>,
    return
  }
  func.func @transform_0(%arg0: i32) -> (i32, i32, i32) {
    %c0_i32 = arith.constant 0 : i32
    %c0_i32_0 = arith.constant 0 : i32
    %c0_i32_1 = arith.constant 0 : i32
    return %arg0, %c0_i32, %c0_i32_0 : i32, i32, i32
  }
  func.func @transform_1(%arg0: i32) -> (i32, i32, i32) {
    %c0_i32 = arith.constant 0 : i32
    %c0_i32_0 = arith.constant 0 : i32
    %c0_i32_1 = arith.constant 0 : i32
    return %arg0, %c0_i32, %c0_i32_0 : i32, i32, i32
  }
  func.func @transform_2(%arg0: i32) -> (i32, i32) {
    %c0_i32 = arith.constant 0 : i32
    %c0_i32_0 = arith.constant 0 : i32
    %c0_i32_1 = arith.constant 0 : i32
    return %c0_i32, %c0_i32_0 : i32, i32
  }
  func.func @transform_3(%arg0: i32) -> (i32, i32) {
    %c0_i32 = arith.constant 0 : i32
    %c0_i32_0 = arith.constant 0 : i32
    %c0_i32_1 = arith.constant 0 : i32
    return %c0_i32, %c0_i32_0 : i32, i32
  }
  func.func @transform_4(%arg0: i32) -> (i32, i32) {
    %c0_i32 = arith.constant 0 : i32
    %c0_i32_0 = arith.constant 0 : i32
    %c0_i32_1 = arith.constant 0 : i32
    return %c0_i32, %c0_i32_0 : i32, i32
  }
  func.func @transform_5(%arg0: i32) -> (i32, i32) {
    %c0_i32 = arith.constant 0 : i32
    %c0_i32_0 = arith.constant 0 : i32
    %c0_i32_1 = arith.constant 0 : i32
    return %c0_i32, %c0_i32_0 : i32, i32
  }
  func.func @transform_6(%arg0: i32) -> (i32, i32) {
    %c0_i32 = arith.constant 0 : i32
    %c0_i32_0 = arith.constant 0 : i32
    %c0_i32_1 = arith.constant 0 : i32
    return %c0_i32, %c0_i32_0 : i32, i32
  }
  func.func @transform_7(%arg0: i32) -> (i32, i32) {
    %c0_i32 = arith.constant 0 : i32
    %c0_i32_0 = arith.constant 0 : i32
    %c0_i32_1 = arith.constant 0 : i32
    return %c0_i32, %c0_i32_0 : i32, i32
  }
  func.func @transform_8(%arg0: i32) -> (i32, i32, i32) {
    %c0_i32 = arith.constant 0 : i32
    %c0_i32_0 = arith.constant 0 : i32
    %c0_i32_1 = arith.constant 0 : i32
    return %arg0, %c0_i32, %c0_i32_0 : i32, i32, i32
  }
}

module attributes {stable_mosaic.version = 11 : i64} {
  func.func @lstm_gates_kernel(%arg0: i32, %arg1: memref<2x8x128xf32, #tpu.memory_space<vmem>>, %arg2: memref<128x512xbf16, #tpu.memory_space<vmem>>, %arg3: memref<1x512xf32, #tpu.memory_space<vmem>>, %arg4: memref<2x8x512xf32, #tpu.memory_space<vmem>>) attributes {dimension_semantics = [#tpu.dimension_semantics<parallel>], iteration_bounds = array<i64: 1>, scalar_prefetch = 0 : i64, scratch_operands = 0 : i64, tpu.core_type = #tpu.core_type<tc>, window_params = [{transform_indices = @transform_0, window_bounds = array<i64: 2, 8, 128>}, {pipeline_mode = #tpu.pipeline_mode<synchronous>, transform_indices = @transform_1, window_bounds = array<i64: 128, 512>}, {pipeline_mode = #tpu.pipeline_mode<synchronous>, transform_indices = @transform_2, window_bounds = array<i64: 1, 512>}, {transform_indices = @transform_3, window_bounds = array<i64: 2, 8, 512>}]} {
    %c0 = arith.constant 0 : index
    %c0_0 = arith.constant 0 : index
    %c0_1 = arith.constant 0 : index
    %0 = vector.load %arg1[%c0, %c0_0, %c0_1] : memref<2x8x128xf32, #tpu.memory_space<vmem>>, vector<2x8x128xf32>
    %1 = arith.truncf %0 : vector<2x8x128xf32> to vector<2x8x128xbf16>
    %c0_2 = arith.constant 0 : index
    %c0_3 = arith.constant 0 : index
    %2 = vector.load %arg2[%c0_2, %c0_3] : memref<128x512xbf16, #tpu.memory_space<vmem>>, vector<128x512xbf16>
    "tpu.trace_start"() <{level = 10 : i32, message = "btd,dg->btg"}> : () -> ()
    %cst = arith.constant dense<0.000000e+00> : vector<2x8x512xf32>
    %3 = tpu.matmul %1, %2, %cst {dimension_numbers = #tpu.dot_dimension_numbers<[2], [0], [0, 1], [1], [0, 0, 0, 1, 1, 1], [], []>} : vector<2x8x128xbf16>, vector<128x512xbf16>, vector<2x8x512xf32> -> vector<2x8x512xf32>
    "tpu.trace_stop"() : () -> ()
    %c0_4 = arith.constant 0 : index
    %c0_5 = arith.constant 0 : index
    %4 = vector.load %arg3[%c0_4, %c0_5] : memref<1x512xf32, #tpu.memory_space<vmem>>, vector<1x512xf32>
    %5 = vector.shape_cast %4 : vector<1x512xf32> to vector<1x1x512xf32>
    %6 = vector.broadcast %5 : vector<1x1x512xf32> to vector<2x8x512xf32>
    %7 = arith.addf %3, %6 : vector<2x8x512xf32>
    %c0_6 = arith.constant 0 : index
    %c0_7 = arith.constant 0 : index
    %c0_8 = arith.constant 0 : index
    %8 = vector.load %arg4[%c0_6, %c0_7, %c0_8] : memref<2x8x512xf32, #tpu.memory_space<vmem>>, vector<2x8x512xf32>
    tpu.vector_store %arg4[%c0_6, %c0_7, %c0_8], %7 {strides = array<i32>} : memref<2x8x512xf32, #tpu.memory_space<vmem>>, vector<2x8x512xf32>,
    return
  }
  func.func @transform_0(%arg0: i32) -> (i32, i32, i32) {
    %c0_i32 = arith.constant 0 : i32
    %c0_i32_0 = arith.constant 0 : i32
    %c0_i32_1 = arith.constant 0 : i32
    return %c0_i32, %arg0, %c0_i32_0 : i32, i32, i32
  }
  func.func @transform_1(%arg0: i32) -> (i32, i32) {
    %c0_i32 = arith.constant 0 : i32
    %c0_i32_0 = arith.constant 0 : i32
    %c0_i32_1 = arith.constant 0 : i32
    return %c0_i32, %c0_i32_0 : i32, i32
  }
  func.func @transform_2(%arg0: i32) -> (i32, i32) {
    %c0_i32 = arith.constant 0 : i32
    %c0_i32_0 = arith.constant 0 : i32
    %c0_i32_1 = arith.constant 0 : i32
    return %c0_i32, %c0_i32_0 : i32, i32
  }
  func.func @transform_3(%arg0: i32) -> (i32, i32, i32) {
    %c0_i32 = arith.constant 0 : i32
    %c0_i32_0 = arith.constant 0 : i32
    %c0_i32_1 = arith.constant 0 : i32
    return %c0_i32, %arg0, %c0_i32_0 : i32, i32, i32
  }
}

module attributes {stable_mosaic.version = 11 : i64} {
  func.func @lstm_rec_kernel(%arg0: i32, %arg1: memref<2x8x512xf32, #tpu.memory_space<vmem>>, %arg2: memref<128x512xbf16, #tpu.memory_space<vmem>>, %arg3: memref<128x128xbf16, #tpu.memory_space<vmem>>, %arg4: memref<1x128xf32, #tpu.memory_space<vmem>>, %arg5: memref<2x128xf32, #tpu.memory_space<vmem>>, %arg6: memref<2x128xf32, #tpu.memory_space<vmem>>, %arg7: memref<2x128xf32, #tpu.memory_space<vmem>>) attributes {dimension_semantics = [#tpu.dimension_semantics<arbitrary>], iteration_bounds = array<i64: 1>, scalar_prefetch = 0 : i64, scratch_operands = 2 : i64, tpu.core_type = #tpu.core_type<tc>, window_params = [{transform_indices = @transform_0, window_bounds = array<i64: 2, 8, 512>}, {pipeline_mode = #tpu.pipeline_mode<synchronous>, transform_indices = @transform_1, window_bounds = array<i64: 128, 512>}, {pipeline_mode = #tpu.pipeline_mode<synchronous>, transform_indices = @transform_2, window_bounds = array<i64: 128, 128>}, {pipeline_mode = #tpu.pipeline_mode<synchronous>, transform_indices = @transform_3, window_bounds = array<i64: 1, 128>}, {pipeline_mode = #tpu.pipeline_mode<synchronous>, transform_indices = @transform_4, window_bounds = array<i64: 2, 128>}]} {
    %c0_i32 = arith.constant 0 : i32
    %0 = arith.cmpi eq, %arg0, %c0_i32 : i32
    %1 = arith.extui %0 : i1 to i32
    %c0_i32_0 = arith.constant 0 : i32
    %2 = arith.cmpi ne, %1, %c0_i32_0 : i32
    scf.if %2 {
      %cst_30 = arith.constant 0.000000e+00 : f32
      %180 = vector.broadcast %cst_30 : f32 to vector<2x128xf32>
      %c0_31 = arith.constant 0 : index
      %c0_32 = arith.constant 0 : index
      %181 = vector.load %arg6[%c0_31, %c0_32] : memref<2x128xf32, #tpu.memory_space<vmem>>, vector<2x128xf32>
      tpu.vector_store %arg6[%c0_31, %c0_32], %180 {strides = array<i32>} : memref<2x128xf32, #tpu.memory_space<vmem>>, vector<2x128xf32>,
      %cst_33 = arith.constant 0.000000e+00 : f32
      %182 = vector.broadcast %cst_33 : f32 to vector<2x128xf32>
      %c0_34 = arith.constant 0 : index
      %c0_35 = arith.constant 0 : index
      %183 = vector.load %arg7[%c0_34, %c0_35] : memref<2x128xf32, #tpu.memory_space<vmem>>, vector<2x128xf32>
      tpu.vector_store %arg7[%c0_34, %c0_35], %182 {strides = array<i32>} : memref<2x128xf32, #tpu.memory_space<vmem>>, vector<2x128xf32>,
    } else {
    }
    %c0 = arith.constant 0 : index
    %c0_1 = arith.constant 0 : index
    %c0_2 = arith.constant 0 : index
    %3 = vector.load %arg1[%c0, %c0_1, %c0_2] : memref<2x8x512xf32, #tpu.memory_space<vmem>>, vector<2x8x512xf32>
    %c0_3 = arith.constant 0 : index
    %c0_4 = arith.constant 0 : index
    %4 = vector.load %arg2[%c0_3, %c0_4] : memref<128x512xbf16, #tpu.memory_space<vmem>>, vector<128x512xbf16>
    %c0_5 = arith.constant 0 : index
    %c0_6 = arith.constant 0 : index
    %5 = vector.load %arg6[%c0_5, %c0_6] : memref<2x128xf32, #tpu.memory_space<vmem>>, vector<2x128xf32>
    %c0_7 = arith.constant 0 : index
    %c0_8 = arith.constant 0 : index
    %6 = vector.load %arg7[%c0_7, %c0_8] : memref<2x128xf32, #tpu.memory_space<vmem>>, vector<2x128xf32>
    %7 = vector.extract_strided_slice %3 {offsets = [0, 0, 0], sizes = [2, 1, 512], strides = [1, 1, 1]} : vector<2x8x512xf32> to vector<2x1x512xf32>
    %8 = vector.shape_cast %7 : vector<2x1x512xf32> to vector<2x512xf32>
    %9 = arith.truncf %5 : vector<2x128xf32> to vector<2x128xbf16>
    %cst = arith.constant dense<0.000000e+00> : vector<2x512xf32>
    %10 = tpu.matmul %9, %4, %cst {dimension_numbers = #tpu.dot_dimension_numbers<[1], [0], [0], [1], [0, 0, 1, 1], [], []>} : vector<2x128xbf16>, vector<128x512xbf16>, vector<2x512xf32> -> vector<2x512xf32>
    %11 = arith.addf %8, %10 : vector<2x512xf32>
    %12 = vector.extract_strided_slice %11 {offsets = [0, 0], sizes = [2, 384], strides = [1, 1]} : vector<2x512xf32> to vector<2x384xf32>
    %13 = arith.negf %12 : vector<2x384xf32>
    %14 = math.exp %13 : vector<2x384xf32>
    %cst_9 = arith.constant 1.000000e+00 : f32
    %15 = vector.broadcast %cst_9 : f32 to vector<2x384xf32>
    %16 = arith.addf %15, %14 : vector<2x384xf32>
    %17 = arith.divf %15, %16 : vector<2x384xf32>
    %18 = vector.extract_strided_slice %17 {offsets = [0, 0], sizes = [2, 128], strides = [1, 1]} : vector<2x384xf32> to vector<2x128xf32>
    %19 = vector.extract_strided_slice %17 {offsets = [0, 128], sizes = [2, 128], strides = [1, 1]} : vector<2x384xf32> to vector<2x128xf32>
    %20 = vector.extract_strided_slice %17 {offsets = [0, 256], sizes = [2, 128], strides = [1, 1]} : vector<2x384xf32> to vector<2x128xf32>
    %21 = vector.extract_strided_slice %11 {offsets = [0, 384], sizes = [2, 128], strides = [1, 1]} : vector<2x512xf32> to vector<2x128xf32>
    %22 = math.tanh %21 : vector<2x128xf32>
    %23 = arith.mulf %19, %6 : vector<2x128xf32>
    %24 = arith.mulf %18, %22 : vector<2x128xf32>
    %25 = arith.addf %23, %24 : vector<2x128xf32>
    %26 = math.tanh %25 : vector<2x128xf32>
    %27 = arith.mulf %20, %26 : vector<2x128xf32>
    %28 = vector.extract_strided_slice %3 {offsets = [0, 1, 0], sizes = [2, 1, 512], strides = [1, 1, 1]} : vector<2x8x512xf32> to vector<2x1x512xf32>
    %29 = vector.shape_cast %28 : vector<2x1x512xf32> to vector<2x512xf32>
    %30 = arith.truncf %27 : vector<2x128xf32> to vector<2x128xbf16>
    %cst_10 = arith.constant dense<0.000000e+00> : vector<2x512xf32>
    %31 = tpu.matmul %30, %4, %cst_10 {dimension_numbers = #tpu.dot_dimension_numbers<[1], [0], [0], [1], [0, 0, 1, 1], [], []>} : vector<2x128xbf16>, vector<128x512xbf16>, vector<2x512xf32> -> vector<2x512xf32>
    %32 = arith.addf %29, %31 : vector<2x512xf32>
    %33 = vector.extract_strided_slice %32 {offsets = [0, 0], sizes = [2, 384], strides = [1, 1]} : vector<2x512xf32> to vector<2x384xf32>
    %34 = arith.negf %33 : vector<2x384xf32>
    %35 = math.exp %34 : vector<2x384xf32>
    %cst_11 = arith.constant 1.000000e+00 : f32
    %36 = vector.broadcast %cst_11 : f32 to vector<2x384xf32>
    %37 = arith.addf %36, %35 : vector<2x384xf32>
    %38 = arith.divf %36, %37 : vector<2x384xf32>
    %39 = vector.extract_strided_slice %38 {offsets = [0, 0], sizes = [2, 128], strides = [1, 1]} : vector<2x384xf32> to vector<2x128xf32>
    %40 = vector.extract_strided_slice %38 {offsets = [0, 128], sizes = [2, 128], strides = [1, 1]} : vector<2x384xf32> to vector<2x128xf32>
    %41 = vector.extract_strided_slice %38 {offsets = [0, 256], sizes = [2, 128], strides = [1, 1]} : vector<2x384xf32> to vector<2x128xf32>
    %42 = vector.extract_strided_slice %32 {offsets = [0, 384], sizes = [2, 128], strides = [1, 1]} : vector<2x512xf32> to vector<2x128xf32>
    %43 = math.tanh %42 : vector<2x128xf32>
    %44 = arith.mulf %40, %25 : vector<2x128xf32>
    %45 = arith.mulf %39, %43 : vector<2x128xf32>
    %46 = arith.addf %44, %45 : vector<2x128xf32>
    %47 = math.tanh %46 : vector<2x128xf32>
    %48 = arith.mulf %41, %47 : vector<2x128xf32>
    %49 = vector.extract_strided_slice %3 {offsets = [0, 2, 0], sizes = [2, 1, 512], strides = [1, 1, 1]} : vector<2x8x512xf32> to vector<2x1x512xf32>
    %50 = vector.shape_cast %49 : vector<2x1x512xf32> to vector<2x512xf32>
    %51 = arith.truncf %48 : vector<2x128xf32> to vector<2x128xbf16>
    %cst_12 = arith.constant dense<0.000000e+00> : vector<2x512xf32>
    %52 = tpu.matmul %51, %4, %cst_12 {dimension_numbers = #tpu.dot_dimension_numbers<[1], [0], [0], [1], [0, 0, 1, 1], [], []>} : vector<2x128xbf16>, vector<128x512xbf16>, vector<2x512xf32> -> vector<2x512xf32>
    %53 = arith.addf %50, %52 : vector<2x512xf32>
    %54 = vector.extract_strided_slice %53 {offsets = [0, 0], sizes = [2, 384], strides = [1, 1]} : vector<2x512xf32> to vector<2x384xf32>
    %55 = arith.negf %54 : vector<2x384xf32>
    %56 = math.exp %55 : vector<2x384xf32>
    %cst_13 = arith.constant 1.000000e+00 : f32
    %57 = vector.broadcast %cst_13 : f32 to vector<2x384xf32>
    %58 = arith.addf %57, %56 : vector<2x384xf32>
    %59 = arith.divf %57, %58 : vector<2x384xf32>
    %60 = vector.extract_strided_slice %59 {offsets = [0, 0], sizes = [2, 128], strides = [1, 1]} : vector<2x384xf32> to vector<2x128xf32>
    %61 = vector.extract_strided_slice %59 {offsets = [0, 128], sizes = [2, 128], strides = [1, 1]} : vector<2x384xf32> to vector<2x128xf32>
    %62 = vector.extract_strided_slice %59 {offsets = [0, 256], sizes = [2, 128], strides = [1, 1]} : vector<2x384xf32> to vector<2x128xf32>
    %63 = vector.extract_strided_slice %53 {offsets = [0, 384], sizes = [2, 128], strides = [1, 1]} : vector<2x512xf32> to vector<2x128xf32>
    %64 = math.tanh %63 : vector<2x128xf32>
    %65 = arith.mulf %61, %46 : vector<2x128xf32>
    %66 = arith.mulf %60, %64 : vector<2x128xf32>
    %67 = arith.addf %65, %66 : vector<2x128xf32>
    %68 = math.tanh %67 : vector<2x128xf32>
    %69 = arith.mulf %62, %68 : vector<2x128xf32>
    %70 = vector.extract_strided_slice %3 {offsets = [0, 3, 0], sizes = [2, 1, 512], strides = [1, 1, 1]} : vector<2x8x512xf32> to vector<2x1x512xf32>
    %71 = vector.shape_cast %70 : vector<2x1x512xf32> to vector<2x512xf32>
    %72 = arith.truncf %69 : vector<2x128xf32> to vector<2x128xbf16>
    %cst_14 = arith.constant dense<0.000000e+00> : vector<2x512xf32>
    %73 = tpu.matmul %72, %4, %cst_14 {dimension_numbers = #tpu.dot_dimension_numbers<[1], [0], [0], [1], [0, 0, 1, 1], [], []>} : vector<2x128xbf16>, vector<128x512xbf16>, vector<2x512xf32> -> vector<2x512xf32>
    %74 = arith.addf %71, %73 : vector<2x512xf32>
    %75 = vector.extract_strided_slice %74 {offsets = [0, 0], sizes = [2, 384], strides = [1, 1]} : vector<2x512xf32> to vector<2x384xf32>
    %76 = arith.negf %75 : vector<2x384xf32>
    %77 = math.exp %76 : vector<2x384xf32>
    %cst_15 = arith.constant 1.000000e+00 : f32
    %78 = vector.broadcast %cst_15 : f32 to vector<2x384xf32>
    %79 = arith.addf %78, %77 : vector<2x384xf32>
    %80 = arith.divf %78, %79 : vector<2x384xf32>
    %81 = vector.extract_strided_slice %80 {offsets = [0, 0], sizes = [2, 128], strides = [1, 1]} : vector<2x384xf32> to vector<2x128xf32>
    %82 = vector.extract_strided_slice %80 {offsets = [0, 128], sizes = [2, 128], strides = [1, 1]} : vector<2x384xf32> to vector<2x128xf32>
    %83 = vector.extract_strided_slice %80 {offsets = [0, 256], sizes = [2, 128], strides = [1, 1]} : vector<2x384xf32> to vector<2x128xf32>
    %84 = vector.extract_strided_slice %74 {offsets = [0, 384], sizes = [2, 128], strides = [1, 1]} : vector<2x512xf32> to vector<2x128xf32>
    %85 = math.tanh %84 : vector<2x128xf32>
    %86 = arith.mulf %82, %67 : vector<2x128xf32>
    %87 = arith.mulf %81, %85 : vector<2x128xf32>
    %88 = arith.addf %86, %87 : vector<2x128xf32>
    %89 = math.tanh %88 : vector<2x128xf32>
    %90 = arith.mulf %83, %89 : vector<2x128xf32>
    %91 = vector.extract_strided_slice %3 {offsets = [0, 4, 0], sizes = [2, 1, 512], strides = [1, 1, 1]} : vector<2x8x512xf32> to vector<2x1x512xf32>
    %92 = vector.shape_cast %91 : vector<2x1x512xf32> to vector<2x512xf32>
    %93 = arith.truncf %90 : vector<2x128xf32> to vector<2x128xbf16>
    %cst_16 = arith.constant dense<0.000000e+00> : vector<2x512xf32>
    %94 = tpu.matmul %93, %4, %cst_16 {dimension_numbers = #tpu.dot_dimension_numbers<[1], [0], [0], [1], [0, 0, 1, 1], [], []>} : vector<2x128xbf16>, vector<128x512xbf16>, vector<2x512xf32> -> vector<2x512xf32>
    %95 = arith.addf %92, %94 : vector<2x512xf32>
    %96 = vector.extract_strided_slice %95 {offsets = [0, 0], sizes = [2, 384], strides = [1, 1]} : vector<2x512xf32> to vector<2x384xf32>
    %97 = arith.negf %96 : vector<2x384xf32>
    %98 = math.exp %97 : vector<2x384xf32>
    %cst_17 = arith.constant 1.000000e+00 : f32
    %99 = vector.broadcast %cst_17 : f32 to vector<2x384xf32>
    %100 = arith.addf %99, %98 : vector<2x384xf32>
    %101 = arith.divf %99, %100 : vector<2x384xf32>
    %102 = vector.extract_strided_slice %101 {offsets = [0, 0], sizes = [2, 128], strides = [1, 1]} : vector<2x384xf32> to vector<2x128xf32>
    %103 = vector.extract_strided_slice %101 {offsets = [0, 128], sizes = [2, 128], strides = [1, 1]} : vector<2x384xf32> to vector<2x128xf32>
    %104 = vector.extract_strided_slice %101 {offsets = [0, 256], sizes = [2, 128], strides = [1, 1]} : vector<2x384xf32> to vector<2x128xf32>
    %105 = vector.extract_strided_slice %95 {offsets = [0, 384], sizes = [2, 128], strides = [1, 1]} : vector<2x512xf32> to vector<2x128xf32>
    %106 = math.tanh %105 : vector<2x128xf32>
    %107 = arith.mulf %103, %88 : vector<2x128xf32>
    %108 = arith.mulf %102, %106 : vector<2x128xf32>
    %109 = arith.addf %107, %108 : vector<2x128xf32>
    %110 = math.tanh %109 : vector<2x128xf32>
    %111 = arith.mulf %104, %110 : vector<2x128xf32>
    %112 = vector.extract_strided_slice %3 {offsets = [0, 5, 0], sizes = [2, 1, 512], strides = [1, 1, 1]} : vector<2x8x512xf32> to vector<2x1x512xf32>
    %113 = vector.shape_cast %112 : vector<2x1x512xf32> to vector<2x512xf32>
    %114 = arith.truncf %111 : vector<2x128xf32> to vector<2x128xbf16>
    %cst_18 = arith.constant dense<0.000000e+00> : vector<2x512xf32>
    %115 = tpu.matmul %114, %4, %cst_18 {dimension_numbers = #tpu.dot_dimension_numbers<[1], [0], [0], [1], [0, 0, 1, 1], [], []>} : vector<2x128xbf16>, vector<128x512xbf16>, vector<2x512xf32> -> vector<2x512xf32>
    %116 = arith.addf %113, %115 : vector<2x512xf32>
    %117 = vector.extract_strided_slice %116 {offsets = [0, 0], sizes = [2, 384], strides = [1, 1]} : vector<2x512xf32> to vector<2x384xf32>
    %118 = arith.negf %117 : vector<2x384xf32>
    %119 = math.exp %118 : vector<2x384xf32>
    %cst_19 = arith.constant 1.000000e+00 : f32
    %120 = vector.broadcast %cst_19 : f32 to vector<2x384xf32>
    %121 = arith.addf %120, %119 : vector<2x384xf32>
    %122 = arith.divf %120, %121 : vector<2x384xf32>
    %123 = vector.extract_strided_slice %122 {offsets = [0, 0], sizes = [2, 128], strides = [1, 1]} : vector<2x384xf32> to vector<2x128xf32>
    %124 = vector.extract_strided_slice %122 {offsets = [0, 128], sizes = [2, 128], strides = [1, 1]} : vector<2x384xf32> to vector<2x128xf32>
    %125 = vector.extract_strided_slice %122 {offsets = [0, 256], sizes = [2, 128], strides = [1, 1]} : vector<2x384xf32> to vector<2x128xf32>
    %126 = vector.extract_strided_slice %116 {offsets = [0, 384], sizes = [2, 128], strides = [1, 1]} : vector<2x512xf32> to vector<2x128xf32>
    %127 = math.tanh %126 : vector<2x128xf32>
    %128 = arith.mulf %124, %109 : vector<2x128xf32>
    %129 = arith.mulf %123, %127 : vector<2x128xf32>
    %130 = arith.addf %128, %129 : vector<2x128xf32>
    %131 = math.tanh %130 : vector<2x128xf32>
    %132 = arith.mulf %125, %131 : vector<2x128xf32>
    %133 = vector.extract_strided_slice %3 {offsets = [0, 6, 0], sizes = [2, 1, 512], strides = [1, 1, 1]} : vector<2x8x512xf32> to vector<2x1x512xf32>
    %134 = vector.shape_cast %133 : vector<2x1x512xf32> to vector<2x512xf32>
    %135 = arith.truncf %132 : vector<2x128xf32> to vector<2x128xbf16>
    %cst_20 = arith.constant dense<0.000000e+00> : vector<2x512xf32>
    %136 = tpu.matmul %135, %4, %cst_20 {dimension_numbers = #tpu.dot_dimension_numbers<[1], [0], [0], [1], [0, 0, 1, 1], [], []>} : vector<2x128xbf16>, vector<128x512xbf16>, vector<2x512xf32> -> vector<2x512xf32>
    %137 = arith.addf %134, %136 : vector<2x512xf32>
    %138 = vector.extract_strided_slice %137 {offsets = [0, 0], sizes = [2, 384], strides = [1, 1]} : vector<2x512xf32> to vector<2x384xf32>
    %139 = arith.negf %138 : vector<2x384xf32>
    %140 = math.exp %139 : vector<2x384xf32>
    %cst_21 = arith.constant 1.000000e+00 : f32
    %141 = vector.broadcast %cst_21 : f32 to vector<2x384xf32>
    %142 = arith.addf %141, %140 : vector<2x384xf32>
    %143 = arith.divf %141, %142 : vector<2x384xf32>
    %144 = vector.extract_strided_slice %143 {offsets = [0, 0], sizes = [2, 128], strides = [1, 1]} : vector<2x384xf32> to vector<2x128xf32>
    %145 = vector.extract_strided_slice %143 {offsets = [0, 128], sizes = [2, 128], strides = [1, 1]} : vector<2x384xf32> to vector<2x128xf32>
    %146 = vector.extract_strided_slice %143 {offsets = [0, 256], sizes = [2, 128], strides = [1, 1]} : vector<2x384xf32> to vector<2x128xf32>
    %147 = vector.extract_strided_slice %137 {offsets = [0, 384], sizes = [2, 128], strides = [1, 1]} : vector<2x512xf32> to vector<2x128xf32>
    %148 = math.tanh %147 : vector<2x128xf32>
    %149 = arith.mulf %145, %130 : vector<2x128xf32>
    %150 = arith.mulf %144, %148 : vector<2x128xf32>
    %151 = arith.addf %149, %150 : vector<2x128xf32>
    %152 = math.tanh %151 : vector<2x128xf32>
    %153 = arith.mulf %146, %152 : vector<2x128xf32>
    %154 = vector.extract_strided_slice %3 {offsets = [0, 7, 0], sizes = [2, 1, 512], strides = [1, 1, 1]} : vector<2x8x512xf32> to vector<2x1x512xf32>
    %155 = vector.shape_cast %154 : vector<2x1x512xf32> to vector<2x512xf32>
    %156 = arith.truncf %153 : vector<2x128xf32> to vector<2x128xbf16>
    %cst_22 = arith.constant dense<0.000000e+00> : vector<2x512xf32>
    %157 = tpu.matmul %156, %4, %cst_22 {dimension_numbers = #tpu.dot_dimension_numbers<[1], [0], [0], [1], [0, 0, 1, 1], [], []>} : vector<2x128xbf16>, vector<128x512xbf16>, vector<2x512xf32> -> vector<2x512xf32>
    %158 = arith.addf %155, %157 : vector<2x512xf32>
    %159 = vector.extract_strided_slice %158 {offsets = [0, 0], sizes = [2, 384], strides = [1, 1]} : vector<2x512xf32> to vector<2x384xf32>
    %160 = arith.negf %159 : vector<2x384xf32>
    %161 = math.exp %160 : vector<2x384xf32>
    %cst_23 = arith.constant 1.000000e+00 : f32
    %162 = vector.broadcast %cst_23 : f32 to vector<2x384xf32>
    %163 = arith.addf %162, %161 : vector<2x384xf32>
    %164 = arith.divf %162, %163 : vector<2x384xf32>
    %165 = vector.extract_strided_slice %164 {offsets = [0, 0], sizes = [2, 128], strides = [1, 1]} : vector<2x384xf32> to vector<2x128xf32>
    %166 = vector.extract_strided_slice %164 {offsets = [0, 128], sizes = [2, 128], strides = [1, 1]} : vector<2x384xf32> to vector<2x128xf32>
    %167 = vector.extract_strided_slice %164 {offsets = [0, 256], sizes = [2, 128], strides = [1, 1]} : vector<2x384xf32> to vector<2x128xf32>
    %168 = vector.extract_strided_slice %158 {offsets = [0, 384], sizes = [2, 128], strides = [1, 1]} : vector<2x512xf32> to vector<2x128xf32>
    %169 = math.tanh %168 : vector<2x128xf32>
    %170 = arith.mulf %166, %151 : vector<2x128xf32>
    %171 = arith.mulf %165, %169 : vector<2x128xf32>
    %172 = arith.addf %170, %171 : vector<2x128xf32>
    %173 = math.tanh %172 : vector<2x128xf32>
    %174 = arith.mulf %167, %173 : vector<2x128xf32>
    %c0_24 = arith.constant 0 : index
    %c0_25 = arith.constant 0 : index
    %175 = vector.load %arg6[%c0_24, %c0_25] : memref<2x128xf32, #tpu.memory_space<vmem>>, vector<2x128xf32>
    tpu.vector_store %arg6[%c0_24, %c0_25], %174 {strides = array<i32>} : memref<2x128xf32, #tpu.memory_space<vmem>>, vector<2x128xf32>,
    %c0_26 = arith.constant 0 : index
    %c0_27 = arith.constant 0 : index
    %176 = vector.load %arg7[%c0_26, %c0_27] : memref<2x128xf32, #tpu.memory_space<vmem>>, vector<2x128xf32>
    tpu.vector_store %arg7[%c0_26, %c0_27], %172 {strides = array<i32>} : memref<2x128xf32, #tpu.memory_space<vmem>>, vector<2x128xf32>,
    %c0_i32_28 = arith.constant 0 : i32
    %177 = arith.cmpi eq, %arg0, %c0_i32_28 : i32
    %178 = arith.extui %177 : i1 to i32
    %c0_i32_29 = arith.constant 0 : i32
    %179 = arith.cmpi ne, %178, %c0_i32_29 : i32
    scf.if %179 {
      %180 = arith.truncf %174 : vector<2x128xf32> to vector<2x128xbf16>
      %c0_30 = arith.constant 0 : index
      %c0_31 = arith.constant 0 : index
      %181 = vector.load %arg3[%c0_30, %c0_31] : memref<128x128xbf16, #tpu.memory_space<vmem>>, vector<128x128xbf16>
      %cst_32 = arith.constant dense<0.000000e+00> : vector<2x128xf32>
      %182 = tpu.matmul %180, %181, %cst_32 {dimension_numbers = #tpu.dot_dimension_numbers<[1], [0], [0], [1], [0, 0, 1, 1], [], []>} : vector<2x128xbf16>, vector<128x128xbf16>, vector<2x128xf32> -> vector<2x128xf32>
      %c0_33 = arith.constant 0 : index
      %c0_34 = arith.constant 0 : index
      %183 = vector.load %arg4[%c0_33, %c0_34] : memref<1x128xf32, #tpu.memory_space<vmem>>, vector<1x128xf32>
      %184 = vector.broadcast %183 : vector<1x128xf32> to vector<2x128xf32>
      %185 = arith.addf %182, %184 : vector<2x128xf32>
      %c0_35 = arith.constant 0 : index
      %c0_36 = arith.constant 0 : index
      %186 = vector.load %arg5[%c0_35, %c0_36] : memref<2x128xf32, #tpu.memory_space<vmem>>, vector<2x128xf32>
      tpu.vector_store %arg5[%c0_35, %c0_36], %185 {strides = array<i32>} : memref<2x128xf32, #tpu.memory_space<vmem>>, vector<2x128xf32>,
    } else {
    }
    return
  }
  func.func @transform_0(%arg0: i32) -> (i32, i32, i32) {
    %c0_i32 = arith.constant 0 : i32
    %c0_i32_0 = arith.constant 0 : i32
    %c0_i32_1 = arith.constant 0 : i32
    return %c0_i32, %arg0, %c0_i32_0 : i32, i32, i32
  }
  func.func @transform_1(%arg0: i32) -> (i32, i32) {
    %c0_i32 = arith.constant 0 : i32
    %c0_i32_0 = arith.constant 0 : i32
    %c0_i32_1 = arith.constant 0 : i32
    return %c0_i32, %c0_i32_0 : i32, i32
  }
  func.func @transform_2(%arg0: i32) -> (i32, i32) {
    %c0_i32 = arith.constant 0 : i32
    %c0_i32_0 = arith.constant 0 : i32
    %c0_i32_1 = arith.constant 0 : i32
    return %c0_i32, %c0_i32_0 : i32, i32
  }
  func.func @transform_3(%arg0: i32) -> (i32, i32) {
    %c0_i32 = arith.constant 0 : i32
    %c0_i32_0 = arith.constant 0 : i32
    %c0_i32_1 = arith.constant 0 : i32
    return %c0_i32, %c0_i32_0 : i32, i32
  }
  func.func @transform_4(%arg0: i32) -> (i32, i32) {
    %c0_i32 = arith.constant 0 : i32
    %c0_i32_0 = arith.constant 0 : i32
    %c0_i32_1 = arith.constant 0 : i32
    return %c0_i32, %c0_i32_0 : i32, i32
  }
}

</mosaic_0001>

<bundles_post_ra>
// kernel: bert_classifier_forward.4
= control target key start
LH: loop header
LB: loop body
LE: loop exit
PB: predicated region body
PF: predicated region fallthrough
CT: control target
= control target key end

     0   :  { %s699_s1 = inlined_call_operand.vmem [shape: bf16[128,512], index: 1, kind: input, shape index: {}]   ;;  %s700_s0 = inlined_call_operand.vmem [shape: f32[2,8,128], index: 0, kind: input, shape index: {}]   ;;  %s701_s2 = inlined_call_operand.vmem [shape: f32[1,512], index: 2, kind: input, shape index: {}]   ;;  %s702_s3 = inlined_call_operand.vmem [shape: f32[2,8,512], index: 3, kind: output, shape index: {}]  }
   0x1   :  { %v408_v0 = vld [vmem:[%s699_s1 + $0xe0] sm:$0xf]  ;;  %v452_v1 = vld [vmem:[%s699_s1 + $0xec] sm:$0xf0]  ;;  %v450_v2 = vld [vmem:[%s699_s1 + $0xe4] sm:$0xf] }
   0x2   :  { %v409_v3 = vor.u32 %v452_v1, %v408_v0  ;;  %v410_v4 = vld [vmem:[%s699_s1 + $0xf0] sm:$0xf0]  ;;  %v416_v5 = vld [vmem:[%s699_s1 + $0xe8] sm:$0xf]  ;;  %v453_v6 = vld [vmem:[%s699_s1 + $0xf4] sm:$0xf0] }
   0x3   :  { %v413_v7 = vor.u32 %v450_v2, %v410_v4  ;;  %v417_v8 = vor.u32 %v453_v6, %v416_v5  ;;  %v451_v9 = vld [vmem:[%s699_s1 + $0xec] sm:$0xf]  ;;  %v418_v10 = vld [vmem:[%s699_s1 + $0xf8] sm:$0xf0]  ;;  %v392_v11 = vld [vmem:[%s699_s1 + $0xc0] sm:$0xf] }
   0x4   :  { %226 = vmatpush.bf16.msra.mxu0 %v409_v3  ;;  %v421_v12 = vor.u32 %v451_v9, %v418_v10  ;;  %v448_v13 = vld [vmem:[%s699_s1 + $0xcc] sm:$0xf0]  ;;  %v446_v14 = vld [vmem:[%s699_s1 + $0xc4] sm:$0xf]  ;;  %v394_v15 = vld [vmem:[%s699_s1 + $0xd0] sm:$0xf0] }
   0x5   :  { %240 = vmatpush.bf16.msra.mxu1 %v413_v7  ;;  %254 = vmatpush.bf16.msra.mxu2 %v417_v8  ;;  %v393_v16 = vor.u32 %v448_v13, %v392_v11  ;;  %v397_v17 = vor.u32 %v446_v14, %v394_v15  ;;  %v400_v18 = vld [vmem:[%s699_s1 + $0xc8] sm:$0xf]  ;;  %v449_v19 = vld [vmem:[%s699_s1 + $0xd4] sm:$0xf0]  ;;  %v447_v20 = vld [vmem:[%s699_s1 + $0xcc] sm:$0xf] }
   0x6   :  { %268 = vmatpush.bf16.msra.mxu3 %v421_v12  ;;  %v401_v21 = vor.u32 %v449_v19, %v400_v18  ;;  %v402_v22 = vld [vmem:[%s699_s1 + $0xd8] sm:$0xf0]  ;;  %v376_v23 = vld [vmem:[%s699_s1 + $0xa0] sm:$0xf]  ;;  %v444_v24 = vld [vmem:[%s699_s1 + $0xac] sm:$0xf0] }
   0x7   :  { %v405_v25 = vor.u32 %v447_v20, %v402_v22  ;;  %v442_v26 = vld [vmem:[%s699_s1 + $0xa4] sm:$0xf]  ;;  %v378_v27 = vld [vmem:[%s699_s1 + $0xb0] sm:$0xf0]  ;;  %v384_v28 = vld [vmem:[%s699_s1 + $0xa8] sm:$0xf]  ;;  %v377_v29 = vor.u32 %v444_v24, %v376_v23 }
   0x8   :  { %227 = vmatpush.bf16.msra.mxu0 %v393_v16  ;;  %v445_v30 = vld [vmem:[%s699_s1 + $0xb4] sm:$0xf0]  ;;  %v443_v31 = vld [vmem:[%s699_s1 + $0xac] sm:$0xf]  ;;  %v386_v32 = vld [vmem:[%s699_s1 + $0xb8] sm:$0xf0]  ;;  %v381_v33 = vor.u32 %v442_v26, %v378_v27 }
   0x9   :  { %241 = vmatpush.bf16.msra.mxu1 %v397_v17  ;;  %255 = vmatpush.bf16.msra.mxu2 %v401_v21  ;;  %v385_v34 = vor.u32 %v445_v30, %v384_v28  ;;  %v360_v35 = vld [vmem:[%s699_s1 + $0x80] sm:$0xf]  ;;  %v440_v36 = vld [vmem:[%s699_s1 + $0x8c] sm:$0xf0]  ;;  %v438_v37 = vld [vmem:[%s699_s1 + $0x84] sm:$0xf]  ;;  %v389_v38 = vor.u32 %v443_v31, %v386_v32 }
   0xa   :  { %269 = vmatpush.bf16.msra.mxu3 %v405_v25  ;;  %v362_v39 = vld [vmem:[%s699_s1 + $0x90] sm:$0xf0]  ;;  %v368_v40 = vld [vmem:[%s699_s1 + $0x88] sm:$0xf]  ;;  %v441_v41 = vld [vmem:[%s699_s1 + $0x94] sm:$0xf0]  ;;  %v361_v44 = vor.u32 %v440_v36, %v360_v35 }
   0xb   :  { %v439_v42 = vld [vmem:[%s699_s1 + $0x8c] sm:$0xf]  ;;  %v370_v43 = vld [vmem:[%s699_s1 + $0x98] sm:$0xf0]  ;;  %v365_v45 = vor.u32 %v438_v37, %v362_v39  ;;  %v369_v46 = vor.u32 %v441_v41, %v368_v40  ;;  %v344_v47 = vld [vmem:[%s699_s1 + $0x60] sm:$0xf] }
   0xc   :  { %228 = vmatpush.bf16.msra.mxu0 %v377_v29  ;;  %v436_v48 = vld [vmem:[%s699_s1 + $0x6c] sm:$0xf0]  ;;  %v434_v49 = vld [vmem:[%s699_s1 + $0x64] sm:$0xf]  ;;  %v373_v50 = vor.u32 %v439_v42, %v370_v43  ;;  %v346_v51 = vld [vmem:[%s699_s1 + $0x70] sm:$0xf0] }
   0xd   :  { %242 = vmatpush.bf16.msra.mxu1 %v381_v33  ;;  %256 = vmatpush.bf16.msra.mxu2 %v385_v34  ;;  %v352_v52 = vld [vmem:[%s699_s1 + $0x68] sm:$0xf]  ;;  %v437_v53 = vld [vmem:[%s699_s1 + $0x74] sm:$0xf0]  ;;  %v435_v54 = vld [vmem:[%s699_s1 + $0x6c] sm:$0xf]  ;;  %v345_v56 = vor.u32 %v436_v48, %v344_v47  ;;  %v349_v57 = vor.u32 %v434_v49, %v346_v51 }
   0xe   :  { %270 = vmatpush.bf16.msra.mxu3 %v389_v38  ;;  %v354_v55 = vld [vmem:[%s699_s1 + $0x78] sm:$0xf0]  ;;  %v353_v58 = vor.u32 %v437_v53, %v352_v52  ;;  %v328_v59 = vld [vmem:[%s699_s1 + $0x40] sm:$0xf]  ;;  %v432_v60 = vld [vmem:[%s699_s1 + $0x4c] sm:$0xf0] }
   0xf   :  { %v430_v61 = vld [vmem:[%s699_s1 + $0x44] sm:$0xf]  ;;  %v357_v62 = vor.u32 %v435_v54, %v354_v55  ;;  %v330_v63 = vld [vmem:[%s699_s1 + $0x50] sm:$0xf0]  ;;  %v336_v0 = vld [vmem:[%s699_s1 + $0x48] sm:$0xf]  ;;  %v329_v4 = vor.u32 %v432_v60, %v328_v59 }
  0x10   :  { %229 = vmatpush.bf16.msra.mxu0 %v361_v44  ;;  %v433_v1 = vld [vmem:[%s699_s1 + $0x54] sm:$0xf0]  ;;  %v431_v2 = vld [vmem:[%s699_s1 + $0x4c] sm:$0xf]  ;;  %v338_v3 = vld [vmem:[%s699_s1 + $0x58] sm:$0xf0]  ;;  %v333_v7 = vor.u32 %v430_v61, %v330_v63 }
  0x11   :  { %243 = vmatpush.bf16.msra.mxu1 %v365_v45  ;;  %257 = vmatpush.bf16.msra.mxu2 %v369_v46  ;;  %v312_v5 = vld [vmem:[%s699_s1 + $0x20] sm:$0xf]  ;;  %v428_v6 = vld [vmem:[%s699_s1 + $0x2c] sm:$0xf0]  ;;  %v337_v8 = vor.u32 %v433_v1, %v336_v0  ;;  %v426_v9 = vld [vmem:[%s699_s1 + $0x24] sm:$0xf]  ;;  %v341_v12 = vor.u32 %v431_v2, %v338_v3 }
  0x12   :  { %271 = vmatpush.bf16.msra.mxu3 %v373_v50  ;;  %v314_v10 = vld [vmem:[%s699_s1 + $0x30] sm:$0xf0]  ;;  %v320_v11 = vld [vmem:[%s699_s1 + $0x28] sm:$0xf]  ;;  %v429_v13 = vld [vmem:[%s699_s1 + $0x34] sm:$0xf0]  ;;  %v313_v20 = vor.u32 %v428_v6, %v312_v5 }
  0x13   :  { %v14_v14 = vld [vmem:[%s700_s0] sm:$0xff]  ;;  %v15_v15 = vld [vmem:[%s700_s0 + $0x8] sm:$0xff]  ;;  %v322_v17 = vld [vmem:[%s699_s1 + $0x38] sm:$0xf0]  ;;  %v317_v21 = vor.u32 %v426_v9, %v314_v10  ;;  %v321_v22 = vor.u32 %v429_v13, %v320_v11 }
  0x14   :  { %230 = vmatpush.bf16.msra.mxu0 %v345_v56  ;;  %v427_v16 = vld [vmem:[%s699_s1 + $0x2c] sm:$0xf]  ;;  %v16_v18 = vpack.c.bf16 %v14_v14, %v14_v14  ;;  %v17_v19 = vpack.c.bf16 %v15_v15, %v15_v15  ;;  %v296_v23 = vld [vmem:[%s699_s1] sm:$0xf]  ;;  %v424_v24 = vld [vmem:[%s699_s1 + $0xc] sm:$0xf0] }
  0x15   :  { %244 = vmatpush.bf16.msra.mxu1 %v349_v57  ;;  %258 = vmatpush.bf16.msra.mxu2 %v353_v58  ;;  %v422_v25 = vld [vmem:[%s699_s1 + $0x4] sm:$0xf]  ;;  %v325_v26 = vor.u32 %v427_v16, %v322_v17  ;;  %v298_v27 = vld [vmem:[%s699_s1 + $0x10] sm:$0xf0]  ;;  %v304_v28 = vld [vmem:[%s699_s1 + $0x8] sm:$0xf]  ;;  %v297_v34 = vor.u32 %v424_v24, %v296_v23 }
  0x16   :  { %272 = vmatpush.bf16.msra.mxu3 %v357_v62  ;;  %v425_v29 = vld [vmem:[%s699_s1 + $0x14] sm:$0xf0]  ;;  %v423_v30 = vld [vmem:[%s699_s1 + $0xc] sm:$0xf]  ;;  %v306_v31 = vld [vmem:[%s699_s1 + $0x18] sm:$0xf0]  ;;  %v62_v32 = vunpack.c.l.b16 %v16_v18  ;;  %v63_v33 = vunpack.c.l.b16 %v17_v19  ;;  %v301_v35 = vor.u32 %v422_v25, %v298_v27 }
  0x17   :  { %v305_v36 = vor.u32 %v425_v29, %v304_v28  ;;  %v309_v37 = vor.u32 %v423_v30, %v306_v31  ;;  %v50_v39 = vld [vmem:[%s701_s2] sm:$0xf] }
  0x18   :  { %231 = vmatpush.bf16.msra.mxu0 %v329_v4  ;;  %v64_v38 = vpack.c.b16 %v63_v33, %v62_v32  ;;  %v52_v40 = vperm.slane %v50_v39, 0  ;;  %v53_v41 = vperm.slane %v50_v39, 1  ;;  %v54_v46 = vperm.slane %v50_v39, 2 }
  0x19   :  { %245 = vmatpush.bf16.msra.mxu1 %v333_v7  ;;  %259 = vmatpush.bf16.msra.mxu2 %v337_v8  ;;  %v55_v47 = vperm.slane %v50_v39, 3 }
  0x1a   :  { %273 = vmatpush.bf16.msra.mxu3 %v341_v12 }
  0x1c   :  { %232 = vmatpush.bf16.msra.mxu0 %v313_v20 }
  0x1d   :  { %246 = vmatpush.bf16.msra.mxu1 %v317_v21  ;;  %260 = vmatpush.bf16.msra.mxu2 %v321_v22 }
  0x1e   :  { %274 = vmatpush.bf16.msra.mxu3 %v325_v26 }
  0x20   :  { %233 = vmatpush.bf16.msra.mxu0 %v297_v34 }
  0x21   :  { %247 = vmatpush.bf16.msra.mxu1 %v301_v35  ;;  %261 = vmatpush.bf16.msra.mxu2 %v305_v36 }
  0x22   :  { %275 = vmatpush.bf16.msra.mxu3 %v309_v37 }
  0x23   :  { %234 = vmatmul.bf16.vlgmr.msra.gmra.mxu0 %v64_v38 }
  0x24   :  { %248 = vmatmul.bf16.vlgmr.msra.gmra.mxu1 %v64_v38  ;;  %262 = vmatmul.bf16.vlgmr.msra.gmra.mxu2 %v64_v38 }
  0x25   :  { %276 = vmatmul.bf16.vlgmr.msra.gmra.mxu3 %v64_v38 }
  0xa0   :  { %v235_v42 = vpop.f32.mrf.mxu0 }
  0xa1   :  { %v236_v43 = vadd.f32 %v235_v42, %v52_v40  ;;  %v249_v44 = vpop.f32.mrf.mxu1 }
  0xa2   :  { %v250_v45 = vadd.f32 %v249_v44, %v53_v41 }
  0xa3   :  { %282 = vst [vmem:[%s702_s3] sm:$0xff] %v236_v43 }
  0xa4   :  { %283 = vst [vmem:[%s702_s3 + $0x8] sm:$0xff] %v250_v45 }
  0xa7   :  { %v263_v48 = vpop.f32.mrf.mxu2 }
  0xa8   :  { %v264_v49 = vadd.f32 %v263_v48, %v54_v46  ;;  %v277_v50 = vpop.f32.mrf.mxu3  ;;  %v237_v51 = vpop.f32.mrf.mxu0 }
  0xa9   :  { %v278_v52 = vadd.f32 %v277_v50, %v55_v47  ;;  %v238_v53 = vadd.f32 %v237_v51, %v52_v40  ;;  %v251_v54 = vpop.f32.mrf.mxu1 }
  0xaa   :  { %284 = vst [vmem:[%s702_s3 + $0x10] sm:$0xff] %v264_v49  ;;  %v252_v55 = vadd.f32 %v251_v54, %v53_v41 }
  0xab   :  { %285 = vst [vmem:[%s702_s3 + $0x18] sm:$0xff] %v278_v52 }
  0xac   :  { %286 = vst [vmem:[%s702_s3 + $0x20] sm:$0xff] %v238_v53 }
  0xad   :  { %287 = vst [vmem:[%s702_s3 + $0x28] sm:$0xff] %v252_v55 }
  0xaf   :  { %v265_v56 = vpop.f32.mrf.mxu2 }
  0xb0   :  { %v266_v57 = vadd.f32 %v265_v56, %v54_v46  ;;  %v279_v58 = vpop.f32.mrf.mxu3 }
  0xb1   :  { %v280_v59 = vadd.f32 %v279_v58, %v55_v47 }
  0xb2   :  { %288 = vst [vmem:[%s702_s3 + $0x30] sm:$0xff] %v266_v57 }
  0xb3   :  { %289 = vst [vmem:[%s702_s3 + $0x38] sm:$0xff] %v280_v59 }

// kernel: bert_classifier_forward.3
= control target key start
LH: loop header
LB: loop body
LE: loop exit
PB: predicated region body
PF: predicated region fallthrough
CT: control target
= control target key end

     0   :  { %s1940_s27 = smov 0   ;;  %s2463_s0 = inlined_call_operand.vmem [shape: f32[2,8,128], index: 0, kind: input, shape index: {}]   ;;  %s2464_s1 = inlined_call_operand.vmem [shape: f32[2,1,8], index: 1, kind: input, shape index: {}]   ;;  %s2465_s2 = inlined_call_operand.vmem [shape: bf16[128,384], index: 2, kind: input, shape index: {}]   ;;  %s2466_s3 = inlined_call_operand.vmem [shape: bf16[128,128], index: 3, kind: input, shape index: {}]   ;;  %s2467_s4 = inlined_call_operand.vmem [shape: bf16[128,512], index: 4, kind: input, shape index: {}]   ;;  %s2468_s5 = inlined_call_operand.vmem [shape: f32[1,512], index: 5, kind: input, shape index: {}]   ;;  %s2469_s6 = inlined_call_operand.vmem [shape: bf16[512,128], index: 6, kind: input, shape index: {}]   ;;  %s2470_s7 = inlined_call_operand.vmem [shape: f32[1,128], index: 7, kind: input, shape index: {}]   ;;  %s2471_s8 = inlined_call_operand.vmem [shape: f32[2,8,128], index: 8, kind: output, shape index: {}]  }
   0x1 LB: > { %s1367_s28 = sadd.s32 4294967295, %s1892_s27   ;;  %p1371_p0 = scmp.ge.s32.totalorder %s1892_s27, 1  ;;  %s1892_s27 = sphi %s1940_s27, %s18_s27  }
   0x2   : > { %p269_p1 = scmp.lt.s32.totalorder %s1892_s27, 3 }
   0x4   : > { %p270_p2 = pnand %p1371_p0, %p269_p1 }
   0x5   : > { %p304_p3 = scmp.lt.s32.totalorder (!%p270_p2), %s1367_s28, 1 }
   0x6   : > { %273 = sbr.rel (%p270_p2) target bundleno = 1657 (0x679), region = 52 }
   0xb   : > { %v1782_v0 = vld [vmem:[%s2465_s2 + $0xac] sm:$0xf]  ;;  %v1462_v1 = vld [vmem:[%s2465_s2 + $0xb4] sm:$0xf0]  ;;  %v1779_v2 = vld [vmem:[%s2465_s2 + $0x94] sm:$0xf] }
   0xc   : > { %v1465_v3 = vor.u32 %v1782_v0, %v1462_v1  ;;  %v1450_v4 = vld [vmem:[%s2465_s2 + $0x9c] sm:$0xf0]  ;;  %v1460_v5 = vld [vmem:[%s2465_s2 + $0xa8] sm:$0xf]  ;;  %v1783_v6 = vld [vmem:[%s2465_s2 + $0xb0] sm:$0xf0] }
   0xd   : > { %v1461_v7 = vor.u32 %v1783_v6, %v1460_v5  ;;  %v1448_v8 = vld [vmem:[%s2465_s2 + $0x90] sm:$0xf]  ;;  %v1453_v9 = vor.u32 %v1779_v2, %v1450_v4  ;;  %v1780_v10 = vld [vmem:[%s2465_s2 + $0x98] sm:$0xf0]  ;;  %v1438_v12 = vld [vmem:[%s2465_s2 + $0x84] sm:$0xf0] }
   0xe   : > { %491 = vmatpush.bf16.msra.mxu1 %v1465_v3  ;;  %v1776_v11 = vld [vmem:[%s2465_s2 + $0x7c] sm:$0xf]  ;;  %v1449_v13 = vor.u32 %v1780_v10, %v1448_v8  ;;  %v1436_v14 = vld [vmem:[%s2465_s2 + $0x78] sm:$0xf]  ;;  %v1777_v15 = vld [vmem:[%s2465_s2 + $0x80] sm:$0xf0] }
   0xf   : > { %478 = vmatpush.bf16.msra.mxu0 %v1461_v7  ;;  %v1441_v16 = vor.u32 %v1776_v11, %v1438_v12  ;;  %v1773_v17 = vld [vmem:[%s2465_s2 + $0x64] sm:$0xf]  ;;  %v1426_v18 = vld [vmem:[%s2465_s2 + $0x6c] sm:$0xf0]  ;;  %v1437_v19 = vor.u32 %v1777_v15, %v1436_v14  ;;  %v1424_v20 = vld [vmem:[%s2465_s2 + $0x60] sm:$0xf] }
  0x10   : > { %v1774_v21 = vld [vmem:[%s2465_s2 + $0x68] sm:$0xf0]  ;;  %v1429_v22 = vor.u32 %v1773_v17, %v1426_v18  ;;  %v1414_v24 = vld [vmem:[%s2465_s2 + $0x54] sm:$0xf0]  ;;  %v1412_v26 = vld [vmem:[%s2465_s2 + $0x48] sm:$0xf] }
  0x11   : > { %v1770_v23 = vld [vmem:[%s2465_s2 + $0x4c] sm:$0xf]  ;;  %v1425_v25 = vor.u32 %v1774_v21, %v1424_v20  ;;  %v1771_v27 = vld [vmem:[%s2465_s2 + $0x50] sm:$0xf0]  ;;  %v1402_v30 = vld [vmem:[%s2465_s2 + $0x3c] sm:$0xf0] }
  0x12   : > { %492 = vmatpush.bf16.msra.mxu1 %v1453_v9  ;;  %v1417_v28 = vor.u32 %v1770_v23, %v1414_v24  ;;  %v1767_v29 = vld [vmem:[%s2465_s2 + $0x34] sm:$0xf]  ;;  %v1413_v31 = vor.u32 %v1771_v27, %v1412_v26  ;;  %v1400_v32 = vld [vmem:[%s2465_s2 + $0x30] sm:$0xf]  ;;  %v1768_v33 = vld [vmem:[%s2465_s2 + $0x38] sm:$0xf0] }
  0x13   : > { %479 = vmatpush.bf16.msra.mxu0 %v1449_v13  ;;  %s2473_s28 = smov (!%p304_p3, %s1367_s28), 1  ;;  %v1405_v34 = vor.u32 %v1767_v29, %v1402_v30  ;;  %v1764_v35 = vld [vmem:[%s2465_s2 + $0x1c] sm:$0xf]  ;;  %v1390_v36 = vld [vmem:[%s2465_s2 + $0x24] sm:$0xf0]  ;;  %v1401_v37 = vor.u32 %v1768_v33, %v1400_v32  ;;  %vm536_vm0 = vcmask 64512  }
  0x14   : > { %v1388_v38 = vld [vmem:[%s2465_s2 + $0x18] sm:$0xf]  ;;  %v1765_v39 = vld [vmem:[%s2465_s2 + $0x20] sm:$0xf0]  ;;  %s1372_s23 = sshll.u32 %s2473_s28, 3  ;;  %v1393_v40 = vor.u32 %v1764_v35, %v1390_v36  ;;  %s310_s17 = scalar_lea.vmem %s2464_s1, %s2473_s28  ;;  %vm553_vm1 = vcmask 1043456  }
  0x15   : > { %v1761_v41 = vld [vmem:[%s2465_s2 + $0x4] sm:$0xf]  ;;  %v1378_v42 = vld [vmem:[%s2465_s2 + $0xc] sm:$0xf0]  ;;  %v1389_v43 = vor.u32 %v1765_v39, %v1388_v38  ;;  %s307_s10 = scalar_lea.vmem %s2463_s0, %s1372_s23  ;;  %v1376_v44 = vld [vmem:[%s2465_s2] sm:$0xf]  ;;  %s314_s20 = scalar_lea.vmem %s2471_s8, %s1372_s23 }
  0x16   : > { %493 = vmatpush.bf16.msra.mxu1 %v1441_v16  ;;  %v1762_v45 = vld [vmem:[%s2465_s2 + $0x8] sm:$0xf0]  ;;  %v1381_v46 = vor.u32 %v1761_v41, %v1378_v42  ;;  %v2056_v47 = vld [vmem:[%s307_s10] sm:$0xff]  ;;  %v1468_v56 = vld [vmem:[%s2465_s2 + $0xb0] sm:$0xf] }
  0x17   : > { %480 = vmatpush.bf16.msra.mxu0 %v1437_v19  ;;  %v1377_v48 = vor.u32 %v1762_v45, %v1376_v44  ;;  %v317_v49 = vpack.c.bf16 %v2056_v47, %v2056_v47  ;;  %v1784_v57 = vld [vmem:[%s2465_s2 + $0xb8] sm:$0xf0]  ;;  %v1456_v58 = vld [vmem:[%s2465_s2 + $0x98] sm:$0xf]  ;;  %v1781_v60 = vld [vmem:[%s2465_s2 + $0xa0] sm:$0xf0] }
  0x18   : > { %v1469_v59 = vor.u32 %v1784_v57, %v1468_v56  ;;  %v1457_v61 = vor.u32 %v1781_v60, %v1456_v58  ;;  %v1444_v62 = vld [vmem:[%s2465_s2 + $0x80] sm:$0xf]  ;;  %v1778_v63 = vld [vmem:[%s2465_s2 + $0x88] sm:$0xf0]  ;;  %v1432_v1 = vld [vmem:[%s2465_s2 + $0x68] sm:$0xf] }
  0x19   : > { %v1445_v0 = vor.u32 %v1778_v63, %v1444_v62  ;;  %v1775_v2 = vld [vmem:[%s2465_s2 + $0x70] sm:$0xf0]  ;;  %v1420_v4 = vld [vmem:[%s2465_s2 + $0x50] sm:$0xf]  ;;  %v1772_v5 = vld [vmem:[%s2465_s2 + $0x58] sm:$0xf0] }
  0x1a   : > { %494 = vmatpush.bf16.msra.mxu1 %v1429_v22  ;;  %504 = vmatpush.bf16.msra.mxu2 %v1469_v59  ;;  %v1433_v3 = vor.u32 %v1775_v2, %v1432_v1  ;;  %v1421_v6 = vor.u32 %v1772_v5, %v1420_v4  ;;  %v1408_v7 = vld [vmem:[%s2465_s2 + $0x38] sm:$0xf]  ;;  %v1769_v8 = vld [vmem:[%s2465_s2 + $0x40] sm:$0xf0]  ;;  %v1396_v10 = vld [vmem:[%s2465_s2 + $0x20] sm:$0xf] }
  0x1b   : > { %481 = vmatpush.bf16.msra.mxu0 %v1425_v25  ;;  %v1409_v9 = vor.u32 %v1769_v8, %v1408_v7  ;;  %v1766_v11 = vld [vmem:[%s2465_s2 + $0x28] sm:$0xf0]  ;;  %v1866_v12 = vld [vmem:[%s310_s17] ss:$0 sm:$0xff]  ;;  %v1384_v15 = vld [vmem:[%s2465_s2 + $0x8] sm:$0xf] }
  0x1c   : > { %v1397_v13 = vor.u32 %v1766_v11, %v1396_v10  ;;  %v1763_v16 = vld [vmem:[%s2465_s2 + $0x10] sm:$0xf0]  ;;  %v1792_v30 = vld [vmem:[%s2466_s3 + $0x38] sm:$0xff]  ;;  %v1790_v32 = vld [vmem:[%s2466_s3 + $0x28] sm:$0xff] }
  0x1d   : > { %v1385_v19 = vor.u32 %v1763_v16, %v1384_v15  ;;  %v1789_v33 = vld [vmem:[%s2466_s3 + $0x20] sm:$0xff]  ;;  %v1787_v35 = vld [vmem:[%s2466_s3 + $0x10] sm:$0xff]  ;;  %v1822_v58 = vld [vmem:[%s2467_s4 + $0xec] sm:$0xf] }
  0x1e   : > { %495 = vmatpush.bf16.msra.mxu1 %v1417_v28  ;;  %505 = vmatpush.bf16.msra.mxu2 %v1457_v61  ;;  %v1785_v41 = vld [vmem:[%s2466_s3] sm:$0xff]  ;;  %v1627_v59 = vld [vmem:[%s2467_s4 + $0xf8] sm:$0xf0]  ;;  %v1819_v62 = vld [vmem:[%s2467_s4 + $0xcc] sm:$0xf0] }
  0x1f   : > { %482 = vmatpush.bf16.msra.mxu0 %v1413_v31  ;;  %v1791_v31 = vld [vmem:[%s2466_s3 + $0x30] sm:$0xff]  ;;  %v1601_v60 = vld [vmem:[%s2467_s4 + $0xc0] sm:$0xf]  ;;  %v1630_v61 = vor.u32 %v1822_v58, %v1627_v59  ;;  %v1817_v63 = vld [vmem:[%s2467_s4 + $0xc4] sm:$0xf] }
  0x20   : > { %v1602_v2 = vor.u32 %v1819_v62, %v1601_v60  ;;  %v1609_v4 = vld [vmem:[%s2467_s4 + $0xc8] sm:$0xf]  ;;  %v1820_v5 = vld [vmem:[%s2467_s4 + $0xd4] sm:$0xf0]  ;;  %v1611_v8 = vld [vmem:[%s2467_s4 + $0xd8] sm:$0xf0] }
  0x21   : > { %v1610_v7 = vor.u32 %v1820_v5, %v1609_v4  ;;  %v1539_v59 = vld [vmem:[%s2467_s4 + $0x50] sm:$0xf0]  ;;  %v1545_v60 = vld [vmem:[%s2467_s4 + $0x48] sm:$0xf]  ;;  %v1799_v4 = vld [vmem:[%s2467_s4 + $0x2c] sm:$0xf0] }
  0x22   : > { %496 = vmatpush.bf16.msra.mxu1 %v1405_v34  ;;  %506 = vmatpush.bf16.msra.mxu2 %v1445_v0  ;;  %v1788_v34 = vld [vmem:[%s2466_s3 + $0x18] sm:$0xff]  ;;  %v1603_v0 = vld [vmem:[%s2467_s4 + $0xd0] sm:$0xf0]  ;;  %v1797_v5 = vld [vmem:[%s2467_s4 + $0x24] sm:$0xf] }
  0x23   : > { %483 = vmatpush.bf16.msra.mxu0 %v1401_v37  ;;  %v1786_v37 = vld [vmem:[%s2466_s3 + $0x8] sm:$0xff] }
  0x26   : > { %497 = vmatpush.bf16.msra.mxu1 %v1393_v40  ;;  %507 = vmatpush.bf16.msra.mxu2 %v1433_v3  ;;  %v1606_v3 = vor.u32 %v1817_v63, %v1603_v0  ;;  %v1802_v0 = vld [vmem:[%s2467_s4 + $0x4c] sm:$0xf] }
  0x27   : > { %484 = vmatpush.bf16.msra.mxu0 %v1389_v43 }
  0x2a   : > { %498 = vmatpush.bf16.msra.mxu1 %v1381_v46  ;;  %508 = vmatpush.bf16.msra.mxu2 %v1421_v6  ;;  %v1818_v6 = vld [vmem:[%s2467_s4 + $0xcc] sm:$0xf] }
  0x2b   : > { %485 = vmatpush.bf16.msra.mxu0 %v1377_v48 }
  0x2d   : > { %499 = vmatmul.bf16.vlgmr.msra.gmra.mxu1 %v317_v49 }
  0x2e   : > { %486 = vmatmul.bf16.vlgmr.msra.gmra.mxu0 %v317_v49  ;;  %509 = vmatpush.bf16.msra.mxu2 %v1409_v9  ;;  %v1614_v9 = vor.u32 %v1818_v6, %v1611_v8  ;;  %v1529_v8 = vld [vmem:[%s2467_s4 + $0x28] sm:$0xf] }
  0x32   : > { %510 = vmatpush.bf16.msra.mxu2 %v1397_v13 }
  0x36   : > { %511 = vmatpush.bf16.msra.mxu2 %v1385_v19  ;;  %v1585_v19 = vld [vmem:[%s2467_s4 + $0xa0] sm:$0xf] }
  0x39   : > { %512 = vmatmul.bf16.vlgmr.msra.gmra.mxu2 %v317_v49  ;;  %v1894_v49 = vmov 128.0  }
  0xaa   : > { %v500_v50 = vpop.f32.mrf.mxu1 }
  0xab   : > { %v518_v51 = vpack.c.bf16 %v500_v50, %v500_v50  ;;  %v487_v52 = vpop.f32.mrf.mxu0  ;;  %v1617_v50 = vld [vmem:[%s2467_s4 + $0xe0] sm:$0xf] }
  0xac   : > { %v517_v53 = vpack.c.bf16 %v487_v52, %v487_v52  ;;  %v1821_v52 = vld [vmem:[%s2467_s4 + $0xe4] sm:$0xf] }
  0xad   : > { %530 = vmatpush.bf16.xpose.msrb.mxu0 %v518_v51  ;;  %v1823_v51 = vld [vmem:[%s2467_s4 + $0xec] sm:$0xf0] }
  0xb2   : > { %v502_v54 = vpop.f32.mrf.mxu1 }
  0xb3   : > { %v489_v55 = vpop.f32.mrf.mxu0  ;;  %v1625_v54 = vld [vmem:[%s2467_s4 + $0xe8] sm:$0xf] }
  0xb4   : > { %531 = vmatmul.bf16.vlgmr.msrb.gmra.mxu0 %v517_v53  ;;  %v1618_v53 = vor.u32 %v1823_v51, %v1617_v50  ;;  %v1824_v55 = vld [vmem:[%s2467_s4 + $0xf4] sm:$0xf0] }
  0xb5   : > { %v1626_v57 = vor.u32 %v1824_v55, %v1625_v54  ;;  %v1808_v50 = vld [vmem:[%s2467_s4 + $0x74] sm:$0xf0]  ;;  %v1537_v55 = vld [vmem:[%s2467_s4 + $0x40] sm:$0xf] }
  0xb6   : > { %879 = vmatpush.bf16.msra.mxu0 %v1618_v53  ;;  %v1806_v53 = vld [vmem:[%s2467_s4 + $0x6c] sm:$0xf] }
  0xb7   : > { %905 = vmatpush.bf16.msrb.mxu2 %v1626_v57  ;;  %v1801_v57 = vld [vmem:[%s2467_s4 + $0x44] sm:$0xf] }
  0xb8   : > { %v1542_v62 = vor.u32 %v1801_v57, %v1539_v59  ;;  %v1853_v57 = vld [vmem:[%s2469_s6 + $0xe0] sm:$0xff]  ;;  %v1835_v59 = vld [vmem:[%s2469_s6 + $0x50] sm:$0xff] }
  0xba   : > { %880 = vmatpush.bf16.msra.mxu0 %v1602_v2 }
  0xbb   : > { %906 = vmatpush.bf16.msrb.mxu2 %v1610_v7  ;;  %v1523_v7 = vld [vmem:[%s2467_s4 + $0x30] sm:$0xf0] }
  0xbc   : > { %v513_v26 = vpop.f32.mrf.mxu2 }
  0xbd   : > { %v549_v27 = vpack.c.bf16 %v513_v26, %v513_v26 }
  0xbf   : > { %v555_v28 = vsel %vm553_vm1, %v549_v27, 0 }
  0xc0   : > { %564 = vmatpush.bf16.msra.mxu3 %v555_v28  ;;  %v1814_v28 = vld [vmem:[%s2467_s4 + $0xac] sm:$0xf] }
  0xc4   : > { %v515_v29 = vpop.f32.mrf.mxu2  ;;  %635 = vmatpush.bf16.msrb.mxu3 %v1792_v30 }
  0xc5   : > { %v1595_v29 = vld [vmem:[%s2467_s4 + $0xb8] sm:$0xf0] }
  0xc6   : > { %v1598_v30 = vor.u32 %v1814_v28, %v1595_v29  ;;  %v1832_v29 = vld [vmem:[%s2469_s6 + $0x38] sm:$0xff] }
  0xc8   : > { %636 = vmatpush.bf16.msrb.mxu3 %v1791_v31  ;;  %v1569_v31 = vld [vmem:[%s2467_s4 + $0x80] sm:$0xf] }
  0xcc   : > { %637 = vmatpush.bf16.msrb.mxu3 %v1790_v32  ;;  %v1811_v32 = vld [vmem:[%s2467_s4 + $0x8c] sm:$0xf0] }
  0xd0   : > { %638 = vmatpush.bf16.msrb.mxu3 %v1789_v33  ;;  %v1809_v33 = vld [vmem:[%s2467_s4 + $0x84] sm:$0xf] }
  0xd4   : > { %639 = vmatpush.bf16.msrb.mxu3 %v1788_v34  ;;  %v1570_v34 = vor.u32 %v1811_v32, %v1569_v31 }
  0xd8   : > { %640 = vmatpush.bf16.msrb.mxu3 %v1787_v35  ;;  %v1571_v35 = vld [vmem:[%s2467_s4 + $0x90] sm:$0xf0] }
  0xdc   : > { %641 = vmatpush.bf16.msrb.mxu3 %v1786_v37  ;;  %v1812_v37 = vld [vmem:[%s2467_s4 + $0x94] sm:$0xf0] }
  0xe0   : > { %642 = vmatpush.bf16.msrb.mxu3 %v1785_v41  ;;  %v1579_v41 = vld [vmem:[%s2467_s4 + $0x98] sm:$0xf0] }
 0x131   : > { %v532_v14 = vpop.f32.mrf.mxu0 }
 0x132   : > { %v533_v17 = vadd.f32 %v1866_v12, %v532_v14 }
 0x134   : > { %v537_v18 = vsel %vm536_vm0, %v533_v17, -inf }
 0x135   : > { %538 = vmax.xlane.f32.xlu0 %v537_v18 }
 0x139   : > { %v534_v20 = vpop.f32.mrf.mxu0 }
 0x13a   : > { %v1815_v20 = vld [vmem:[%s2467_s4 + $0xac] sm:$0xf0] }
 0x1a8   : > { %v539_v21 = vpop.xlane.xlu0 %538 }
 0x1a9   : > { %v540_v22 = vsub.f32 %v533_v17, %v539_v21  ;;  %v1813_v21 = vld [vmem:[%s2467_s4 + $0xa4] sm:$0xf] }
 0x1ab   : > { %v541_v23 = vmul.f32 1.442695, %v540_v22  ;;  %v1586_v22 = vor.u32 %v1815_v20, %v1585_v19  ;;  %v1793_v19 = vld [vmem:[%s2467_s4 + $0x4] sm:$0xf] }
 0x1ad   : > { %1868 = vpow2.f32 %v541_v23  ;;  %v1587_v23 = vld [vmem:[%s2467_s4 + $0xb0] sm:$0xf0]  ;;  %881 = vmatpush.bf16.msra.mxu0 %v1586_v22  ;;  %v1513_v22 = vld [vmem:[%s2467_s4 + $0x8] sm:$0xf] }
 0x1ae   : > { %v1590_v26 = vor.u32 %v1813_v21, %v1587_v23  ;;  %v1507_v21 = vld [vmem:[%s2467_s4 + $0x10] sm:$0xf0]  ;;  %v1796_v23 = vld [vmem:[%s2467_s4 + $0x14] sm:$0xf0] }
 0x1b1   : > { %882 = vmatpush.bf16.msra.mxu0 %v1570_v34 }
 0x1b3   : > { %v1869_v24 = vpop.eup %1868 }
 0x1b4   : > { %v543_v25 = vsel %vm536_vm0, %v1869_v24, 0.0 }
 0x1b5   : > { %544 = vadd.xlane.f32.xlu0 %v543_v25  ;;  %v1816_v25 = vld [vmem:[%s2467_s4 + $0xb4] sm:$0xf0] }
 0x228   : > { %v545_v36 = vpop.xlane.xlu0 %544 }
 0x229   : > { %1870 = vrcp.f32 %v545_v36  ;;  %v1577_v36 = vld [vmem:[%s2467_s4 + $0x88] sm:$0xf] }
 0x22a   : > { %1872 = vrcp.f32 %v1894_v49  ;;  %v1561_v49 = vld [vmem:[%s2467_s4 + $0x68] sm:$0xf] }
 0x22f   : > { %v1871_v38 = vpop.eup %1870 }
 0x230   : > { %v547_v39 = vmul.f32 %v1871_v38, %v1869_v24  ;;  %v1873_v1 = vpop.eup %1872  ;;  %v1593_v24 = vld [vmem:[%s2467_s4 + $0xa8] sm:$0xf]  ;;  %v1574_v38 = vor.u32 %v1809_v33, %v1571_v35 }
 0x231   : > { %v652_v10 = vmul.f32 128.0, %v1873_v1  ;;  %vm656_vm2 = vweird.f32 %v1873_v1  ;;  %v1594_v27 = vor.u32 %v1816_v25, %v1593_v24  ;;  %v1510_v24 = vor.u32 %v1793_v19, %v1507_v21 }
 0x232   : > { %v548_v40 = vpack.c.bf16 %v547_v39, %v547_v39  ;;  %v1578_v39 = vor.u32 %v1812_v37, %v1577_v36  ;;  %v1514_v25 = vor.u32 %v1796_v23, %v1513_v22 }
 0x233   : > { %v653_v11 = vsub.f32 1.0, %v652_v10  ;;  %907 = vmatpush.bf16.msrb.mxu2 %v1594_v27  ;;  %v1526_v10 = vor.u32 %v1797_v5, %v1523_v7  ;;  %v1515_v27 = vld [vmem:[%s2467_s4 + $0x18] sm:$0xf0]  ;;  %v1850_v5 = vld [vmem:[%s2469_s6 + $0xc8] sm:$0xff] }
 0x234   : > { %1470 = vmatmul.msk.bf16.vlgmr.msra.gmra.mxu3 %vm536_vm0, %v548_v40  ;;  %v1810_v40 = vld [vmem:[%s2467_s4 + $0x8c] sm:$0xf] }
 0x235   : > { %918 = vmatpush.bf16.msra.mxu3 %v1630_v61  ;;  %v654_v12 = vmul.f32 %v1873_v1, %v653_v11  ;;  %v1804_v61 = vld [vmem:[%s2467_s4 + $0x54] sm:$0xf0] }
 0x236   : > { %v1546_v63 = vor.u32 %v1804_v61, %v1545_v60  ;;  %v1844_v60 = vld [vmem:[%s2469_s6 + $0x98] sm:$0xff] }
 0x237   : > { %v655_v13 = vadd.f32 %v1873_v1, %v654_v12  ;;  %908 = vmatpush.bf16.msrb.mxu2 %v1578_v39  ;;  %v1798_v12 = vld [vmem:[%s2467_s4 + $0x2c] sm:$0xf]  ;;  %v1852_v61 = vld [vmem:[%s2469_s6 + $0xd8] sm:$0xff] }
 0x239   : > { %919 = vmatpush.bf16.msra.mxu3 %v1614_v9  ;;  %v2193_v14 = vsel %vm656_vm2, %v1873_v1, %v655_v13  ;;  %v1547_v1 = vld [vmem:[%s2467_s4 + $0x58] sm:$0xf0]  ;;  %v1800_v9 = vld [vmem:[%s2467_s4 + $0x34] sm:$0xf0] }
 0x23a   : > { %v1550_v2 = vor.u32 %v1802_v0, %v1547_v1  ;;  %v1530_v11 = vor.u32 %v1800_v9, %v1529_v8  ;;  %v1531_v13 = vld [vmem:[%s2467_s4 + $0x38] sm:$0xf0]  ;;  %v1843_v0 = vld [vmem:[%s2469_s6 + $0x90] sm:$0xff]  ;;  %v1841_v9 = vld [vmem:[%s2469_s6 + $0x80] sm:$0xff] }
 0x23b   : > { %v1851_v1 = vld [vmem:[%s2469_s6 + $0xd0] sm:$0xff] }
 0x23d   : > { %920 = vmatpush.bf16.msra.mxu3 %v1598_v30  ;;  %v1840_v30 = vld [vmem:[%s2469_s6 + $0x78] sm:$0xff] }
 0x2b7   : > { %v566_v42 = vpop.f32.mrf.mxu3 }
 0x2b8   : > { %v570_v43 = vpack.c.bf16 %v566_v42, %v566_v42  ;;  %v1582_v42 = vor.u32 %v1810_v40, %v1579_v41 }
 0x2ba   : > { %643 = vmatmul.bf16.vlgmr.msrb.gmra.mxu3 %v570_v43  ;;  %v1553_v43 = vld [vmem:[%s2467_s4 + $0x60] sm:$0xf] }
 0x2bb   : > { %921 = vmatpush.bf16.msra.mxu3 %v1582_v42 }
 0x2bf   : > { %v568_v44 = vpop.f32.mrf.mxu3 }
 0x2c0   : > { %v1807_v44 = vld [vmem:[%s2467_s4 + $0x6c] sm:$0xf0] }
 0x33d   : > { %v644_v45 = vpop.f32.mrf.mxu3 }
 0x33e   : > { %v648_v46 = vadd.f32 %v644_v45, %v2056_v47  ;;  %v1619_v47 = vld [vmem:[%s2467_s4 + $0xf0] sm:$0xf0]  ;;  %v1805_v45 = vld [vmem:[%s2467_s4 + $0x64] sm:$0xf] }
 0x33f   : > { %v1622_v56 = vor.u32 %v1821_v52, %v1619_v47  ;;  %v1562_v52 = vor.u32 %v1808_v50, %v1561_v49  ;;  %v1563_v47 = vld [vmem:[%s2467_s4 + $0x78] sm:$0xf0]  ;;  %v1847_v49 = vld [vmem:[%s2469_s6 + $0xb0] sm:$0xff] }
 0x340   : > { %649 = vadd.xlane.f32.xlu1 %v648_v46  ;;  %v1566_v54 = vor.u32 %v1806_v53, %v1563_v47  ;;  %v1855_v50 = vld [vmem:[%s2469_s6 + $0xf0] sm:$0xff]  ;;  %v1846_v53 = vld [vmem:[%s2469_s6 + $0xa8] sm:$0xff] }
 0x341   : > { %892 = vmatpush.bf16.msrb.mxu1 %v1622_v56  ;;  %909 = vmatpush.bf16.msrb.mxu2 %v1562_v52  ;;  %v1803_v56 = vld [vmem:[%s2467_s4 + $0x4c] sm:$0xf0]  ;;  %v1837_v52 = vld [vmem:[%s2469_s6 + $0x60] sm:$0xff]  ;;  %v1854_v47 = vld [vmem:[%s2469_s6 + $0xe8] sm:$0xff] }
 0x342   : > { %922 = vmatpush.bf16.msra.mxu3 %v1566_v54  ;;  %v1538_v58 = vor.u32 %v1803_v56, %v1537_v55  ;;  %v1828_v54 = vld [vmem:[%s2469_s6 + $0x18] sm:$0xff]  ;;  %v1845_v56 = vld [vmem:[%s2469_s6 + $0xa0] sm:$0xff] }
 0x343   : > { %v1836_v55 = vld [vmem:[%s2469_s6 + $0x58] sm:$0xff] }
 0x345   : > { %v646_v48 = vpop.f32.mrf.mxu3  ;;  %893 = vmatpush.bf16.msrb.mxu1 %v1606_v3  ;;  %910 = vmatpush.bf16.msrb.mxu2 %v1546_v63  ;;  %v1521_v3 = vld [vmem:[%s2467_s4 + $0x20] sm:$0xf]  ;;  %v1834_v63 = vld [vmem:[%s2469_s6 + $0x48] sm:$0xff] }
 0x346   : > { %v1555_v48 = vld [vmem:[%s2467_s4 + $0x70] sm:$0xf0]  ;;  %923 = vmatpush.bf16.msra.mxu3 %v1550_v2  ;;  %v1522_v6 = vor.u32 %v1799_v4, %v1521_v3  ;;  %v1825_v2 = vld [vmem:[%s2469_s6] sm:$0xff]  ;;  %v1842_v4 = vld [vmem:[%s2469_s6 + $0x88] sm:$0xff] }
 0x347   : > { %v1558_v51 = vor.u32 %v1805_v45, %v1555_v48  ;;  %v1856_v45 = vld [vmem:[%s2469_s6 + $0xf8] sm:$0xff]  ;;  %v1838_v48 = vld [vmem:[%s2469_s6 + $0x68] sm:$0xff]  ;;  %v1833_v3 = vld [vmem:[%s2469_s6 + $0x40] sm:$0xff] }
 0x349   : > { %894 = vmatpush.bf16.msrb.mxu1 %v1590_v26  ;;  %911 = vmatpush.bf16.msrb.mxu2 %v1530_v11  ;;  %v1794_v26 = vld [vmem:[%s2467_s4 + $0xc] sm:$0xf] }
 0x34a   : > { %v1518_v28 = vor.u32 %v1794_v26, %v1515_v27 }
 0x34d   : > { %895 = vmatpush.bf16.msrb.mxu1 %v1574_v38  ;;  %912 = vmatpush.bf16.msrb.mxu2 %v1514_v25 }
 0x351   : > { %896 = vmatpush.bf16.msrb.mxu1 %v1558_v51  ;;  %v1829_v51 = vld [vmem:[%s2469_s6 + $0x20] sm:$0xff] }
 0x355   : > { %897 = vmatpush.bf16.msrb.mxu1 %v1542_v62  ;;  %v1826_v62 = vld [vmem:[%s2469_s6 + $0x8] sm:$0xff] }
 0x359   : > { %898 = vmatpush.bf16.msrb.mxu1 %v1526_v10  ;;  %v1849_v10 = vld [vmem:[%s2469_s6 + $0xc0] sm:$0xff] }
 0x35d   : > { %899 = vmatpush.bf16.msrb.mxu1 %v1510_v24 }
 0x361   : > { %1244 = vmatpush.bf16.msra.mxu1 %v1840_v30 }
 0x3b3   : > { %v650_v15 = vpop.xlane.xlu1 %649 }
 0x3b4   : > { %v658_v16 = vmul.f32 %v2193_v14, %v650_v15  ;;  %v1534_v15 = vor.u32 %v1798_v12, %v1531_v13 }
 0x3b6   : > { %v2196_v17 = vsub.f32 %v648_v46, %v658_v16  ;;  %v1554_v46 = vor.u32 %v1807_v44, %v1553_v43  ;;  %v1505_v16 = vld [vmem:[%s2467_s4] sm:$0xf]  ;;  %924 = vmatpush.bf16.msra.mxu3 %v1534_v15  ;;  %v1831_v43 = vld [vmem:[%s2469_s6 + $0x30] sm:$0xff] }
 0x3b7   : > { %v1839_v44 = vld [vmem:[%s2469_s6 + $0x70] sm:$0xff] }
 0x3b8   : > { %v660_v18 = vmul.f32 %v2196_v17, %v2196_v17  ;;  %883 = vmatpush.bf16.msra.mxu0 %v1554_v46  ;;  %1245 = vmatpush.bf16.msra.mxu1 %v1839_v44  ;;  %v1830_v46 = vld [vmem:[%s2469_s6 + $0x28] sm:$0xff] }
 0x3ba   : > { %661 = vadd.xlane.f32.xlu1 %v660_v18  ;;  %v1795_v18 = vld [vmem:[%s2467_s4 + $0xc] sm:$0xf0]  ;;  %925 = vmatpush.bf16.msra.mxu3 %v1518_v28 }
 0x3bb   : > { %v1506_v20 = vor.u32 %v1795_v18, %v1505_v16 }
 0x3bc   : > { %884 = vmatpush.bf16.msra.mxu0 %v1538_v58  ;;  %1246 = vmatpush.bf16.msra.mxu1 %v1838_v48  ;;  %v1827_v58 = vld [vmem:[%s2469_s6 + $0x10] sm:$0xff] }
 0x3be   : > { %1270 = vmatpush.bf16.msrb.mxu3 %v1856_v45 }
 0x3c0   : > { %885 = vmatpush.bf16.msra.mxu0 %v1522_v6  ;;  %1247 = vmatpush.bf16.msra.mxu1 %v1837_v52  ;;  %v709_v6 = vld [vmem:[%s2468_s5] sm:$0xf] }
 0x3c1   : > { %v711_v7 = vperm.slane %v709_v6, 0  ;;  %v712_v8 = vperm.slane %v709_v6, 1  ;;  %v713_v19 = vperm.slane %v709_v6, 2 }
 0x3c2   : > { %1271 = vmatpush.bf16.msrb.mxu3 %v1855_v50 }
 0x3c4   : > { %886 = vmatpush.bf16.msra.mxu0 %v1506_v20  ;;  %1248 = vmatpush.bf16.msra.mxu1 %v1836_v55  ;;  %v714_v20 = vperm.slane %v709_v6, 3 }
 0x3c6   : > { %1272 = vmatpush.bf16.msrb.mxu3 %v1854_v47 }
 0x3c8   : > { %1231 = vmatpush.bf16.msrb.mxu0 %v1832_v29  ;;  %1249 = vmatpush.bf16.msra.mxu1 %v1835_v59 }
 0x3ca   : > { %1273 = vmatpush.bf16.msrb.mxu3 %v1853_v57 }
 0x3cc   : > { %1232 = vmatpush.bf16.msrb.mxu0 %v1831_v43  ;;  %1250 = vmatpush.bf16.msra.mxu1 %v1834_v63 }
 0x3ce   : > { %1274 = vmatpush.bf16.msrb.mxu3 %v1852_v61 }
 0x3d0   : > { %1233 = vmatpush.bf16.msrb.mxu0 %v1830_v46  ;;  %1251 = vmatpush.bf16.msra.mxu1 %v1833_v3 }
 0x3d2   : > { %1275 = vmatpush.bf16.msrb.mxu3 %v1851_v1 }
 0x3d4   : > { %1234 = vmatpush.bf16.msrb.mxu0 %v1829_v51 }
 0x3d6   : > { %1276 = vmatpush.bf16.msrb.mxu3 %v1850_v5  ;;  %v1867_v5 = vld [vmem:[%s2470_s7] ss:$0 sm:$0xff] }
 0x3d8   : > { %1235 = vmatpush.bf16.msrb.mxu0 %v1828_v54 }
 0x3da   : > { %1277 = vmatpush.bf16.msrb.mxu3 %v1849_v10 }
 0x3dc   : > { %1236 = vmatpush.bf16.msrb.mxu0 %v1827_v58 }
 0x3e0   : > { %1237 = vmatpush.bf16.msrb.mxu0 %v1826_v62 }
 0x3e4   : > { %1238 = vmatpush.bf16.msrb.mxu0 %v1825_v2 }
 0x42d   : > { %v662_v31 = vpop.xlane.xlu1 %661 }
 0x42e   : > { %v663_v32 = vmul.f32 %v662_v31, %v2193_v14 }
 0x430   : > { %v664_v33 = vadd.f32 1e-12, %v663_v32 }
 0x432   : > { %1874 = vrsqrt.f32 %v664_v33  ;;  %vm671_vm4 = vweird.f32 %v664_v33 }
 0x438   : > { %v1875_v34 = vpop.eup %1874 }
 0x439   : > { %v666_v35 = vmul.f32 %v1875_v34, %v664_v33  ;;  %vm672_vm3 = vweird.f32 %v1875_v34 }
 0x43a   : > { %vm673_vm5 = vmor %vm671_vm4, %vm672_vm3 }
 0x43b   : > { %v667_v36 = vmul.f32 %v1875_v34, %v666_v35 }
 0x43d   : > { %v668_v37 = vmul.f32 0.5, %v667_v36 }
 0x43f   : > { %v669_v38 = vsub.f32 1.5, %v668_v37 }
 0x441   : > { %v670_v39 = vmul.f32 %v1875_v34, %v669_v38 }
 0x443   : > { %v674_v40 = vsel %vm673_vm5, %v1875_v34, %v670_v39 }
 0x444   : > { %v2352_v41 = vmul.f32 %v674_v40, %v2196_v17  ;;  %v1848_v17 = vld [vmem:[%s2469_s6 + $0xb8] sm:$0xff] }
 0x445   : > { %1257 = vmatpush.bf16.msra.mxu2 %v1848_v17 }
 0x446   : > { %v676_v42 = vpack.c.bf16 %v2352_v41, %v2352_v41 }
 0x448   : > { %887 = vmatmul.bf16.vlgmr.msra.gmra.mxu0 %v676_v42  ;;  %900 = vmatmul.bf16.vlgmr.msrb.gmra.mxu1 %v676_v42 }
 0x449   : > { %913 = vmatmul.bf16.vlgmr.msrb.gmra.mxu2 %v676_v42  ;;  %926 = vmatmul.bf16.vlgmr.msra.gmra.mxu3 %v676_v42 }
 0x44a   : > { %1258 = vmatpush.bf16.msra.mxu2 %v1847_v49 }
 0x44e   : > { %1259 = vmatpush.bf16.msra.mxu2 %v1846_v53 }
 0x452   : > { %1260 = vmatpush.bf16.msra.mxu2 %v1845_v56 }
 0x456   : > { %1261 = vmatpush.bf16.msra.mxu2 %v1844_v60 }
 0x45a   : > { %1262 = vmatpush.bf16.msra.mxu2 %v1843_v0 }
 0x45e   : > { %1263 = vmatpush.bf16.msra.mxu2 %v1842_v4 }
 0x462   : > { %1264 = vmatpush.bf16.msra.mxu2 %v1841_v9 }
 0x4c5   : > { %v888_v11 = vpop.f32.mrf.mxu0  ;;  %v901_v12 = vpop.f32.mrf.mxu1 }
 0x4c6   : > { %v889_v13 = vadd.f32 %v888_v11, %v711_v7  ;;  %v902_v15 = vadd.f32 %v901_v12, %v712_v8 }
 0x4c8   : > { %v931_v16 = vmul.f32 %v889_v13, %v889_v13  ;;  %v932_v18 = vmul.f32 %v902_v15, %v902_v15 }
 0x4ca   : > { %v935_v21 = vmul.f32 %v931_v16, %v889_v13  ;;  %v936_v22 = vmul.f32 %v932_v18, %v902_v15 }
 0x4cc   : > { %v939_v23 = vmul.f32 0.044715, %v935_v21  ;;  %v940_v24 = vmul.f32 0.044715, %v936_v22  ;;  %v914_v25 = vpop.f32.mrf.mxu2  ;;  %v927_v26 = vpop.f32.mrf.mxu3 }
 0x4cd   : > { %v915_v27 = vadd.f32 %v914_v25, %v713_v19  ;;  %v928_v28 = vadd.f32 %v927_v26, %v714_v20  ;;  %v890_v29 = vpop.f32.mrf.mxu0  ;;  %v903_v30 = vpop.f32.mrf.mxu1 }
 0x4ce   : > { %v943_v31 = vadd.f32 %v939_v23, %v889_v13  ;;  %v944_v32 = vadd.f32 %v940_v24, %v902_v15 }
 0x4cf   : > { %v933_v33 = vmul.f32 %v915_v27, %v915_v27  ;;  %v934_v34 = vmul.f32 %v928_v28, %v928_v28 }
 0x4d0   : > { %v947_v35 = vmul.f32 0.7978846, %v943_v31  ;;  %v948_v36 = vmul.f32 0.7978846, %v944_v32 }
 0x4d1   : > { %v937_v37 = vmul.f32 %v933_v33, %v915_v27  ;;  %v938_v38 = vmul.f32 %v934_v34, %v928_v28 }
 0x4d2   : > { %1876 = vtanh.f32 %v947_v35 }
 0x4d3   : > { %1878 = vtanh.f32 %v948_v36  ;;  %v941_v39 = vmul.f32 0.044715, %v937_v37  ;;  %v942_v40 = vmul.f32 0.044715, %v938_v38 }
 0x4d4   : > { %v916_v42 = vpop.f32.mrf.mxu2  ;;  %v929_v43 = vpop.f32.mrf.mxu3 }
 0x4d5   : > { %v945_v44 = vadd.f32 %v941_v39, %v915_v27  ;;  %v946_v17 = vadd.f32 %v942_v40, %v928_v28 }
 0x4d7   : > { %v949_v45 = vmul.f32 0.7978846, %v945_v44  ;;  %v950_v46 = vmul.f32 0.7978846, %v946_v17 }
 0x4d8   : > { %v1877_v48 = vpop.eup %1876 }
 0x4d9   : > { %v1879_v49 = vpop.eup %1878  ;;  %1880 = vtanh.f32 %v949_v45  ;;  %v955_v50 = vadd.f32 1.0, %v1877_v48 }
 0x4da   : > { %1882 = vtanh.f32 %v950_v46  ;;  %v956_v51 = vadd.f32 1.0, %v1879_v49 }
 0x4db   : > { %v959_v52 = vmul.f32 0.5, %v955_v50 }
 0x4dc   : > { %v960_v53 = vmul.f32 0.5, %v956_v51 }
 0x4dd   : > { %v963_v47 = vmul.f32 %v959_v52, %v889_v13 }
 0x4de   : > { %v964_v54 = vmul.f32 %v960_v53, %v902_v15 }
 0x4df   : > { %v1881_v55 = vpop.eup %1880  ;;  %v967_v56 = vpack.c.bf16 %v963_v47, %v963_v47 }
 0x4e0   : > { %v1883_v57 = vpop.eup %1882  ;;  %v968_v58 = vpack.c.bf16 %v964_v54, %v964_v54  ;;  %v957_v59 = vadd.f32 1.0, %v1881_v55 }
 0x4e1   : > { %1239 = vmatmul.bf16.vlgmr.msrb.gmra.mxu0 %v967_v56  ;;  %v958_v60 = vadd.f32 1.0, %v1883_v57 }
 0x4e2   : > { %1252 = vmatmul.bf16.vlgmr.msra.gmra.mxu1 %v968_v58  ;;  %v961_v61 = vmul.f32 0.5, %v957_v59 }
 0x4e3   : > { %v962_v62 = vmul.f32 0.5, %v958_v60 }
 0x4e4   : > { %v965_v63 = vmul.f32 %v961_v61, %v915_v27 }
 0x4e5   : > { %v966_v0 = vmul.f32 %v962_v62, %v928_v28 }
 0x4e6   : > { %v969_v1 = vpack.c.bf16 %v965_v63, %v965_v63 }
 0x4e7   : > { %v970_v2 = vpack.c.bf16 %v966_v0, %v966_v0 }
 0x4e8   : > { %1265 = vmatmul.bf16.vlgmr.msra.gmra.mxu2 %v969_v1 }
 0x4e9   : > { %1278 = vmatmul.bf16.vlgmr.msrb.gmra.mxu3 %v970_v2 }
 0x55e   : > { %v1240_v3 = vpop.f32.mrf.mxu0 }
 0x55f   : > { %v1253_v4 = vpop.f32.mrf.mxu1  ;;  %v1241_v6 = vadd.f32 %v1867_v5, %v1240_v3 }
 0x561   : > { %v1254_v9 = vadd.f32 %v1253_v4, %v1241_v6 }
 0x566   : > { %v1242_v7 = vpop.f32.mrf.mxu0 }
 0x567   : > { %v1255_v8 = vpop.f32.mrf.mxu1 }
 0x56b   : > { %v1266_v10 = vpop.f32.mrf.mxu2 }
 0x56c   : > { %v1267_v11 = vadd.f32 %v1266_v10, %v1254_v9  ;;  %v1279_v12 = vpop.f32.mrf.mxu3 }
 0x56e   : > { %v1280_v13 = vadd.f32 %v1279_v12, %v1267_v11 }
 0x570   : > { %v1283_v15 = vadd.f32 %v1280_v13, %v2352_v41 }
 0x572   : > { %1284 = vadd.xlane.f32.xlu2 %v1283_v15 }
 0x573   : > { %v1268_v16 = vpop.f32.mrf.mxu2 }
 0x574   : > { %v1281_v18 = vpop.f32.mrf.mxu3 }
 0x5e5   : > { %v1285_v19 = vpop.xlane.xlu2 %1284 }
 0x5e6   : > { %v1286_v20 = vmul.f32 %v1285_v19, %v2193_v14 }
 0x5e8   : > { %v1287_v21 = vsub.f32 %v1283_v15, %v1286_v20 }
 0x5ea   : > { %v1288_v22 = vmul.f32 %v1287_v21, %v1287_v21 }
 0x5ec   : > { %1289 = vadd.xlane.f32.xlu2 %v1288_v22 }
 0x65f   : > { %v1290_v23 = vpop.xlane.xlu2 %1289 }
 0x660   : > { %v1291_v24 = vmul.f32 %v1290_v23, %v2193_v14 }
 0x662   : > { %v1292_v25 = vadd.f32 1e-12, %v1291_v24 }
 0x664   : > { %1884 = vrsqrt.f32 %v1292_v25  ;;  %vm1299_vm7 = vweird.f32 %v1292_v25 }
 0x66a   : > { %v1885_v26 = vpop.eup %1884 }
 0x66b   : > { %v1294_v27 = vmul.f32 %v1885_v26, %v1292_v25  ;;  %vm1300_vm6 = vweird.f32 %v1885_v26 }
 0x66c   : > { %vm1301_vm8 = vmor %vm1299_vm7, %vm1300_vm6 }
 0x66d   : > { %v1295_v28 = vmul.f32 %v1885_v26, %v1294_v27 }
 0x66f   : > { %v1296_v29 = vmul.f32 0.5, %v1295_v28 }
 0x671   : > { %v1297_v41 = vsub.f32 1.5, %v1296_v29 }
 0x673   : > { %v1298_v30 = vmul.f32 %v1885_v26, %v1297_v41 }
 0x675   : > { %v1302_v31 = vsel %vm1301_vm8, %v1885_v26, %v1298_v30 }
 0x676   : > { %v1303_v32 = vmul.f32 %v1302_v31, %v1287_v21 }
 0x678   : > { %1304 = vst [vmem:[%s314_s20] sm:$0xff] %v1303_v32 }
 0x679 PF: > { %s18_s27 = sadd.s32 1, %s1892_s27  }
 0x67a   : > { %p15_p4 = scmp.ge.s32.totalorder %s18_s27, 4  }
 0x67c   :  { %17 = sbr.rel (!%p15_p4) target bundleno = 1 (0x1), region = 85 }

// kernel: bert_classifier_forward.5
= control target key start
LH: loop header
LB: loop body
LE: loop exit
PB: predicated region body
PF: predicated region fallthrough
CT: control target
= control target key end

     0   :  { %s4112_s0 = inlined_call_operand.vmem [shape: f32[2,8,512], index: 0, kind: input, shape index: {}]   ;;  %s4113_s1 = inlined_call_operand.vmem [shape: bf16[128,512], index: 1, kind: input, shape index: {}]   ;;  %s4114_s2 = inlined_call_operand.vmem [shape: bf16[128,128], index: 2, kind: input, shape index: {}]   ;;  %s4115_s3 = inlined_call_operand.vmem [shape: f32[1,128], index: 3, kind: input, shape index: {}]   ;;  %s4116_s4 = inlined_call_operand.hbm [shape: f32[2,128], index: 4, kind: output, shape index: {}]  }
   0x1   :  { %v2229_v0 = vld [vmem:[%s4113_s1 + $0xe0] sm:$0xf]  ;;  %v2353_v1 = vld [vmem:[%s4113_s1 + $0xec] sm:$0xf0]  ;;  %v2351_v2 = vld [vmem:[%s4113_s1 + $0xe4] sm:$0xf] }
   0x2   :  { %v2700_v3 = vor.u32 %v2353_v1, %v2229_v0  ;;  %v2231_v4 = vld [vmem:[%s4113_s1 + $0xf0] sm:$0xf0]  ;;  %v2237_v5 = vld [vmem:[%s4113_s1 + $0xe8] sm:$0xf]  ;;  %v2354_v6 = vld [vmem:[%s4113_s1 + $0xf4] sm:$0xf0] }
   0x3   :  { %v2711_v7 = vor.u32 %v2351_v2, %v2231_v4  ;;  %v2713_v8 = vor.u32 %v2354_v6, %v2237_v5  ;;  %v2213_v9 = vld [vmem:[%s4113_s1 + $0xc0] sm:$0xf]  ;;  %v2349_v10 = vld [vmem:[%s4113_s1 + $0xcc] sm:$0xf0]  ;;  %v2347_v11 = vld [vmem:[%s4113_s1 + $0xc4] sm:$0xf] }
   0x4   :  { %227 = vmatpush.bf16.msra.mxu0 %v2700_v3  ;;  %v2725_v12 = vor.u32 %v2349_v10, %v2213_v9  ;;  %v2215_v13 = vld [vmem:[%s4113_s1 + $0xd0] sm:$0xf0]  ;;  %v2221_v14 = vld [vmem:[%s4113_s1 + $0xc8] sm:$0xf]  ;;  %v2350_v15 = vld [vmem:[%s4113_s1 + $0xd4] sm:$0xf0] }
   0x5   :  { %240 = vmatpush.bf16.msra.mxu1 %v2711_v7  ;;  %253 = vmatpush.bf16.msra.mxu2 %v2713_v8  ;;  %v2738_v16 = vor.u32 %v2347_v11, %v2215_v13  ;;  %v2740_v17 = vor.u32 %v2350_v15, %v2221_v14  ;;  %v2352_v18 = vld [vmem:[%s4113_s1 + $0xec] sm:$0xf]  ;;  %v2239_v19 = vld [vmem:[%s4113_s1 + $0xf8] sm:$0xf0]  ;;  %v2197_v20 = vld [vmem:[%s4113_s1 + $0xa0] sm:$0xf] }
   0x6   :  { %v2751_v21 = vor.u32 %v2352_v18, %v2239_v19  ;;  %v2345_v22 = vld [vmem:[%s4113_s1 + $0xac] sm:$0xf0]  ;;  %v2343_v23 = vld [vmem:[%s4113_s1 + $0xa4] sm:$0xf]  ;;  %v2199_v24 = vld [vmem:[%s4113_s1 + $0xb0] sm:$0xf0] }
   0x7   :  { %v2205_v25 = vld [vmem:[%s4113_s1 + $0xa8] sm:$0xf]  ;;  %v2346_v26 = vld [vmem:[%s4113_s1 + $0xb4] sm:$0xf0]  ;;  %v2348_v27 = vld [vmem:[%s4113_s1 + $0xcc] sm:$0xf]  ;;  %v2773_v28 = vor.u32 %v2345_v22, %v2197_v20  ;;  %v2786_v32 = vor.u32 %v2343_v23, %v2199_v24 }
   0x8   :  { %228 = vmatpush.bf16.msra.mxu0 %v2725_v12  ;;  %266 = vmatpush.bf16.msra.mxu3 %v2751_v21  ;;  %v2223_v29 = vld [vmem:[%s4113_s1 + $0xd8] sm:$0xf0]  ;;  %v2181_v30 = vld [vmem:[%s4113_s1 + $0x80] sm:$0xf]  ;;  %v2341_v31 = vld [vmem:[%s4113_s1 + $0x8c] sm:$0xf0]  ;;  %v2788_v33 = vor.u32 %v2346_v26, %v2205_v25 }
   0x9   :  { %241 = vmatpush.bf16.msra.mxu1 %v2738_v16  ;;  %254 = vmatpush.bf16.msra.mxu2 %v2740_v17  ;;  %v2790_v34 = vor.u32 %v2348_v27, %v2223_v29  ;;  %v2339_v35 = vld [vmem:[%s4113_s1 + $0x84] sm:$0xf]  ;;  %v2183_v36 = vld [vmem:[%s4113_s1 + $0x90] sm:$0xf0]  ;;  %v2189_v37 = vld [vmem:[%s4113_s1 + $0x88] sm:$0xf]  ;;  %v2812_v41 = vor.u32 %v2341_v31, %v2181_v30 }
   0xa   :  { %v2342_v38 = vld [vmem:[%s4113_s1 + $0x94] sm:$0xf0]  ;;  %v2344_v39 = vld [vmem:[%s4113_s1 + $0xac] sm:$0xf]  ;;  %v2207_v40 = vld [vmem:[%s4113_s1 + $0xb8] sm:$0xf0]  ;;  %v2824_v45 = vor.u32 %v2339_v35, %v2183_v36 }
   0xb   :  { %v2814_v42 = vor.u32 %v2344_v39, %v2207_v40  ;;  %v2165_v43 = vld [vmem:[%s4113_s1 + $0x60] sm:$0xf]  ;;  %v2337_v44 = vld [vmem:[%s4113_s1 + $0x6c] sm:$0xf0]  ;;  %v2826_v46 = vor.u32 %v2342_v38, %v2189_v37  ;;  %v2335_v47 = vld [vmem:[%s4113_s1 + $0x64] sm:$0xf] }
   0xc   :  { %229 = vmatpush.bf16.msra.mxu0 %v2773_v28  ;;  %267 = vmatpush.bf16.msra.mxu3 %v2790_v34  ;;  %v2340_v48 = vld [vmem:[%s4113_s1 + $0x8c] sm:$0xf]  ;;  %v2191_v49 = vld [vmem:[%s4113_s1 + $0x98] sm:$0xf0]  ;;  %v2167_v50 = vld [vmem:[%s4113_s1 + $0x70] sm:$0xf0]  ;;  %v2848_v53 = vor.u32 %v2337_v44, %v2165_v43 }
   0xd   :  { %242 = vmatpush.bf16.msra.mxu1 %v2786_v32  ;;  %255 = vmatpush.bf16.msra.mxu2 %v2788_v33  ;;  %v2173_v51 = vld [vmem:[%s4113_s1 + $0x68] sm:$0xf]  ;;  %v2338_v52 = vld [vmem:[%s4113_s1 + $0x74] sm:$0xf0]  ;;  %v2850_v54 = vor.u32 %v2340_v48, %v2191_v49  ;;  %v2149_v55 = vld [vmem:[%s4113_s1 + $0x40] sm:$0xf]  ;;  %v2860_v57 = vor.u32 %v2335_v47, %v2167_v50 }
   0xe   :  { %v2333_v56 = vld [vmem:[%s4113_s1 + $0x4c] sm:$0xf0]  ;;  %v2862_v58 = vor.u32 %v2338_v52, %v2173_v51  ;;  %v2331_v59 = vld [vmem:[%s4113_s1 + $0x44] sm:$0xf]  ;;  %v2336_v60 = vld [vmem:[%s4113_s1 + $0x6c] sm:$0xf] }
   0xf   :  { %v2175_v61 = vld [vmem:[%s4113_s1 + $0x78] sm:$0xf0]  ;;  %v2151_v62 = vld [vmem:[%s4113_s1 + $0x50] sm:$0xf0]  ;;  %v2157_v63 = vld [vmem:[%s4113_s1 + $0x48] sm:$0xf]  ;;  %v2887_v2 = vor.u32 %v2333_v56, %v2149_v55 }
  0x10   :  { %230 = vmatpush.bf16.msra.mxu0 %v2812_v41  ;;  %268 = vmatpush.bf16.msra.mxu3 %v2814_v42  ;;  %v2334_v0 = vld [vmem:[%s4113_s1 + $0x54] sm:$0xf0]  ;;  %v2133_v1 = vld [vmem:[%s4113_s1 + $0x20] sm:$0xf]  ;;  %v2889_v4 = vor.u32 %v2336_v60, %v2175_v61  ;;  %v2329_v5 = vld [vmem:[%s4113_s1 + $0x2c] sm:$0xf0]  ;;  %v2902_v10 = vor.u32 %v2331_v59, %v2151_v62 }
  0x11   :  { %243 = vmatpush.bf16.msra.mxu1 %v2824_v45  ;;  %256 = vmatpush.bf16.msra.mxu2 %v2826_v46  ;;  %v2327_v6 = vld [vmem:[%s4113_s1 + $0x24] sm:$0xf]  ;;  %v2135_v9 = vld [vmem:[%s4113_s1 + $0x30] sm:$0xf0]  ;;  %v2904_v11 = vor.u32 %v2334_v0, %v2157_v63  ;;  %v2332_v13 = vld [vmem:[%s4113_s1 + $0x4c] sm:$0xf]  ;;  %v2920_v20 = vor.u32 %v2329_v5, %v2133_v1 }
  0x12   :  { %v2159_v14 = vld [vmem:[%s4113_s1 + $0x58] sm:$0xf0]  ;;  %v2141_v15 = vld [vmem:[%s4113_s1 + $0x28] sm:$0xf]  ;;  %v2330_v18 = vld [vmem:[%s4113_s1 + $0x34] sm:$0xf0] }
  0x13   :  { %v2664_v19 = vmov 0.0   ;;  %v2922_v22 = vor.u32 %v2332_v13, %v2159_v14  ;;  %v2117_v23 = vld [vmem:[%s4113_s1] sm:$0xf]  ;;  %v2325_v24 = vld [vmem:[%s4113_s1 + $0xc] sm:$0xf0] }
  0x14   :  { %231 = vmatpush.bf16.msra.mxu0 %v2848_v53  ;;  %269 = vmatpush.bf16.msra.mxu3 %v2850_v54  ;;  %22 = vst [vmem:[#allocation2] sm:$0x3] %v2664_v19 }
  0x15   :  { %244 = vmatpush.bf16.msra.mxu1 %v2860_v57  ;;  %257 = vmatpush.bf16.msra.mxu2 %v2862_v58  ;;  %23 = vst [vmem:[#allocation3] sm:$0x3] %v2664_v19 }
  0x18   :  { %232 = vmatpush.bf16.msra.mxu0 %v2887_v2  ;;  %270 = vmatpush.bf16.msra.mxu3 %v2889_v4 }
  0x19   :  { %9 = vsyncpa [#allocation5], 0  ;;  %245 = vmatpush.bf16.msra.mxu1 %v2902_v10  ;;  %258 = vmatpush.bf16.msra.mxu2 %v2904_v11  ;;  %v2932_v25 = vor.u32 %v2327_v6, %v2135_v9  ;;  %v2934_v26 = vor.u32 %v2330_v18, %v2141_v15  ;;  %v2323_v27 = vld [vmem:[%s4113_s1 + $0x4] sm:$0xf]  ;;  %v2328_v29 = vld [vmem:[%s4113_s1 + $0x2c] sm:$0xf]  ;;  %v2956_v37 = vor.u32 %v2325_v24, %v2117_v23 }
  0x1a   :  { %v2143_v30 = vld [vmem:[%s4113_s1 + $0x38] sm:$0xf0]  ;;  %v2119_v31 = vld [vmem:[%s4113_s1 + $0x10] sm:$0xf0]  ;;  %v2125_v35 = vld [vmem:[%s4113_s1 + $0x8] sm:$0xf] }
  0x1b   :  { %4161 = vst [vmem:[#allocation7_spill] sm:$0xff] %v2934_v26  ;;  %v2326_v36 = vld [vmem:[%s4113_s1 + $0x14] sm:$0xf0]  ;;  %v2958_v38 = vor.u32 %v2328_v29, %v2143_v30  ;;  %v2962_v39 = vor.u32 %v2323_v27, %v2119_v31  ;;  %v64_v43 = vld [vmem:[#allocation2] sm:$0x3]  ;;  %v3051_v51 = vld [vmem:[%s4112_s0 + $0x8] sm:$0xff] }
  0x1c   :  { %233 = vmatpush.bf16.msra.mxu0 %v2920_v20  ;;  %271 = vmatpush.bf16.msra.mxu3 %v2922_v22  ;;  %4162 = vst [vmem:[#allocation8_spill] sm:$0xff] %v2956_v37  ;;  %v2964_v40 = vor.u32 %v2326_v36, %v2125_v35  ;;  %v2324_v44 = vld [vmem:[%s4113_s1 + $0xc] sm:$0xf]  ;;  %v2127_v47 = vld [vmem:[%s4113_s1 + $0x18] sm:$0xf0]  ;;  %v66_v48 = vpack.c.bf16 %v64_v43, %v64_v43  ;;  %v3046_v50 = vld [vmem:[%s4112_s0] sm:$0xff] }
  0x1d   :  { %4163 = vst [vmem:[#allocation9_spill] sm:$0xff] %v2958_v38  ;;  %246 = vmatpush.bf16.msra.mxu1 %v2932_v25  ;;  %259 = vmatpush.bf16.msra.mxu2 %v2934_v26  ;;  %v2976_v49 = vor.u32 %v2324_v44, %v2127_v47  ;;  %v3056_v52 = vld [vmem:[%s4112_s0 + $0x20] sm:$0xff]  ;;  %v3062_v60 = vld [vmem:[%s4112_s0 + $0x28] sm:$0xff]  ;;  %v3070_v13 = vld [vmem:[%s4112_s0 + $0x10] sm:$0xff]  ;;  %s2665_s22 = smov [#allocation4]   ;;  %s2106_s26 = sshll.u32 %s4116_s4, 4  ;;  %s2107_s26 = int_to_ptr.hbm [resolvable:$true] %s2106_s26 }
  0x1e   :  { %4164 = vst [vmem:[#allocation10_spill] sm:$0xff] %v2962_v39  ;;  %v3075_v15 = vld [vmem:[%s4112_s0 + $0x30] sm:$0xff]  ;;  %s2104_s23 = sshll.u32 %s2665_s22, 4  ;;  %s2105_s23 = int_to_ptr.vmem [resolvable:$true] %s2104_s23 }
  0x1f   :  { %4165 = vst [vmem:[#allocation11_spill] sm:$0xff] %v2964_v40 }
  0x20   :  { %234 = vmatpush.bf16.msra.mxu0 %v2956_v37  ;;  %272 = vmatpush.bf16.msra.mxu3 %v2958_v38  ;;  %4166 = vst [vmem:[#allocation12_spill] sm:$0xff] %v2976_v49 }
  0x21   :  { %247 = vmatpush.bf16.msra.mxu1 %v2962_v39  ;;  %260 = vmatpush.bf16.msra.mxu2 %v2964_v40  ;;  %4167 = vst [vmem:[#allocation13_spill] sm:$0xff] %v3046_v50 }
  0x22   :  { %4168 = vst [vmem:[#allocation14_spill] sm:$0xff] %v3051_v51 }
  0x23   :  { %235 = vmatmul.bf16.vlgmr.msra.gmra.mxu0 %v66_v48  ;;  %4169 = vst [vmem:[#allocation15_spill] sm:$0xff] %v3056_v52 }
  0x24   :  { %444 = vmatpush.bf16.msrb.mxu0 %v2700_v3  ;;  %248 = vmatmul.bf16.vlgmr.msra.gmra.mxu1 %v66_v48  ;;  %4170 = vst [vmem:[#allocation16_spill] sm:$0xff] %v3062_v60 }
  0x25   :  { %457 = vmatpush.bf16.msrb.mxu1 %v2711_v7  ;;  %470 = vmatpush.bf16.msrb.mxu2 %v2713_v8  ;;  %4171 = vst [vmem:[#allocation17_spill] sm:$0xff] %v3070_v13 }
  0x26   :  { %261 = vmatmul.bf16.vlgmr.msra.gmra.mxu2 %v66_v48  ;;  %273 = vmatpush.bf16.msra.mxu3 %v2976_v49  ;;  %4172 = vst [vmem:[#allocation18_spill] sm:$0xff] %v3075_v15 }
  0x28   :  { %445 = vmatpush.bf16.msrb.mxu0 %v2725_v12 }
  0x29   :  { %458 = vmatpush.bf16.msrb.mxu1 %v2738_v16  ;;  %471 = vmatpush.bf16.msrb.mxu2 %v2740_v17 }
  0x2a   :  { %483 = vmatpush.bf16.msrb.mxu3 %v2751_v21 }
  0x2b   :  { %274 = vmatmul.bf16.vlgmr.msra.gmra.mxu3 %v66_v48 }
  0x2c   :  { %446 = vmatpush.bf16.msrb.mxu0 %v2773_v28 }
  0x2d   :  { %459 = vmatpush.bf16.msrb.mxu1 %v2786_v32  ;;  %472 = vmatpush.bf16.msrb.mxu2 %v2788_v33 }
  0x2e   :  { %484 = vmatpush.bf16.msrb.mxu3 %v2790_v34 }
  0x30   :  { %447 = vmatpush.bf16.msrb.mxu0 %v2812_v41 }
  0x31   :  { %460 = vmatpush.bf16.msrb.mxu1 %v2824_v45  ;;  %473 = vmatpush.bf16.msrb.mxu2 %v2826_v46 }
  0x32   :  { %485 = vmatpush.bf16.msrb.mxu3 %v2814_v42 }
  0x34   :  { %448 = vmatpush.bf16.msrb.mxu0 %v2848_v53 }
  0x35   :  { %461 = vmatpush.bf16.msrb.mxu1 %v2860_v57  ;;  %474 = vmatpush.bf16.msrb.mxu2 %v2862_v58 }
  0x36   :  { %486 = vmatpush.bf16.msrb.mxu3 %v2850_v54 }
  0x38   :  { %449 = vmatpush.bf16.msrb.mxu0 %v2887_v2 }
  0x39   :  { %462 = vmatpush.bf16.msrb.mxu1 %v2902_v10  ;;  %475 = vmatpush.bf16.msrb.mxu2 %v2904_v11 }
  0x3a   :  { %487 = vmatpush.bf16.msrb.mxu3 %v2889_v4 }
  0x3c   :  { %450 = vmatpush.bf16.msrb.mxu0 %v2920_v20 }
  0x3d   :  { %463 = vmatpush.bf16.msrb.mxu1 %v2932_v25  ;;  %476 = vmatpush.bf16.msrb.mxu2 %v2934_v26 }
  0x3e   :  { %488 = vmatpush.bf16.msrb.mxu3 %v2922_v22 }
  0x40   :  { %451 = vmatpush.bf16.msrb.mxu0 %v2956_v37 }
  0x41   :  { %464 = vmatpush.bf16.msrb.mxu1 %v2962_v39  ;;  %477 = vmatpush.bf16.msrb.mxu2 %v2964_v40 }
  0x42   :  { %489 = vmatpush.bf16.msrb.mxu3 %v2958_v38 }
  0x44   :  { %662 = vmatpush.bf16.msra.mxu0 %v2700_v3 }
  0x45   :  { %675 = vmatpush.bf16.msra.mxu1 %v2711_v7  ;;  %688 = vmatpush.bf16.msra.mxu2 %v2713_v8 }
  0x46   :  { %490 = vmatpush.bf16.msrb.mxu3 %v2976_v49 }
  0x48   :  { %663 = vmatpush.bf16.msra.mxu0 %v2725_v12 }
  0x49   :  { %676 = vmatpush.bf16.msra.mxu1 %v2738_v16  ;;  %689 = vmatpush.bf16.msra.mxu2 %v2740_v17 }
  0x4a   :  { %701 = vmatpush.bf16.msra.mxu3 %v2751_v21 }
  0x4c   :  { %664 = vmatpush.bf16.msra.mxu0 %v2773_v28 }
  0x4d   :  { %677 = vmatpush.bf16.msra.mxu1 %v2786_v32  ;;  %690 = vmatpush.bf16.msra.mxu2 %v2788_v33 }
  0x4e   :  { %702 = vmatpush.bf16.msra.mxu3 %v2790_v34 }
  0x50   :  { %665 = vmatpush.bf16.msra.mxu0 %v2812_v41 }
  0x51   :  { %678 = vmatpush.bf16.msra.mxu1 %v2824_v45  ;;  %691 = vmatpush.bf16.msra.mxu2 %v2826_v46 }
  0x52   :  { %703 = vmatpush.bf16.msra.mxu3 %v2814_v42 }
  0x54   :  { %666 = vmatpush.bf16.msra.mxu0 %v2848_v53 }
  0x55   :  { %679 = vmatpush.bf16.msra.mxu1 %v2860_v57  ;;  %692 = vmatpush.bf16.msra.mxu2 %v2862_v58 }
  0x56   :  { %704 = vmatpush.bf16.msra.mxu3 %v2850_v54 }
  0x58   :  { %667 = vmatpush.bf16.msra.mxu0 %v2887_v2 }
  0x59   :  { %680 = vmatpush.bf16.msra.mxu1 %v2902_v10  ;;  %693 = vmatpush.bf16.msra.mxu2 %v2904_v11 }
  0x5a   :  { %705 = vmatpush.bf16.msra.mxu3 %v2889_v4 }
  0x5c   :  { %668 = vmatpush.bf16.msra.mxu0 %v2920_v20 }
  0x5d   :  { %681 = vmatpush.bf16.msra.mxu1 %v2932_v25  ;;  %694 = vmatpush.bf16.msra.mxu2 %v2934_v26 }
  0x5e   :  { %706 = vmatpush.bf16.msra.mxu3 %v2922_v22 }
  0x60   :  { %669 = vmatpush.bf16.msra.mxu0 %v2956_v37 }
  0x61   :  { %682 = vmatpush.bf16.msra.mxu1 %v2962_v39  ;;  %695 = vmatpush.bf16.msra.mxu2 %v2964_v40 }
  0x62   :  { %707 = vmatpush.bf16.msra.mxu3 %v2958_v38 }
  0x66   :  { %708 = vmatpush.bf16.msra.mxu3 %v2976_v49 }
  0xa0   :  { %v236_v55 = vpop.f32.mrf.mxu0 }
  0xa1   :  { %v283_v56 = vrot.slane %v236_v55, 1  ;;  %v295_v59 = vadd.f32 %v236_v55, %v3046_v50  ;;  %v249_v61 = vpop.f32.mrf.mxu1 }
  0xa2   :  { %v284_v62 = vrot.slane %v249_v61, 1  ;;  %v296_v63 = vadd.f32 %v249_v61, %v3051_v51  ;;  %v3092_v61 = vld [vmem:[%s4112_s0 + $0x18] sm:$0xff] }
  0xa3   :  { %v299_v0 = vadd.f32 %v283_v56, %v3056_v52  ;;  %v2243_v1 = vmul.f32 -1.442695, %v295_v59  ;;  %4173 = vst [vmem:[#allocation19_spill] sm:$0xff] %v3092_v61 }
  0xa4   :  { %v300_v5 = vadd.f32 %v284_v62, %v3062_v60  ;;  %v2244_v6 = vmul.f32 -1.442695, %v296_v63 }
  0xa5   :  { %2366 = vpow2.f32 %v2243_v1  ;;  %v2246_v9 = vmul.f32 -1.442695, %v299_v0  ;;  %v3100_v1 = vld [vmem:[%s4112_s0 + $0x38] sm:$0xff] }
  0xa6   :  { %2368 = vpow2.f32 %v2244_v6  ;;  %v2247_v14 = vmul.f32 -1.442695, %v300_v5  ;;  %4174 = vst [vmem:[#allocation20_spill] sm:$0xff] %v3100_v1  ;;  %v3102_v5 = vld [vmem:[#allocation3] sm:$0x3] }
  0xa7   :  { %2370 = vpow2.f32 %v2246_v9 }
  0xa8   :  { %2372 = vpow2.f32 %v2247_v14  ;;  %v238_v24 = vpop.f32.mrf.mxu0 }
  0xa9   :  { %v262_v18 = vpop.f32.mrf.mxu2  ;;  %v251_v27 = vpop.f32.mrf.mxu1 }
  0xaa   :  { %v285_v19 = vrot.slane %v262_v18, 1  ;;  %v297_v23 = vadd.f32 %v262_v18, %v3070_v13 }
  0xab   :  { %v2367_v31 = vpop.eup %2366 }
  0xac   :  { %v301_v29 = vadd.f32 %v285_v19, %v3075_v15  ;;  %v2245_v30 = vmul.f32 -1.442695, %v297_v23  ;;  %v2369_v36 = vpop.eup %2368  ;;  %v3079_v43 = vadd.f32 1.0, %v2367_v31 }
  0xad   :  { %v2371_v44 = vpop.eup %2370  ;;  %v3081_v47 = vadd.f32 1.0, %v2369_v36 }
  0xae   :  { %v275_v35 = vpop.f32.mrf.mxu3  ;;  %2374 = vpow2.f32 %v2245_v30  ;;  %v2373_v48 = vpop.eup %2372  ;;  %v3083_v55 = vadd.f32 1.0, %v2371_v44  ;;  %v2248_v56 = vmul.f32 -1.442695, %v301_v29  ;;  %v336_v14 = vand.u32 2147483647, %v3079_v43 }
  0xaf   :  { %2376 = vrcp.f32 %v3079_v43  ;;  %v3086_v59 = vadd.f32 1.0, %v2373_v48  ;;  %v286_v63 = vrot.slane %v275_v35, 1  ;;  %v353_v0 = vand.u32 2147483648, %v3081_v47 }
  0xb0   :  { %2378 = vrcp.f32 %v3081_v47  ;;  %v298_v9 = vadd.f32 %v275_v35, %v3092_v61  ;;  %v338_v19 = vand.u32 2147483648, %v3079_v43  ;;  %v351_v23 = vand.u32 2147483647, %v3081_v47 }
  0xb1   :  { %v264_v62 = vpop.f32.mrf.mxu2  ;;  %2380 = vrcp.f32 %v3083_v55  ;;  %v398_v29 = vand.u32 2147483648, %v3086_v59  ;;  %v302_v30 = vadd.f32 %v286_v63, %v3100_v1  ;;  %vm332_vm0 = vweird.f32 %v3079_v43 }
  0xb2   :  { %2382 = vrcp.f32 %v3086_v59  ;;  %vm347_vm1 = vweird.f32 %v3081_v47  ;;  %v354_v44 = vor.u32 1.1754944e-38, %v353_v0  ;;  %vm392_vm2 = vweird.f32 %v3086_v59 }
  0xb3   :  { %2384 = vpow2.f32 %v2248_v56  ;;  %vm3119_vm3 = vcmp.eq.f32.partialorder %v336_v14, 8.507059e+37  ;;  %v339_v31 = vor.u32 1.1754944e-38, %v338_v19  ;;  %vm3124_vm4 = vcmp.eq.f32.partialorder %v351_v23, 8.507059e+37 }
  0xb4   :  { %v2375_v6 = vpop.eup %2374  ;;  %v399_v15 = vor.u32 1.1754944e-38, %v398_v29  ;;  %vm377_vm5 = vweird.f32 %v3083_v55  ;;  %v396_v29 = vand.u32 2147483647, %v3086_v59  ;;  %v4179_v62 = vrot.slane %v3102_v5, 1 }
  0xb5   :  { %v3106_v18 = vadd.f32 1.0, %v2375_v6  ;;  %v2377_v27 = vpop.eup %2376 }
  0xb6   :  { %v277_v24 = vpop.f32.mrf.mxu3  ;;  %v2379_v36 = vpop.eup %2378  ;;  %v328_v35 = vmul.f32 %v2377_v27, %v3079_v43  ;;  %vm333_vm6 = vweird.f32 %v2377_v27  ;;  %vm397_vm14 = vcmp.eq.f32.partialorder %v396_v29, 8.507059e+37 }
  0xb7   :  { %2386 = vrcp.f32 %v3106_v18  ;;  %v2381_v48 = vpop.eup %2380  ;;  %v343_v56 = vmul.f32 %v2379_v36, %v3081_v47  ;;  %vm348_vm7 = vweird.f32 %v2379_v36  ;;  %vm334_vm9 = vmor %vm332_vm0, %vm333_vm6 }
  0xb8   :  { %2388 = vtanh.f32 %v298_v9  ;;  %v2383_v63 = vpop.eup %2382  ;;  %v329_v6 = vsub.f32 1.0, %v328_v35  ;;  %v373_v24 = vmul.f32 %v2381_v48, %v3083_v55  ;;  %vm349_vm10 = vmor %vm347_vm1, %vm348_vm7  ;;  %vm378_vm11 = vweird.f32 %v2381_v48 }
  0xb9   :  { %v2385_v0 = vpop.eup %2384  ;;  %v344_v1 = vsub.f32 1.0, %v343_v56  ;;  %v388_v13 = vmul.f32 %v2383_v63, %v3086_v59  ;;  %2390 = vtanh.f32 %v302_v30  ;;  %v383_v56 = vand.u32 2147483648, %v3083_v55  ;;  %vm379_vm13 = vmor %vm377_vm5, %vm378_vm11 }
  0xba   :  { %v374_v14 = vsub.f32 1.0, %v373_v24  ;;  %v3130_v51 = vadd.f32 1.0, %v2385_v0  ;;  %v330_v9 = vmul.f32 %v2377_v27, %v329_v6  ;;  %vm393_vm8 = vweird.f32 %v2383_v63 }
  0xbb   :  { %v345_v35 = vmul.f32 %v2379_v36, %v344_v1  ;;  %v389_v50 = vsub.f32 1.0, %v388_v13  ;;  %v381_v24 = vand.u32 2147483647, %v3083_v55  ;;  %vm394_vm12 = vmor %vm392_vm2, %vm393_vm8  ;;  %v384_v47 = vor.u32 1.1754944e-38, %v383_v56 }
  0xbc   :  { %2392 = vrcp.f32 %v3130_v51  ;;  %v331_v23 = vadd.f32 %v2377_v27, %v330_v9  ;;  %v375_v30 = vmul.f32 %v2381_v48, %v374_v14  ;;  %vm362_vm1 = vweird.f32 %v3106_v18 }
  0xbd   :  { %v3132_v19 = vpop.eup %2386  ;;  %v390_v52 = vmul.f32 %v2383_v63, %v389_v50  ;;  %v346_v13 = vadd.f32 %v2379_v36, %v345_v35  ;;  %vm382_vm15 = vcmp.eq.f32.partialorder %v381_v24, 8.507059e+37  ;;  %vm440_vm8 = vcmask 1041409  }
  0xbe   :  { %v2389_v60 = vpop.eup %2388  ;;  %v358_v6 = vmul.f32 %v3132_v19, %v3106_v18  ;;  %v335_v1 = vsel %vm334_vm9, %v2377_v27, %v331_v23  ;;  %v376_v35 = vadd.f32 %v2381_v48, %v375_v30  ;;  %vm363_vm0 = vweird.f32 %v3132_v19 }
  0xbf   :  { %v340_v50 = vsel %vm3119_vm3, %v339_v31, %v335_v1  ;;  %v350_v9 = vsel %vm349_vm10, %v2379_v36, %v346_v13  ;;  %v391_v49 = vadd.f32 %v2383_v63, %v390_v52  ;;  %v2391_v27 = vpop.eup %2390  ;;  %vm364_vm3 = vmor %vm362_vm1, %vm363_vm0  ;;  %v411_v1 = vand.u32 2147483647, %v3130_v51 }
  0xc0   :  { %v359_v0 = vsub.f32 1.0, %v358_v6  ;;  %v355_v43 = vsel %vm3124_vm4, %v354_v44, %v350_v9  ;;  %v425_v40 = vmul.f32 %v2389_v60, %v340_v50  ;;  %v380_v36 = vsel %vm379_vm13, %v2381_v48, %v376_v35 }
  0xc1   :  { %v395_v23 = vsel %vm394_vm12, %v2383_v63, %v391_v49  ;;  %v423_v31 = vmul.f32 %v355_v43, %v3102_v5  ;;  %v385_v44 = vsel %vm382_vm15, %v384_v47, %v380_v36  ;;  %v368_v48 = vand.u32 2147483648, %v3106_v18 }
  0xc2   :  { %v360_v14 = vmul.f32 %v3132_v19, %v359_v0  ;;  %v2393_v52 = vpop.eup %2392  ;;  %v400_v59 = vsel %vm397_vm14, %v399_v15, %v395_v23  ;;  %v426_v6 = vmul.f32 %v2391_v27, %v385_v44  ;;  %v366_v5 = vand.u32 2147483647, %v3106_v18 }
  0xc3   :  { %v403_v61 = vmul.f32 %v2393_v52, %v3130_v51  ;;  %v424_v60 = vmul.f32 %v4179_v62, %v400_v59  ;;  %v3157_v56 = vadd.f32 %v425_v40, %v423_v31  ;;  %vm408_vm2 = vweird.f32 %v2393_v52  ;;  %v4181_v59 = vld [vmem:[#allocation12_spill] sm:$0xff] }
  0xc4   :  { %v361_v49 = vadd.f32 %v3132_v19, %v360_v14  ;;  %v413_v40 = vand.u32 2147483648, %v3130_v51  ;;  %vm407_vm4 = vweird.f32 %v3130_v51  ;;  %v369_v30 = vor.u32 1.1754944e-38, %v368_v48 }
  0xc5   :  { %v404_v55 = vsub.f32 1.0, %v403_v61  ;;  %2394 = vtanh.f32 %v3157_v56  ;;  %v3163_v63 = vadd.f32 %v426_v6, %v424_v60  ;;  %vm409_vm5 = vmor %vm407_vm4, %vm408_vm2  ;;  %vm367_vm6 = vcmp.eq.f32.partialorder %v366_v5, 8.507059e+37  ;;  %v4182_v60 = vld [vmem:[#allocation15_spill] sm:$0xff] }
  0xc6   :  { %v365_v29 = vsel %vm364_vm3, %v3132_v19, %v361_v49  ;;  %v414_v18 = vor.u32 1.1754944e-38, %v413_v40  ;;  %vm412_vm7 = vcmp.eq.f32.partialorder %v411_v1, 8.507059e+37  ;;  %v4183_v49 = vld [vmem:[#allocation16_spill] sm:$0xff] }
  0xc7   :  { %v405_v15 = vmul.f32 %v2393_v52, %v404_v55  ;;  %2396 = vtanh.f32 %v3163_v63  ;;  %v370_v50 = vsel %vm367_vm6, %v369_v30, %v365_v29  ;;  %v4185_v29 = vld [vmem:[#allocation14_spill] sm:$0xff] }
  0xc9   :  { %v406_v13 = vadd.f32 %v2393_v52, %v405_v15  ;;  %v4184_v15 = vld [vmem:[#allocation13_spill] sm:$0xff] }
  0xcb   :  { %v2395_v24 = vpop.eup %2394  ;;  %v410_v0 = vsel %vm409_vm5, %v2393_v52, %v406_v13  ;;  %v4180_v52 = vld [vmem:[#allocation11_spill] sm:$0xff] }
  0xcc   :  { %v431_v9 = vmul.f32 %v2395_v24, %v370_v50  ;;  %v415_v35 = vsel %vm412_vm7, %v414_v18, %v410_v0 }
  0xcd   :  { %v2397_v43 = vpop.eup %2396 }
  0xce   :  { %v432_v47 = vmul.f32 %v2397_v43, %v415_v35  ;;  %v433_v27 = vpack.c.bf16 %v431_v9, %v431_v9  ;;  %v4186_v9 = vld [vmem:[#allocation18_spill] sm:$0xff] }
  0xd0   :  { %v434_v14 = vpack.c.bf16 %v432_v47, %v432_v47  ;;  %v437_v19 = vunpack.c.l.b16 %v433_v27  ;;  %v4187_v27 = vld [vmem:[#allocation17_spill] sm:$0xff] }
  0xd2   :  { %v438_v23 = vunpack.c.l.b16 %v434_v14 }
  0xd4   :  { %v439_v31 = vrot.slane %v438_v23, 7 }
  0xd6   :  { %v441_v51 = vsel %vm440_vm8, %v439_v31, %v437_v19 }
  0xd7   :  { %v442_v36 = vpack.c.b16 %v441_v51, %v441_v51 }
  0xd9   :  { %452 = vmatmul.bf16.vlgmr.msrb.gmra.mxu0 %v442_v36  ;;  %465 = vmatmul.bf16.vlgmr.msrb.gmra.mxu1 %v442_v36 }
  0xda   :  { %478 = vmatmul.bf16.vlgmr.msrb.gmra.mxu2 %v442_v36  ;;  %491 = vmatmul.bf16.vlgmr.msrb.gmra.mxu3 %v442_v36 }
  0xdb   :  { %885 = vmatpush.bf16.msrb.mxu0 %v2700_v3  ;;  %898 = vmatpush.bf16.msrb.mxu1 %v2711_v7 }
  0xdc   :  { %911 = vmatpush.bf16.msrb.mxu2 %v2713_v8  ;;  %924 = vmatpush.bf16.msrb.mxu3 %v2751_v21 }
  0xdf   :  { %886 = vmatpush.bf16.msrb.mxu0 %v2725_v12  ;;  %899 = vmatpush.bf16.msrb.mxu1 %v2738_v16 }
  0xe0   :  { %912 = vmatpush.bf16.msrb.mxu2 %v2740_v17  ;;  %925 = vmatpush.bf16.msrb.mxu3 %v2790_v34 }
  0xe3   :  { %887 = vmatpush.bf16.msrb.mxu0 %v2773_v28  ;;  %900 = vmatpush.bf16.msrb.mxu1 %v2786_v32 }
  0xe4   :  { %913 = vmatpush.bf16.msrb.mxu2 %v2788_v33  ;;  %926 = vmatpush.bf16.msrb.mxu3 %v2814_v42 }
  0xe7   :  { %888 = vmatpush.bf16.msrb.mxu0 %v2812_v41  ;;  %901 = vmatpush.bf16.msrb.mxu1 %v2824_v45 }
  0xe8   :  { %914 = vmatpush.bf16.msrb.mxu2 %v2826_v46  ;;  %927 = vmatpush.bf16.msrb.mxu3 %v2850_v54 }
  0xeb   :  { %889 = vmatpush.bf16.msrb.mxu0 %v2848_v53  ;;  %902 = vmatpush.bf16.msrb.mxu1 %v2860_v57 }
  0xec   :  { %915 = vmatpush.bf16.msrb.mxu2 %v2862_v58  ;;  %928 = vmatpush.bf16.msrb.mxu3 %v2889_v4 }
  0xef   :  { %890 = vmatpush.bf16.msrb.mxu0 %v2887_v2  ;;  %903 = vmatpush.bf16.msrb.mxu1 %v2902_v10 }
  0xf0   :  { %916 = vmatpush.bf16.msrb.mxu2 %v2904_v11  ;;  %929 = vmatpush.bf16.msrb.mxu3 %v2922_v22 }
  0xf3   :  { %891 = vmatpush.bf16.msrb.mxu0 %v2920_v20  ;;  %904 = vmatpush.bf16.msrb.mxu1 %v2932_v25 }
  0xf4   :  { %917 = vmatpush.bf16.msrb.mxu2 %v2934_v26  ;;  %930 = vmatpush.bf16.msrb.mxu3 %v2958_v38 }
  0xf7   :  { %892 = vmatpush.bf16.msrb.mxu0 %v2956_v37  ;;  %905 = vmatpush.bf16.msrb.mxu1 %v2962_v39 }
  0xf8   :  { %918 = vmatpush.bf16.msrb.mxu2 %v4180_v52  ;;  %931 = vmatpush.bf16.msrb.mxu3 %v4181_v59 }
 0x156   :  { %v453_v61 = vpop.f32.mrf.mxu0  ;;  %v466_v44 = vpop.f32.mrf.mxu1 }
 0x157   :  { %v500_v62 = vrot.slane %v453_v61, 7  ;;  %v516_v6 = vadd.f32 %v453_v61, %v4182_v60  ;;  %v501_v55 = vrot.slane %v466_v44, 7  ;;  %v517_v48 = vadd.f32 %v466_v44, %v4183_v49 }
 0x159   :  { %v512_v5 = vadd.f32 %v500_v62, %v4184_v15  ;;  %v2252_v40 = vmul.f32 -1.442695, %v516_v6  ;;  %v513_v13 = vadd.f32 %v501_v55, %v4185_v29  ;;  %v2253_v1 = vmul.f32 -1.442695, %v517_v48 }
 0x15b   :  { %v2249_v30 = vmul.f32 -1.442695, %v512_v5  ;;  %2398 = vpow2.f32 %v2252_v40  ;;  %v2250_v24 = vmul.f32 -1.442695, %v513_v13  ;;  %v4188_v5 = vld [vmem:[#allocation20_spill] sm:$0xff] }
 0x15c   :  { %2400 = vpow2.f32 %v2253_v1 }
 0x15d   :  { %2402 = vpow2.f32 %v2249_v30  ;;  %v479_v0 = vpop.f32.mrf.mxu2  ;;  %v492_v50 = vpop.f32.mrf.mxu3  ;;  %v4189_v30 = vld [vmem:[#allocation19_spill] sm:$0xff] }
 0x15e   :  { %2404 = vpow2.f32 %v2250_v24  ;;  %v502_v18 = vrot.slane %v479_v0, 7  ;;  %v518_v43 = vadd.f32 %v479_v0, %v4186_v9  ;;  %v455_v35 = vpop.f32.mrf.mxu0  ;;  %v468_v47 = vpop.f32.mrf.mxu1  ;;  %v503_v36 = vrot.slane %v492_v50, 7 }
 0x15f   :  { %v519_v40 = vadd.f32 %v492_v50, %v4188_v5 }
 0x160   :  { %v514_v14 = vadd.f32 %v502_v18, %v4187_v27  ;;  %v2254_v23 = vmul.f32 -1.442695, %v518_v43  ;;  %v515_v24 = vadd.f32 %v503_v36, %v4189_v30 }
 0x161   :  { %v2399_v19 = vpop.eup %2398 }
 0x162   :  { %v2401_v31 = vpop.eup %2400  ;;  %v3211_v51 = vadd.f32 1.0, %v2399_v19  ;;  %2406 = vpow2.f32 %v2254_v23  ;;  %v2251_v55 = vmul.f32 -1.442695, %v514_v14 }
 0x163   :  { %v2403_v61 = vpop.eup %2402  ;;  %v3213_v44 = vadd.f32 1.0, %v2401_v31 }
 0x164   :  { %v2405_v62 = vpop.eup %2404  ;;  %v3215_v6 = vadd.f32 1.0, %v2403_v61  ;;  %2408 = vrcp.f32 %v3211_v51  ;;  %vm594_vm9 = vweird.f32 %v3211_v51  ;;  %v598_v23 = vand.u32 2147483647, %v3211_v51 }
 0x165   :  { %v3218_v48 = vadd.f32 1.0, %v2405_v62  ;;  %2410 = vrcp.f32 %v3213_v44  ;;  %v481_v13 = vpop.f32.mrf.mxu2  ;;  %v494_v1 = vpop.f32.mrf.mxu3  ;;  %v615_v43 = vand.u32 2147483648, %v3213_v44  ;;  %vm609_vm10 = vweird.f32 %v3213_v44 }
 0x166   :  { %2412 = vrcp.f32 %v3215_v6  ;;  %v553_v47 = vand.u32 2147483647, %v3215_v6  ;;  %v555_v50 = vand.u32 2147483648, %v3215_v6  ;;  %vm549_vm11 = vweird.f32 %v3215_v6 }
 0x167   :  { %2414 = vrcp.f32 %v3218_v48  ;;  %vm564_vm12 = vweird.f32 %v3218_v48  ;;  %v570_v62 = vand.u32 2147483648, %v3218_v48  ;;  %v568_v9 = vand.u32 2147483647, %v3218_v48 }
 0x168   :  { %v2407_v0 = vpop.eup %2406  ;;  %2416 = vpow2.f32 %v2251_v55  ;;  %vm3242_vm13 = vcmp.eq.f32.partialorder %v553_v47, 8.507059e+37  ;;  %v556_v18 = vor.u32 1.1754944e-38, %v555_v50  ;;  %v600_v27 = vand.u32 2147483648, %v3211_v51 }
 0x169   :  { %v3227_v35 = vadd.f32 1.0, %v2407_v0  ;;  %2418 = vtanh.f32 %v519_v40  ;;  %v616_v40 = vor.u32 1.1754944e-38, %v615_v43  ;;  %v571_v15 = vor.u32 1.1754944e-38, %v570_v62 }
 0x16a   :  { %v2409_v14 = vpop.eup %2408  ;;  %2420 = vtanh.f32 %v515_v24  ;;  %v613_v52 = vand.u32 2147483647, %v3213_v44  ;;  %vm599_vm4 = vcmp.eq.f32.partialorder %v598_v23, 8.507059e+37  ;;  %vm569_vm6 = vcmp.eq.f32.partialorder %v568_v9, 8.507059e+37 }
 0x16b   :  { %v2411_v31 = vpop.eup %2410  ;;  %v590_v36 = vmul.f32 %v2409_v14, %v3211_v51  ;;  %2422 = vrcp.f32 %v3227_v35  ;;  %vm595_vm15 = vweird.f32 %v2409_v14  ;;  %v4194_v9 = vrot.slane %v3163_v63, 7 }
 0x16c   :  { %v2413_v61 = vpop.eup %2412  ;;  %v605_v55 = vmul.f32 %v2411_v31, %v3213_v44  ;;  %vm610_vm14 = vweird.f32 %v2411_v31  ;;  %vm596_vm3 = vmor %vm594_vm9, %vm595_vm15  ;;  %v630_v63 = vand.u32 2147483648, %v3227_v35 }
 0x16d   :  { %v2415_v13 = vpop.eup %2414  ;;  %v545_v1 = vmul.f32 %v2413_v61, %v3215_v6  ;;  %v591_v24 = vsub.f32 1.0, %v590_v36  ;;  %vm550_vm0 = vweird.f32 %v2413_v61  ;;  %vm3258_vm2 = vmor %vm609_vm10, %vm610_vm14  ;;  %vm614_vm10 = vcmp.eq.f32.partialorder %v613_v52, 8.507059e+37 }
 0x16e   :  { %v2417_v19 = vpop.eup %2416  ;;  %v560_v5 = vmul.f32 %v2415_v13, %v3218_v48  ;;  %v606_v30 = vsub.f32 1.0, %v605_v55  ;;  %vm565_vm1 = vweird.f32 %v2415_v13  ;;  %vm551_vm5 = vmor %vm549_vm11, %vm550_vm0  ;;  %vm624_vm11 = vweird.f32 %v3227_v35 }
 0x16f   :  { %v2419_v49 = vpop.eup %2418  ;;  %v546_v29 = vsub.f32 1.0, %v545_v1  ;;  %v3249_v43 = vadd.f32 1.0, %v2417_v19  ;;  %v592_v60 = vmul.f32 %v2409_v14, %v591_v24  ;;  %vm566_vm7 = vmor %vm564_vm12, %vm565_vm1  ;;  %v4195_v19 = vrot.slane %v3157_v56, 7 }
 0x170   :  { %v2421_v36 = vpop.eup %2420  ;;  %v561_v47 = vsub.f32 1.0, %v560_v5  ;;  %v607_v59 = vmul.f32 %v2411_v31, %v606_v30  ;;  %v631_v0 = vor.u32 1.1754944e-38, %v630_v63 }
 0x171   :  { %v3251_v50 = vpop.eup %2422  ;;  %2424 = vrcp.f32 %v3249_v43  ;;  %v547_v55 = vmul.f32 %v2413_v61, %v546_v29  ;;  %v593_v30 = vadd.f32 %v2409_v14, %v592_v60  ;;  %v601_v29 = vor.u32 1.1754944e-38, %v600_v27 }
 0x172   :  { %v562_v39 = vmul.f32 %v2415_v13, %v561_v47  ;;  %v620_v5 = vmul.f32 %v3251_v50, %v3227_v35  ;;  %v608_v1 = vadd.f32 %v2411_v31, %v607_v59  ;;  %vm625_vm9 = vweird.f32 %v3251_v50 }
 0x173   :  { %v548_v62 = vadd.f32 %v2413_v61, %v547_v55  ;;  %v597_v47 = vsel %vm596_vm3, %v2409_v14, %v593_v30  ;;  %v585_v56 = vand.u32 2147483648, %v3249_v43  ;;  %vm579_vm14 = vweird.f32 %v3249_v43 }
 0x174   :  { %v621_v24 = vsub.f32 1.0, %v620_v5  ;;  %v563_v44 = vadd.f32 %v2415_v13, %v562_v39  ;;  %v602_v38 = vsel %vm599_vm4, %v601_v29, %v597_v47  ;;  %v612_v60 = vsel %vm3258_vm2, %v2411_v31, %v608_v1 }
 0x175   :  { %v552_v37 = vsel %vm551_vm5, %v2413_v61, %v548_v62  ;;  %v617_v6 = vsel %vm614_vm10, %v616_v40, %v612_v60  ;;  %v645_v55 = vmul.f32 %v2419_v49, %v602_v38  ;;  %v628_v38 = vand.u32 2147483647, %v3227_v35 }
 0x176   :  { %v622_v51 = vmul.f32 %v3251_v50, %v621_v24  ;;  %v557_v59 = vsel %vm3242_vm13, %v556_v18, %v552_v37  ;;  %v567_v27 = vsel %vm566_vm7, %v2415_v13, %v563_v44  ;;  %v643_v14 = vmul.f32 %v4194_v9, %v617_v6  ;;  %vm626_vm13 = vmor %vm624_vm11, %vm625_vm9  ;;  %v4196_v6 = vld [vmem:[#allocation9_spill] sm:$0xff]  ;;  %v4199_v9 = vld [vmem:[#allocation11_spill] sm:$0xff] }
 0x177   :  { %v2425_v23 = vpop.eup %2424  ;;  %v572_v39 = vsel %vm569_vm6, %v571_v15, %v567_v27  ;;  %v644_v48 = vmul.f32 %v2421_v36, %v557_v59  ;;  %v583_v15 = vand.u32 2147483647, %v3249_v43  ;;  %v586_v30 = vor.u32 1.1754944e-38, %v585_v56  ;;  %v4203_v56 = vld [vmem:[#allocation14_spill] sm:$0xff] }
 0x178   :  { %v575_v61 = vmul.f32 %v2425_v23, %v3249_v43  ;;  %v642_v31 = vmul.f32 %v4195_v19, %v572_v39  ;;  %v3280_v52 = vadd.f32 %v645_v55, %v643_v14  ;;  %v623_v18 = vadd.f32 %v3251_v50, %v622_v51  ;;  %v4198_v39 = vld [vmem:[#allocation10_spill] sm:$0xff]  ;;  %v4200_v14 = vld [vmem:[#allocation12_spill] sm:$0xff] }
 0x179   :  { %vm580_vm12 = vweird.f32 %v2425_v23  ;;  %vm629_vm0 = vcmp.eq.f32.partialorder %v628_v38, 8.507059e+37  ;;  %vm584_vm1 = vcmp.eq.f32.partialorder %v583_v15, 8.507059e+37  ;;  %v4202_v38 = vld [vmem:[#allocation15_spill] sm:$0xff] }
 0x17a   :  { %v576_v5 = vsub.f32 1.0, %v575_v61  ;;  %v3283_v37 = vadd.f32 %v644_v48, %v642_v31  ;;  %2426 = vtanh.f32 %v3280_v52  ;;  %v627_v13 = vsel %vm626_vm13, %v3251_v50, %v623_v18  ;;  %vm581_vm15 = vmor %vm579_vm14, %vm580_vm12  ;;  %v4201_v18 = vld [vmem:[#allocation13_spill] sm:$0xff] }
 0x17b   :  { %v632_v62 = vsel %vm629_vm0, %v631_v0, %v627_v13 }
 0x17c   :  { %v577_v49 = vmul.f32 %v2425_v23, %v576_v5  ;;  %2428 = vtanh.f32 %v3283_v37 }
 0x17e   :  { %v578_v40 = vadd.f32 %v2425_v23, %v577_v49 }
 0x180   :  { %v582_v36 = vsel %vm581_vm15, %v2425_v23, %v578_v40  ;;  %v2427_v35 = vpop.eup %2426  ;;  %v4197_v23 = vld [vmem:[#allocation8_spill] sm:$0xff] }
 0x181   :  { %v587_v1 = vsel %vm584_vm1, %v586_v30, %v582_v36  ;;  %v651_v24 = vmul.f32 %v2427_v35, %v632_v62  ;;  %v4204_v40 = vld [vmem:[#allocation16_spill] sm:$0xff] }
 0x182   :  { %v2429_v29 = vpop.eup %2428 }
 0x183   :  { %v650_v44 = vmul.f32 %v2429_v29, %v587_v1  ;;  %v653_v60 = vpack.c.bf16 %v651_v24, %v651_v24 }
 0x185   :  { %v652_v47 = vpack.c.bf16 %v650_v44, %v650_v44  ;;  %v657_v59 = vunpack.c.l.b16 %v653_v60  ;;  %v4205_v60 = vld [vmem:[#allocation17_spill] sm:$0xff] }
 0x187   :  { %v656_v51 = vunpack.c.l.b16 %v652_v47 }
 0x189   :  { %v658_v43 = vrot.slane %v656_v51, 1 }
 0x18b   :  { %v659_v27 = vsel %vm440_vm8, %v657_v59, %v658_v43  ;;  %v4206_v59 = vld [vmem:[#allocation18_spill] sm:$0xff] }
 0x18c   :  { %v660_v50 = vpack.c.b16 %v659_v27, %v659_v27 }
 0x18e   :  { %670 = vmatmul.bf16.vlgmr.msra.gmra.mxu0 %v660_v50  ;;  %683 = vmatmul.bf16.vlgmr.msra.gmra.mxu1 %v660_v50 }
 0x18f   :  { %696 = vmatmul.bf16.vlgmr.msra.gmra.mxu2 %v660_v50  ;;  %709 = vmatmul.bf16.vlgmr.msra.gmra.mxu3 %v660_v50 }
 0x190   :  { %1108 = vmatpush.bf16.msra.mxu0 %v2700_v3  ;;  %1121 = vmatpush.bf16.msra.mxu1 %v2711_v7 }
 0x191   :  { %1134 = vmatpush.bf16.msra.mxu2 %v2713_v8  ;;  %1147 = vmatpush.bf16.msra.mxu3 %v2751_v21 }
 0x194   :  { %1109 = vmatpush.bf16.msra.mxu0 %v2725_v12  ;;  %1122 = vmatpush.bf16.msra.mxu1 %v2738_v16 }
 0x195   :  { %1135 = vmatpush.bf16.msra.mxu2 %v2740_v17  ;;  %1148 = vmatpush.bf16.msra.mxu3 %v2790_v34 }
 0x198   :  { %1110 = vmatpush.bf16.msra.mxu0 %v2773_v28  ;;  %1123 = vmatpush.bf16.msra.mxu1 %v2786_v32 }
 0x199   :  { %1136 = vmatpush.bf16.msra.mxu2 %v2788_v33  ;;  %1149 = vmatpush.bf16.msra.mxu3 %v2814_v42 }
 0x19c   :  { %1111 = vmatpush.bf16.msra.mxu0 %v2812_v41  ;;  %1124 = vmatpush.bf16.msra.mxu1 %v2824_v45 }
 0x19d   :  { %1137 = vmatpush.bf16.msra.mxu2 %v2826_v46  ;;  %1150 = vmatpush.bf16.msra.mxu3 %v2850_v54 }
 0x1a0   :  { %1112 = vmatpush.bf16.msra.mxu0 %v2848_v53  ;;  %1125 = vmatpush.bf16.msra.mxu1 %v2860_v57 }
 0x1a1   :  { %1138 = vmatpush.bf16.msra.mxu2 %v2862_v58  ;;  %1151 = vmatpush.bf16.msra.mxu3 %v2889_v4 }
 0x1a4   :  { %1113 = vmatpush.bf16.msra.mxu0 %v2887_v2  ;;  %1126 = vmatpush.bf16.msra.mxu1 %v2902_v10 }
 0x1a5   :  { %1139 = vmatpush.bf16.msra.mxu2 %v2904_v11  ;;  %1152 = vmatpush.bf16.msra.mxu3 %v2922_v22 }
 0x1a8   :  { %1114 = vmatpush.bf16.msra.mxu0 %v2920_v20  ;;  %1127 = vmatpush.bf16.msra.mxu1 %v2932_v25 }
 0x1a9   :  { %1140 = vmatpush.bf16.msra.mxu2 %v2934_v26  ;;  %1153 = vmatpush.bf16.msra.mxu3 %v4196_v6 }
 0x1ac   :  { %1115 = vmatpush.bf16.msra.mxu0 %v4197_v23  ;;  %1128 = vmatpush.bf16.msra.mxu1 %v4198_v39 }
 0x1ad   :  { %1141 = vmatpush.bf16.msra.mxu2 %v4199_v9  ;;  %1154 = vmatpush.bf16.msra.mxu3 %v4200_v14 }
 0x20b   :  { %v671_v48 = vpop.f32.mrf.mxu0  ;;  %v684_v55 = vpop.f32.mrf.mxu1 }
 0x20c   :  { %v718_v61 = vrot.slane %v671_v48, 6  ;;  %v722_v19 = vrot.slane %v671_v48, 7  ;;  %v719_v31 = vrot.slane %v684_v55, 6  ;;  %v723_v5 = vrot.slane %v684_v55, 7 }
 0x20e   :  { %v734_v63 = vadd.f32 %v718_v61, %v4201_v18  ;;  %v738_v49 = vadd.f32 %v722_v19, %v4202_v38  ;;  %v735_v15 = vadd.f32 %v719_v31, %v4203_v56  ;;  %v739_v13 = vadd.f32 %v723_v5, %v4204_v40 }
 0x210   :  { %v2255_v0 = vmul.f32 -1.442695, %v734_v63  ;;  %v2258_v36 = vmul.f32 -1.442695, %v738_v49  ;;  %v2256_v30 = vmul.f32 -1.442695, %v735_v15 }
 0x211   :  { %v2259_v35 = vmul.f32 -1.442695, %v739_v13  ;;  %v4207_v15 = vld [vmem:[#allocation19_spill] sm:$0xff] }
 0x212   :  { %2430 = vpow2.f32 %v2255_v0  ;;  %v697_v62 = vpop.f32.mrf.mxu2  ;;  %v710_v29 = vpop.f32.mrf.mxu3  ;;  %v4208_v0 = vld [vmem:[#allocation20_spill] sm:$0xff] }
 0x213   :  { %2432 = vpow2.f32 %v2258_v36  ;;  %v720_v1 = vrot.slane %v697_v62, 6  ;;  %v724_v24 = vrot.slane %v697_v62, 7  ;;  %v673_v44 = vpop.f32.mrf.mxu0  ;;  %v686_v47 = vpop.f32.mrf.mxu1  ;;  %v721_v48 = vrot.slane %v710_v29, 6 }
 0x214   :  { %2434 = vpow2.f32 %v2256_v30  ;;  %v725_v61 = vrot.slane %v710_v29, 7 }
 0x215   :  { %2436 = vpow2.f32 %v2259_v35  ;;  %v736_v51 = vadd.f32 %v720_v1, %v4205_v60  ;;  %v740_v43 = vadd.f32 %v724_v24, %v4206_v59  ;;  %v737_v40 = vadd.f32 %v721_v48, %v4207_v15 }
 0x216   :  { %v741_v36 = vadd.f32 %v725_v61, %v4208_v0 }
 0x217   :  { %v2257_v27 = vmul.f32 -1.442695, %v736_v51  ;;  %v2260_v50 = vmul.f32 -1.442695, %v740_v43 }
 0x218   :  { %v2431_v55 = vpop.eup %2430 }
 0x219   :  { %v2433_v19 = vpop.eup %2432  ;;  %v3334_v31 = vadd.f32 1.0, %v2431_v55  ;;  %2438 = vpow2.f32 %v2257_v27 }
 0x21a   :  { %v2435_v5 = vpop.eup %2434  ;;  %v3336_v18 = vadd.f32 1.0, %v2433_v19  ;;  %2440 = vpow2.f32 %v2260_v50  ;;  %v699_v63 = vpop.f32.mrf.mxu2  ;;  %v4217_v50 = vrot.slane %v3283_v37, 7 }
 0x21b   :  { %v712_v38 = vpop.f32.mrf.mxu3  ;;  %v2437_v49 = vpop.eup %2436  ;;  %2442 = vrcp.f32 %v3334_v31  ;;  %v3339_v56 = vadd.f32 1.0, %v2435_v5  ;;  %v775_v30 = vand.u32 2147483647, %v3334_v31  ;;  %v777_v29 = vand.u32 2147483648, %v3334_v31 }
 0x21c   :  { %2444 = vrcp.f32 %v3336_v18  ;;  %v3343_v13 = vadd.f32 1.0, %v2437_v49  ;;  %vm771_vm2 = vweird.f32 %v3334_v31  ;;  %vm816_vm3 = vweird.f32 %v3336_v18 }
 0x21d   :  { %2446 = vrcp.f32 %v3339_v56  ;;  %v792_v44 = vand.u32 2147483648, %v3339_v56  ;;  %vm786_vm4 = vweird.f32 %v3339_v56  ;;  %vm3363_vm5 = vcmp.eq.f32.partialorder %v775_v30, 8.507059e+37 }
 0x21e   :  { %2448 = vrcp.f32 %v3343_v13  ;;  %v837_v51 = vand.u32 2147483648, %v3343_v13  ;;  %v790_v48 = vand.u32 2147483647, %v3339_v56  ;;  %vm831_vm6 = vweird.f32 %v3343_v13 }
 0x21f   :  { %v2439_v35 = vpop.eup %2438  ;;  %2450 = vtanh.f32 %v737_v40  ;;  %v778_v19 = vor.u32 1.1754944e-38, %v777_v29  ;;  %v820_v5 = vand.u32 2147483647, %v3336_v18  ;;  %v793_v15 = vor.u32 1.1754944e-38, %v792_v44 }
 0x220   :  { %v2441_v1 = vpop.eup %2440  ;;  %v3353_v47 = vadd.f32 1.0, %v2439_v35  ;;  %2452 = vtanh.f32 %v741_v36  ;;  %v822_v40 = vand.u32 2147483648, %v3336_v18  ;;  %v838_v35 = vor.u32 1.1754944e-38, %v837_v51 }
 0x221   :  { %v2443_v60 = vpop.eup %2442  ;;  %v3356_v59 = vadd.f32 1.0, %v2441_v1  ;;  %v835_v1 = vand.u32 2147483647, %v3343_v13  ;;  %vm3376_vm10 = vcmp.eq.f32.partialorder %v790_v48, 8.507059e+37  ;;  %vm3380_vm11 = vcmp.eq.f32.partialorder %v820_v5, 8.507059e+37 }
 0x222   :  { %v2445_v43 = vpop.eup %2444  ;;  %v767_v27 = vmul.f32 %v2443_v60, %v3334_v31  ;;  %2454 = vrcp.f32 %v3353_v47  ;;  %vm772_vm7 = vweird.f32 %v2443_v60  ;;  %v823_v23 = vor.u32 1.1754944e-38, %v822_v40 }
 0x223   :  { %v2447_v55 = vpop.eup %2446  ;;  %v812_v61 = vmul.f32 %v2445_v43, %v3336_v18  ;;  %2456 = vrcp.f32 %v3356_v59  ;;  %vm817_vm9 = vweird.f32 %v2445_v43  ;;  %vm773_vm14 = vmor %vm771_vm2, %vm772_vm7  ;;  %vm3392_vm0 = vcmp.eq.f32.partialorder %v835_v1, 8.507059e+37 }
 0x224   :  { %v2449_v63 = vpop.eup %2448  ;;  %v768_v38 = vsub.f32 1.0, %v767_v27  ;;  %v782_v49 = vmul.f32 %v2447_v55, %v3339_v56  ;;  %vm787_vm12 = vweird.f32 %v2447_v55  ;;  %vm818_vm15 = vmor %vm816_vm3, %vm817_vm9  ;;  %v852_v37 = vand.u32 2147483648, %v3356_v59 }
 0x225   :  { %v2451_v0 = vpop.eup %2450  ;;  %v813_v36 = vsub.f32 1.0, %v812_v61  ;;  %v827_v30 = vmul.f32 %v2449_v63, %v3343_v13  ;;  %vm832_vm13 = vweird.f32 %v2449_v63  ;;  %vm788_vm1 = vmor %vm786_vm4, %vm787_vm12 }
 0x226   :  { %v2453_v62 = vpop.eup %2452  ;;  %v783_v24 = vsub.f32 1.0, %v782_v49  ;;  %v769_v14 = vmul.f32 %v2443_v60, %v768_v38  ;;  %vm833_vm2 = vmor %vm831_vm6, %vm832_vm13  ;;  %vm846_vm6 = vweird.f32 %v3356_v59 }
 0x227   :  { %v828_v27 = vsub.f32 1.0, %v827_v30  ;;  %v814_v9 = vmul.f32 %v2445_v43, %v813_v36 }
 0x228   :  { %v2455_v61 = vpop.eup %2454  ;;  %v784_v39 = vmul.f32 %v2447_v55, %v783_v24  ;;  %v770_v51 = vadd.f32 %v2443_v60, %v769_v14 }
 0x229   :  { %v2457_v6 = vpop.eup %2456  ;;  %v829_v49 = vmul.f32 %v2449_v63, %v828_v27  ;;  %v797_v48 = vmul.f32 %v2455_v61, %v3353_v47  ;;  %v815_v38 = vadd.f32 %v2445_v43, %v814_v9  ;;  %vm802_vm3 = vweird.f32 %v2455_v61 }
 0x22a   :  { %v842_v5 = vmul.f32 %v2457_v6, %v3356_v59  ;;  %v774_v36 = vsel %vm773_vm14, %v2443_v60, %v770_v51  ;;  %v785_v30 = vadd.f32 %v2447_v55, %v784_v39  ;;  %vm847_vm4 = vweird.f32 %v2457_v6 }
 0x22b   :  { %v798_v24 = vsub.f32 1.0, %v797_v48  ;;  %v779_v31 = vsel %vm3363_vm5, %v778_v19, %v774_v36  ;;  %v819_v9 = vsel %vm818_vm15, %v2445_v43, %v815_v38  ;;  %v830_v40 = vadd.f32 %v2449_v63, %v829_v49 }
 0x22c   :  { %v843_v39 = vsub.f32 1.0, %v842_v5  ;;  %v789_v60 = vsel %vm788_vm1, %v2447_v55, %v785_v30  ;;  %v824_v18 = vsel %vm3380_vm11, %v823_v23, %v819_v9  ;;  %v866_v1 = vmul.f32 %v2451_v0, %v779_v31 }
 0x22d   :  { %v799_v27 = vmul.f32 %v2455_v61, %v798_v24  ;;  %v794_v56 = vsel %vm3376_vm10, %v793_v15, %v789_v60  ;;  %v834_v51 = vsel %vm833_vm2, %v2449_v63, %v830_v40  ;;  %v867_v48 = vmul.f32 %v2453_v62, %v824_v18  ;;  %vm848_vm10 = vmor %vm846_vm6, %vm847_vm4  ;;  %v4220_v18 = vld [vmem:[#allocation9_spill] sm:$0xff] }
 0x22e   :  { %v844_v26 = vmul.f32 %v2457_v6, %v843_v39  ;;  %v839_v43 = vsel %vm3392_vm0, %v838_v35, %v834_v51  ;;  %v864_v13 = vmul.f32 %v4217_v50, %v794_v56  ;;  %v4218_v19 = vrot.slane %v3280_v52, 7  ;;  %v4223_v56 = vld [vmem:[#allocation11_spill] sm:$0xff]  ;;  %v4224_v51 = vld [vmem:[#allocation12_spill] sm:$0xff] }
 0x22f   :  { %v800_v0 = vadd.f32 %v2455_v61, %v799_v27  ;;  %v807_v15 = vand.u32 2147483648, %v3353_v47  ;;  %vm801_vm5 = vweird.f32 %v3353_v47  ;;  %v805_v52 = vand.u32 2147483647, %v3353_v47  ;;  %v4222_v27 = vld [vmem:[#allocation10_spill] sm:$0xff] }
 0x230   :  { %v865_v55 = vmul.f32 %v4218_v19, %v839_v43  ;;  %v3412_v49 = vadd.f32 %v866_v1, %v864_v13  ;;  %v845_v62 = vadd.f32 %v2457_v6, %v844_v26  ;;  %vm803_vm7 = vmor %vm801_vm5, %vm802_vm3  ;;  %v850_v63 = vand.u32 2147483647, %v3356_v59  ;;  %v4221_v1 = vld [vmem:[#allocation8_spill] sm:$0xff] }
 0x231   :  { %v804_v35 = vsel %vm803_vm7, %v2455_v61, %v800_v0  ;;  %v808_v29 = vor.u32 1.1754944e-38, %v807_v15  ;;  %vm806_vm9 = vcmp.eq.f32.partialorder %v805_v52, 8.507059e+37  ;;  %v853_v26 = vor.u32 1.1754944e-38, %v852_v37  ;;  %v3460_v0 = vld [vmem:[%s4112_s0] sm:$0xff]  ;;  %v3472_v52 = vld [vmem:[%s4112_s0 + $0x8] sm:$0xff] }
 0x232   :  { %v3414_v23 = vadd.f32 %v867_v48, %v865_v55  ;;  %2458 = vtanh.f32 %v3412_v49  ;;  %v849_v44 = vsel %vm848_vm10, %v2457_v6, %v845_v62  ;;  %vm851_vm11 = vcmp.eq.f32.partialorder %v850_v63, 8.507059e+37  ;;  %v4219_v6 = vld [vmem:[#allocation7_spill] sm:$0xff]  ;;  %4225 = vst [vmem:[#allocation13_spill] sm:$0xff] %v3460_v0 }
 0x233   :  { %v809_v5 = vsel %vm806_vm9, %v808_v29, %v804_v35  ;;  %v854_v30 = vsel %vm851_vm11, %v853_v26, %v849_v44  ;;  %v3466_v62 = vld [vmem:[%s4112_s0 + $0x20] sm:$0xff]  ;;  %4227 = vst [vmem:[#allocation14_spill] sm:$0xff] %v3472_v52  ;;  %v3478_v35 = vld [vmem:[%s4112_s0 + $0x28] sm:$0xff] }
 0x234   :  { %2460 = vtanh.f32 %v3414_v23  ;;  %4226 = vst [vmem:[#allocation15_spill] sm:$0xff] %v3466_v62 }
 0x235   :  { %4228 = vst [vmem:[#allocation16_spill] sm:$0xff] %v3478_v35 }
 0x238   :  { %v2459_v38 = vpop.eup %2458 }
 0x239   :  { %v872_v14 = vmul.f32 %v2459_v38, %v809_v5 }
 0x23a   :  { %v2461_v36 = vpop.eup %2460 }
 0x23b   :  { %v873_v24 = vmul.f32 %v2461_v36, %v854_v30  ;;  %v874_v31 = vpack.c.bf16 %v872_v14, %v872_v14 }
 0x23d   :  { %v875_v47 = vpack.c.bf16 %v873_v24, %v873_v24  ;;  %v878_v9 = vunpack.c.l.b16 %v874_v31 }
 0x23f   :  { %v879_v40 = vunpack.c.l.b16 %v875_v47  ;;  %v880_v39 = vrot.slane %v878_v9, 2  ;;  %v3484_v9 = vld [vmem:[%s4112_s0 + $0x10] sm:$0xff] }
 0x240   :  { %4229 = vst [vmem:[#allocation17_spill] sm:$0xff] %v3484_v9 }
 0x241   :  { %v881_v60 = vrot.slane %v879_v40, 1 }
 0x243   :  { %v882_v59 = vsel %vm440_vm8, %v881_v60, %v880_v39  ;;  %v3490_v39 = vld [vmem:[%s4112_s0 + $0x30] sm:$0xff] }
 0x244   :  { %v883_v61 = vpack.c.b16 %v882_v59, %v882_v59  ;;  %4230 = vst [vmem:[#allocation18_spill] sm:$0xff] %v3490_v39 }
 0x246   :  { %893 = vmatmul.bf16.vlgmr.msrb.gmra.mxu0 %v883_v61  ;;  %906 = vmatmul.bf16.vlgmr.msrb.gmra.mxu1 %v883_v61 }
 0x247   :  { %919 = vmatmul.bf16.vlgmr.msrb.gmra.mxu2 %v883_v61  ;;  %932 = vmatmul.bf16.vlgmr.msrb.gmra.mxu3 %v883_v61 }
 0x248   :  { %1331 = vmatpush.bf16.msrb.mxu0 %v2700_v3  ;;  %1344 = vmatpush.bf16.msrb.mxu1 %v2711_v7 }
 0x249   :  { %1357 = vmatpush.bf16.msrb.mxu2 %v2713_v8  ;;  %1370 = vmatpush.bf16.msrb.mxu3 %v2751_v21 }
 0x24c   :  { %1332 = vmatpush.bf16.msrb.mxu0 %v2725_v12  ;;  %1345 = vmatpush.bf16.msrb.mxu1 %v2738_v16 }
 0x24d   :  { %1358 = vmatpush.bf16.msrb.mxu2 %v2740_v17  ;;  %1371 = vmatpush.bf16.msrb.mxu3 %v2790_v34 }
 0x250   :  { %1333 = vmatpush.bf16.msrb.mxu0 %v2773_v28  ;;  %1346 = vmatpush.bf16.msrb.mxu1 %v2786_v32 }
 0x251   :  { %1359 = vmatpush.bf16.msrb.mxu2 %v2788_v33  ;;  %1372 = vmatpush.bf16.msrb.mxu3 %v2814_v42 }
 0x254   :  { %1334 = vmatpush.bf16.msrb.mxu0 %v2812_v41  ;;  %1347 = vmatpush.bf16.msrb.mxu1 %v2824_v45 }
 0x255   :  { %1360 = vmatpush.bf16.msrb.mxu2 %v2826_v46  ;;  %1373 = vmatpush.bf16.msrb.mxu3 %v2850_v54 }
 0x258   :  { %1335 = vmatpush.bf16.msrb.mxu0 %v2848_v53  ;;  %1348 = vmatpush.bf16.msrb.mxu1 %v2860_v57 }
 0x259   :  { %1361 = vmatpush.bf16.msrb.mxu2 %v2862_v58  ;;  %1374 = vmatpush.bf16.msrb.mxu3 %v2889_v4 }
 0x25c   :  { %1336 = vmatpush.bf16.msrb.mxu0 %v2887_v2  ;;  %1349 = vmatpush.bf16.msrb.mxu1 %v2902_v10 }
 0x25d   :  { %1362 = vmatpush.bf16.msrb.mxu2 %v2904_v11  ;;  %1375 = vmatpush.bf16.msrb.mxu3 %v2922_v22 }
 0x260   :  { %1337 = vmatpush.bf16.msrb.mxu0 %v2920_v20  ;;  %1350 = vmatpush.bf16.msrb.mxu1 %v2932_v25 }
 0x261   :  { %1363 = vmatpush.bf16.msrb.mxu2 %v4219_v6  ;;  %1376 = vmatpush.bf16.msrb.mxu3 %v4220_v18 }
 0x264   :  { %1338 = vmatpush.bf16.msrb.mxu0 %v4221_v1  ;;  %1351 = vmatpush.bf16.msrb.mxu1 %v4222_v27 }
 0x265   :  { %1364 = vmatpush.bf16.msrb.mxu2 %v4223_v56  ;;  %1377 = vmatpush.bf16.msrb.mxu3 %v4224_v51 }
 0x2c3   :  { %v894_v48 = vpop.f32.mrf.mxu0  ;;  %v907_v43 = vpop.f32.mrf.mxu1 }
 0x2c4   :  { %v941_v50 = vrot.slane %v894_v48, 5  ;;  %v945_v13 = vrot.slane %v894_v48, 6  ;;  %v942_v19 = vrot.slane %v907_v43, 5  ;;  %v946_v55 = vrot.slane %v907_v43, 6 }
 0x2c6   :  { %v957_v15 = vadd.f32 %v3460_v0, %v941_v50  ;;  %v961_v37 = vadd.f32 %v3466_v62, %v945_v13  ;;  %v958_v63 = vadd.f32 %v3472_v52, %v942_v19  ;;  %v962_v29 = vadd.f32 %v3478_v35, %v946_v55 }
 0x2c8   :  { %v2261_v44 = vmul.f32 -1.442695, %v957_v15  ;;  %v2264_v26 = vmul.f32 -1.442695, %v961_v37  ;;  %v2262_v38 = vmul.f32 -1.442695, %v958_v63 }
 0x2c9   :  { %v2265_v5 = vmul.f32 -1.442695, %v962_v29 }
 0x2ca   :  { %2462 = vpow2.f32 %v2261_v44  ;;  %v920_v36 = vpop.f32.mrf.mxu2  ;;  %v933_v30 = vpop.f32.mrf.mxu3 }
 0x2cb   :  { %2464 = vpow2.f32 %v2264_v26  ;;  %v943_v14 = vrot.slane %v920_v36, 5  ;;  %v947_v24 = vrot.slane %v920_v36, 6  ;;  %v896_v31 = vpop.f32.mrf.mxu0  ;;  %v909_v47 = vpop.f32.mrf.mxu1  ;;  %v944_v48 = vrot.slane %v933_v30, 5  ;;  %v3503_v26 = vld [vmem:[%s4112_s0 + $0x18] sm:$0xff] }
 0x2cc   :  { %2466 = vpow2.f32 %v2262_v38  ;;  %v948_v50 = vrot.slane %v933_v30, 6  ;;  %4231 = vst [vmem:[#allocation19_spill] sm:$0xff] %v3503_v26  ;;  %v3512_v36 = vld [vmem:[%s4112_s0 + $0x38] sm:$0xff] }
 0x2cd   :  { %2468 = vpow2.f32 %v2265_v5  ;;  %v959_v40 = vadd.f32 %v3484_v9, %v943_v14  ;;  %v963_v60 = vadd.f32 %v3490_v39, %v947_v24  ;;  %v960_v38 = vadd.f32 %v3503_v26, %v944_v48  ;;  %4232 = vst [vmem:[#allocation20_spill] sm:$0xff] %v3512_v36 }
 0x2ce   :  { %v964_v30 = vadd.f32 %v3512_v36, %v948_v50 }
 0x2cf   :  { %v2263_v59 = vmul.f32 -1.442695, %v959_v40  ;;  %v2266_v61 = vmul.f32 -1.442695, %v963_v60 }
 0x2d0   :  { %v2463_v43 = vpop.eup %2462 }
 0x2d1   :  { %v2465_v13 = vpop.eup %2464  ;;  %v3493_v19 = vadd.f32 1.0, %v2463_v43  ;;  %2470 = vpow2.f32 %v2263_v59 }
 0x2d2   :  { %v2467_v55 = vpop.eup %2466  ;;  %v3495_v15 = vadd.f32 1.0, %v2465_v13  ;;  %2472 = vpow2.f32 %v2266_v61  ;;  %v922_v37 = vpop.f32.mrf.mxu2 }
 0x2d3   :  { %v935_v63 = vpop.f32.mrf.mxu3  ;;  %v2469_v29 = vpop.eup %2468  ;;  %2474 = vrcp.f32 %v3493_v19  ;;  %v3498_v44 = vadd.f32 1.0, %v2467_v55  ;;  %v998_v14 = vand.u32 2147483647, %v3493_v19  ;;  %v1000_v47 = vand.u32 2147483648, %v3493_v19 }
 0x2d4   :  { %2476 = vrcp.f32 %v3495_v15  ;;  %v3507_v5 = vadd.f32 1.0, %v2469_v29  ;;  %vm994_vm12 = vweird.f32 %v3493_v19  ;;  %vm1039_vm13 = vweird.f32 %v3495_v15 }
 0x2d5   :  { %2478 = vrcp.f32 %v3498_v44  ;;  %v1015_v59 = vand.u32 2147483648, %v3498_v44  ;;  %vm1009_vm14 = vweird.f32 %v3498_v44  ;;  %vm3532_vm15 = vcmp.eq.f32.partialorder %v998_v14, 8.507059e+37 }
 0x2d6   :  { %2480 = vrcp.f32 %v3507_v5  ;;  %v1060_v43 = vand.u32 2147483648, %v3507_v5  ;;  %v1013_v63 = vand.u32 2147483647, %v3498_v44  ;;  %vm1054_vm0 = vweird.f32 %v3507_v5 }
 0x2d7   :  { %v2471_v24 = vpop.eup %2470  ;;  %2482 = vtanh.f32 %v960_v38  ;;  %v1016_v14 = vor.u32 1.1754944e-38, %v1015_v59  ;;  %v1045_v36 = vand.u32 2147483648, %v3495_v15  ;;  %v1058_v52 = vand.u32 2147483647, %v3507_v5 }
 0x2d8   :  { %v2473_v40 = vpop.eup %2472  ;;  %v3522_v61 = vadd.f32 1.0, %v2471_v24  ;;  %2484 = vtanh.f32 %v964_v30  ;;  %v1001_v30 = vor.u32 1.1754944e-38, %v1000_v47  ;;  %v1043_v24 = vand.u32 2147483647, %v3495_v15 }
 0x2d9   :  { %v2475_v48 = vpop.eup %2474  ;;  %v3525_v50 = vadd.f32 1.0, %v2473_v40  ;;  %v1061_v35 = vor.u32 1.1754944e-38, %v1060_v43  ;;  %vm3545_vm2 = vcmp.eq.f32.partialorder %v1013_v63, 8.507059e+37  ;;  %v1046_v1 = vor.u32 1.1754944e-38, %v1045_v36 }
 0x2da   :  { %v2477_v13 = vpop.eup %2476  ;;  %v990_v55 = vmul.f32 %v2475_v48, %v3493_v19  ;;  %2486 = vrcp.f32 %v3522_v61  ;;  %vm995_vm1 = vweird.f32 %v2475_v48  ;;  %vm3549_vm4 = vcmp.eq.f32.partialorder %v1043_v24, 8.507059e+37 }
 0x2db   :  { %v2479_v29 = vpop.eup %2478  ;;  %v1035_v38 = vmul.f32 %v2477_v13, %v3495_v15  ;;  %2488 = vrcp.f32 %v3525_v50  ;;  %vm1040_vm3 = vweird.f32 %v2477_v13  ;;  %vm996_vm7 = vmor %vm994_vm12, %vm995_vm1  ;;  %vm3561_vm9 = vcmp.eq.f32.partialorder %v1058_v52, 8.507059e+37 }
 0x2dc   :  { %v2481_v40 = vpop.eup %2480  ;;  %v991_v60 = vsub.f32 1.0, %v990_v55  ;;  %v1005_v31 = vmul.f32 %v2479_v29, %v3498_v44  ;;  %vm1010_vm5 = vweird.f32 %v2479_v29  ;;  %vm1041_vm10 = vmor %vm1039_vm13, %vm1040_vm3  ;;  %v4241_v37 = vrot.slane %v3412_v49, 7 }
 0x2dd   :  { %v2483_v26 = vpop.eup %2482  ;;  %v1036_v39 = vsub.f32 1.0, %v1035_v38  ;;  %v1050_v9 = vmul.f32 %v2481_v40, %v3507_v5  ;;  %vm1055_vm6 = vweird.f32 %v2481_v40  ;;  %vm1011_vm11 = vmor %vm1009_vm14, %vm1010_vm5  ;;  %v1075_v49 = vand.u32 2147483648, %v3525_v50 }
 0x2de   :  { %v2485_v62 = vpop.eup %2484  ;;  %v1006_v0 = vsub.f32 1.0, %v1005_v31  ;;  %v992_v51 = vmul.f32 %v2475_v48, %v991_v60  ;;  %vm1056_vm12 = vmor %vm1054_vm0, %vm1055_vm6  ;;  %vm1069_vm0 = vweird.f32 %v3525_v50 }
 0x2df   :  { %v1051_v55 = vsub.f32 1.0, %v1050_v9  ;;  %v1037_v56 = vmul.f32 %v2477_v13, %v1036_v39 }
 0x2e0   :  { %v2487_v38 = vpop.eup %2486  ;;  %v1007_v27 = vmul.f32 %v2479_v29, %v1006_v0  ;;  %v993_v43 = vadd.f32 %v2475_v48, %v992_v51 }
 0x2e1   :  { %v2489_v18 = vpop.eup %2488  ;;  %v1052_v31 = vmul.f32 %v2481_v40, %v1051_v55  ;;  %v1020_v60 = vmul.f32 %v2487_v38, %v3522_v61  ;;  %v1038_v9 = vadd.f32 %v2477_v13, %v1037_v56  ;;  %vm1025_vm13 = vweird.f32 %v2487_v38 }
 0x2e2   :  { %v1065_v39 = vmul.f32 %v2489_v18, %v3525_v50  ;;  %v997_v63 = vsel %vm996_vm7, %v2475_v48, %v993_v43  ;;  %v1008_v24 = vadd.f32 %v2479_v29, %v1007_v27  ;;  %vm1070_vm14 = vweird.f32 %v2489_v18 }
 0x2e3   :  { %v1021_v0 = vsub.f32 1.0, %v1020_v60  ;;  %v1002_v19 = vsel %vm3532_vm15, %v1001_v30, %v997_v63  ;;  %v1042_v56 = vsel %vm1041_vm10, %v2477_v13, %v1038_v9  ;;  %v1053_v36 = vadd.f32 %v2481_v40, %v1052_v31 }
 0x2e4   :  { %v1066_v27 = vsub.f32 1.0, %v1065_v39  ;;  %v1012_v48 = vsel %vm1011_vm11, %v2479_v29, %v1008_v24  ;;  %v1047_v52 = vsel %vm3549_vm4, %v1046_v1, %v1042_v56  ;;  %v1089_v15 = vmul.f32 %v2483_v26, %v1002_v19 }
 0x2e5   :  { %v1022_v55 = vmul.f32 %v2487_v38, %v1021_v0  ;;  %v1017_v44 = vsel %vm3545_vm2, %v1016_v14, %v1012_v48  ;;  %v1057_v43 = vsel %vm1056_vm12, %v2481_v40, %v1053_v36  ;;  %v1090_v60 = vmul.f32 %v2485_v62, %v1047_v52  ;;  %vm1071_vm2 = vmor %vm1069_vm0, %vm1070_vm14  ;;  %v4244_v52 = vld [vmem:[#allocation9_spill] sm:$0xff] }
 0x2e6   :  { %v1067_v6 = vmul.f32 %v2489_v18, %v1066_v27  ;;  %v1062_v13 = vsel %vm3561_vm9, %v1061_v35, %v1057_v43  ;;  %v1087_v5 = vmul.f32 %v4241_v37, %v1017_v44  ;;  %v4242_v30 = vrot.slane %v3414_v23, 7  ;;  %v4247_v44 = vld [vmem:[#allocation11_spill] sm:$0xff]  ;;  %v4248_v43 = vld [vmem:[#allocation12_spill] sm:$0xff] }
 0x2e7   :  { %v1023_v26 = vadd.f32 %v2487_v38, %v1022_v55  ;;  %v1030_v14 = vand.u32 2147483648, %v3522_v61  ;;  %vm1024_vm15 = vweird.f32 %v3522_v61  ;;  %v1028_v23 = vand.u32 2147483647, %v3522_v61  ;;  %v4246_v55 = vld [vmem:[#allocation10_spill] sm:$0xff] }
 0x2e8   :  { %v1088_v29 = vmul.f32 %v4242_v30, %v1062_v13  ;;  %v3581_v31 = vadd.f32 %v1089_v15, %v1087_v5  ;;  %v1068_v62 = vadd.f32 %v2489_v18, %v1067_v6  ;;  %vm1026_vm1 = vmor %vm1024_vm15, %vm1025_vm13  ;;  %v1073_v35 = vand.u32 2147483647, %v3525_v50  ;;  %v4245_v15 = vld [vmem:[#allocation8_spill] sm:$0xff] }
 0x2e9   :  { %v1027_v40 = vsel %vm1026_vm1, %v2487_v38, %v1023_v26  ;;  %v1031_v47 = vor.u32 1.1754944e-38, %v1030_v14  ;;  %vm1029_vm3 = vcmp.eq.f32.partialorder %v1028_v23, 8.507059e+37  ;;  %v1076_v6 = vor.u32 1.1754944e-38, %v1075_v49  ;;  %v4249_v26 = vld [vmem:[#allocation13_spill] sm:$0xff]  ;;  %v4251_v23 = vld [vmem:[#allocation14_spill] sm:$0xff] }
 0x2ea   :  { %v3583_v1 = vadd.f32 %v1090_v60, %v1088_v29  ;;  %2490 = vtanh.f32 %v3581_v31  ;;  %v1072_v59 = vsel %vm1071_vm2, %v2489_v18, %v1068_v62  ;;  %vm1074_vm4 = vcmp.eq.f32.partialorder %v1073_v35, 8.507059e+37  ;;  %v4243_v18 = vld [vmem:[#allocation7_spill] sm:$0xff] }
 0x2eb   :  { %v1032_v39 = vsel %vm1029_vm3, %v1031_v47, %v1027_v40  ;;  %v1077_v24 = vsel %vm1074_vm4, %v1076_v6, %v1072_v59  ;;  %v4250_v62 = vld [vmem:[#allocation15_spill] sm:$0xff]  ;;  %v4252_v40 = vld [vmem:[#allocation16_spill] sm:$0xff] }
 0x2ec   :  { %2492 = vtanh.f32 %v3583_v1 }
 0x2f0   :  { %v2491_v9 = vpop.eup %2490 }
 0x2f1   :  { %v1095_v51 = vmul.f32 %v2491_v9, %v1032_v39 }
 0x2f2   :  { %v2493_v63 = vpop.eup %2492 }
 0x2f3   :  { %v1096_v0 = vmul.f32 %v2493_v63, %v1077_v24  ;;  %v1097_v19 = vpack.c.bf16 %v1095_v51, %v1095_v51 }
 0x2f5   :  { %v1098_v61 = vpack.c.bf16 %v1096_v0, %v1096_v0  ;;  %v1101_v56 = vunpack.c.l.b16 %v1097_v19 }
 0x2f7   :  { %v1102_v36 = vunpack.c.l.b16 %v1098_v61  ;;  %v1103_v27 = vrot.slane %v1101_v56, 3  ;;  %v4253_v56 = vld [vmem:[#allocation17_spill] sm:$0xff] }
 0x2f9   :  { %v1104_v48 = vrot.slane %v1102_v36, 2 }
 0x2fb   :  { %v1105_v50 = vsel %vm440_vm8, %v1104_v48, %v1103_v27  ;;  %v4254_v27 = vld [vmem:[#allocation18_spill] sm:$0xff] }
 0x2fc   :  { %v1106_v38 = vpack.c.b16 %v1105_v50, %v1105_v50 }
 0x2fe   :  { %1116 = vmatmul.bf16.vlgmr.msra.gmra.mxu0 %v1106_v38  ;;  %1129 = vmatmul.bf16.vlgmr.msra.gmra.mxu1 %v1106_v38 }
 0x2ff   :  { %1142 = vmatmul.bf16.vlgmr.msra.gmra.mxu2 %v1106_v38  ;;  %1155 = vmatmul.bf16.vlgmr.msra.gmra.mxu3 %v1106_v38 }
 0x300   :  { %1554 = vmatpush.bf16.msra.mxu0 %v2700_v3  ;;  %1567 = vmatpush.bf16.msra.mxu1 %v2711_v7 }
 0x301   :  { %1580 = vmatpush.bf16.msra.mxu2 %v2713_v8  ;;  %1593 = vmatpush.bf16.msra.mxu3 %v2751_v21 }
 0x304   :  { %1555 = vmatpush.bf16.msra.mxu0 %v2725_v12  ;;  %1568 = vmatpush.bf16.msra.mxu1 %v2738_v16 }
 0x305   :  { %1581 = vmatpush.bf16.msra.mxu2 %v2740_v17  ;;  %1594 = vmatpush.bf16.msra.mxu3 %v2790_v34 }
 0x308   :  { %1556 = vmatpush.bf16.msra.mxu0 %v2773_v28  ;;  %1569 = vmatpush.bf16.msra.mxu1 %v2786_v32 }
 0x309   :  { %1582 = vmatpush.bf16.msra.mxu2 %v2788_v33  ;;  %1595 = vmatpush.bf16.msra.mxu3 %v2814_v42 }
 0x30c   :  { %1557 = vmatpush.bf16.msra.mxu0 %v2812_v41  ;;  %1570 = vmatpush.bf16.msra.mxu1 %v2824_v45 }
 0x30d   :  { %1583 = vmatpush.bf16.msra.mxu2 %v2826_v46  ;;  %1596 = vmatpush.bf16.msra.mxu3 %v2850_v54 }
 0x310   :  { %1558 = vmatpush.bf16.msra.mxu0 %v2848_v53  ;;  %1571 = vmatpush.bf16.msra.mxu1 %v2860_v57 }
 0x311   :  { %1584 = vmatpush.bf16.msra.mxu2 %v2862_v58  ;;  %1597 = vmatpush.bf16.msra.mxu3 %v2889_v4 }
 0x314   :  { %1559 = vmatpush.bf16.msra.mxu0 %v2887_v2  ;;  %1572 = vmatpush.bf16.msra.mxu1 %v2902_v10 }
 0x315   :  { %1585 = vmatpush.bf16.msra.mxu2 %v2904_v11  ;;  %1598 = vmatpush.bf16.msra.mxu3 %v2922_v22 }
 0x318   :  { %1560 = vmatpush.bf16.msra.mxu0 %v2920_v20  ;;  %1573 = vmatpush.bf16.msra.mxu1 %v2932_v25 }
 0x319   :  { %1586 = vmatpush.bf16.msra.mxu2 %v4243_v18  ;;  %1599 = vmatpush.bf16.msra.mxu3 %v4244_v52 }
 0x31c   :  { %1561 = vmatpush.bf16.msra.mxu0 %v4245_v15  ;;  %1574 = vmatpush.bf16.msra.mxu1 %v4246_v55 }
 0x31d   :  { %1587 = vmatpush.bf16.msra.mxu2 %v4247_v44  ;;  %1600 = vmatpush.bf16.msra.mxu3 %v4248_v43 }
 0x37b   :  { %v1117_v60 = vpop.f32.mrf.mxu0  ;;  %v1130_v13 = vpop.f32.mrf.mxu1 }
 0x37c   :  { %v1164_v37 = vrot.slane %v1117_v60, 4  ;;  %v1168_v5 = vrot.slane %v1117_v60, 5  ;;  %v1165_v30 = vrot.slane %v1130_v13, 4  ;;  %v1169_v29 = vrot.slane %v1130_v13, 5 }
 0x37e   :  { %v1180_v14 = vadd.f32 %v4249_v26, %v1164_v37  ;;  %v1184_v49 = vadd.f32 %v4250_v62, %v1168_v5  ;;  %v1181_v35 = vadd.f32 %v4251_v23, %v1165_v30  ;;  %v1185_v47 = vadd.f32 %v4252_v40, %v1169_v29 }
 0x380   :  { %v2267_v59 = vmul.f32 -1.442695, %v1180_v14  ;;  %v2270_v6 = vmul.f32 -1.442695, %v1184_v49  ;;  %v2268_v9 = vmul.f32 -1.442695, %v1181_v35 }
 0x381   :  { %v2271_v39 = vmul.f32 -1.442695, %v1185_v47 }
 0x382   :  { %2494 = vpow2.f32 %v2267_v59  ;;  %v1143_v63 = vpop.f32.mrf.mxu2  ;;  %v1156_v24 = vpop.f32.mrf.mxu3 }
 0x383   :  { %2496 = vpow2.f32 %v2270_v6  ;;  %v1166_v51 = vrot.slane %v1143_v63, 4  ;;  %v1170_v0 = vrot.slane %v1143_v63, 5  ;;  %v1119_v19 = vpop.f32.mrf.mxu0  ;;  %v1132_v61 = vpop.f32.mrf.mxu1  ;;  %v1167_v60 = vrot.slane %v1156_v24, 4  ;;  %v4255_v6 = vld [vmem:[#allocation19_spill] sm:$0xff]  ;;  %v4256_v63 = vld [vmem:[#allocation20_spill] sm:$0xff] }
 0x384   :  { %2498 = vpow2.f32 %v2268_v9  ;;  %v1171_v37 = vrot.slane %v1156_v24, 5 }
 0x385   :  { %2500 = vpow2.f32 %v2271_v39  ;;  %v1182_v36 = vadd.f32 %v4253_v56, %v1166_v51  ;;  %v1186_v48 = vadd.f32 %v4254_v27, %v1170_v0  ;;  %v1183_v9 = vadd.f32 %v4255_v6, %v1167_v60 }
 0x386   :  { %v1187_v24 = vadd.f32 %v4256_v63, %v1171_v37 }
 0x387   :  { %v2269_v50 = vmul.f32 -1.442695, %v1182_v36  ;;  %v2272_v38 = vmul.f32 -1.442695, %v1186_v48 }
 0x388   :  { %v2495_v13 = vpop.eup %2494 }
 0x389   :  { %v2497_v5 = vpop.eup %2496  ;;  %v3632_v30 = vadd.f32 1.0, %v2495_v13  ;;  %2502 = vpow2.f32 %v2269_v50 }
 0x38a   :  { %v2499_v29 = vpop.eup %2498  ;;  %v3634_v14 = vadd.f32 1.0, %v2497_v5  ;;  %2504 = vpow2.f32 %v2272_v38  ;;  %v1145_v49 = vpop.f32.mrf.mxu2 }
 0x38b   :  { %v1158_v35 = vpop.f32.mrf.mxu3  ;;  %v2501_v47 = vpop.eup %2500  ;;  %2506 = vrcp.f32 %v3632_v30  ;;  %v3637_v59 = vadd.f32 1.0, %v2499_v29  ;;  %v1221_v51 = vand.u32 2147483647, %v3632_v30  ;;  %v1223_v61 = vand.u32 2147483648, %v3632_v30 }
 0x38c   :  { %2508 = vrcp.f32 %v3634_v14  ;;  %v3641_v39 = vadd.f32 1.0, %v2501_v47  ;;  %vm1217_vm5 = vweird.f32 %v3632_v30  ;;  %vm1262_vm6 = vweird.f32 %v3634_v14 }
 0x38d   :  { %2510 = vrcp.f32 %v3637_v59  ;;  %v1238_v50 = vand.u32 2147483648, %v3637_v59  ;;  %vm1232_vm7 = vweird.f32 %v3637_v59  ;;  %vm3661_vm10 = vcmp.eq.f32.partialorder %v1221_v51, 8.507059e+37 }
 0x38e   :  { %2512 = vrcp.f32 %v3641_v39  ;;  %v1283_v13 = vand.u32 2147483648, %v3641_v39  ;;  %v1236_v35 = vand.u32 2147483647, %v3637_v59  ;;  %vm1277_vm9 = vweird.f32 %v3641_v39 }
 0x38f   :  { %v2503_v0 = vpop.eup %2502  ;;  %2514 = vtanh.f32 %v1183_v9  ;;  %v1239_v51 = vor.u32 1.1754944e-38, %v1238_v50  ;;  %v1268_v63 = vand.u32 2147483648, %v3634_v14  ;;  %v1281_v23 = vand.u32 2147483647, %v3641_v39 }
 0x390   :  { %v2505_v36 = vpop.eup %2504  ;;  %v3651_v38 = vadd.f32 1.0, %v2503_v0  ;;  %2516 = vtanh.f32 %v1187_v24  ;;  %v1224_v24 = vor.u32 1.1754944e-38, %v1223_v61  ;;  %v1266_v0 = vand.u32 2147483647, %v3634_v14 }
 0x391   :  { %v2507_v60 = vpop.eup %2506  ;;  %v3654_v37 = vadd.f32 1.0, %v2505_v36  ;;  %v1284_v40 = vor.u32 1.1754944e-38, %v1283_v13  ;;  %vm3674_vm12 = vcmp.eq.f32.partialorder %v1236_v35, 8.507059e+37  ;;  %v1269_v15 = vor.u32 1.1754944e-38, %v1268_v63 }
 0x392   :  { %v2509_v5 = vpop.eup %2508  ;;  %v1213_v29 = vmul.f32 %v2507_v60, %v3632_v30  ;;  %2518 = vrcp.f32 %v3651_v38  ;;  %vm1218_vm11 = vweird.f32 %v2507_v60  ;;  %vm3678_vm14 = vcmp.eq.f32.partialorder %v1266_v0, 8.507059e+37 }
 0x393   :  { %v2511_v47 = vpop.eup %2510  ;;  %v1258_v9 = vmul.f32 %v2509_v5, %v3634_v14  ;;  %2520 = vrcp.f32 %v3654_v37  ;;  %vm1263_vm13 = vweird.f32 %v2509_v5  ;;  %vm1219_vm1 = vmor %vm1217_vm5, %vm1218_vm11  ;;  %vm3690_vm3 = vcmp.eq.f32.partialorder %v1281_v23, 8.507059e+37 }
 0x394   :  { %v2513_v36 = vpop.eup %2512  ;;  %v1214_v48 = vsub.f32 1.0, %v1213_v29  ;;  %v1228_v19 = vmul.f32 %v2511_v47, %v3637_v59  ;;  %vm1233_vm15 = vweird.f32 %v2511_v47  ;;  %vm1264_vm2 = vmor %vm1262_vm6, %vm1263_vm13  ;;  %v4265_v49 = vrot.slane %v3581_v31, 7 }
 0x395   :  { %v2515_v6 = vpop.eup %2514  ;;  %v1259_v27 = vsub.f32 1.0, %v1258_v9  ;;  %v1273_v56 = vmul.f32 %v2513_v36, %v3641_v39  ;;  %vm1278_vm0 = vweird.f32 %v2513_v36  ;;  %vm1234_vm4 = vmor %vm1232_vm7, %vm1233_vm15  ;;  %v1298_v31 = vand.u32 2147483648, %v3654_v37 }
 0x396   :  { %v2517_v62 = vpop.eup %2516  ;;  %v1229_v26 = vsub.f32 1.0, %v1228_v19  ;;  %v1215_v43 = vmul.f32 %v2507_v60, %v1214_v48  ;;  %vm1279_vm5 = vmor %vm1277_vm9, %vm1278_vm0  ;;  %vm1292_vm9 = vweird.f32 %v3654_v37 }
 0x397   :  { %v1274_v29 = vsub.f32 1.0, %v1273_v56  ;;  %v1260_v44 = vmul.f32 %v2509_v5, %v1259_v27 }
 0x398   :  { %v2519_v9 = vpop.eup %2518  ;;  %v1230_v55 = vmul.f32 %v2511_v47, %v1229_v26  ;;  %v1216_v13 = vadd.f32 %v2507_v60, %v1215_v43 }
 0x399   :  { %v2521_v52 = vpop.eup %2520  ;;  %v1275_v19 = vmul.f32 %v2513_v36, %v1274_v29  ;;  %v1243_v48 = vmul.f32 %v2519_v9, %v3651_v38  ;;  %v1261_v56 = vadd.f32 %v2509_v5, %v1260_v44  ;;  %vm1248_vm6 = vweird.f32 %v2519_v9 }
 0x39a   :  { %v1288_v27 = vmul.f32 %v2521_v52, %v3654_v37  ;;  %v1220_v35 = vsel %vm1219_vm1, %v2507_v60, %v1216_v13  ;;  %v1231_v0 = vadd.f32 %v2511_v47, %v1230_v55  ;;  %vm1293_vm7 = vweird.f32 %v2521_v52 }
 0x39b   :  { %v1244_v26 = vsub.f32 1.0, %v1243_v48  ;;  %v1225_v30 = vsel %vm3661_vm10, %v1224_v24, %v1220_v35  ;;  %v1265_v44 = vsel %vm1264_vm2, %v2509_v5, %v1261_v56  ;;  %v1276_v63 = vadd.f32 %v2513_v36, %v1275_v19 }
 0x39c   :  { %v1289_v55 = vsub.f32 1.0, %v1288_v27  ;;  %v1235_v60 = vsel %vm1234_vm4, %v2511_v47, %v1231_v0  ;;  %v1270_v23 = vsel %vm3678_vm14, %v1269_v15, %v1265_v44  ;;  %v1312_v14 = vmul.f32 %v2515_v6, %v1225_v30 }
 0x39d   :  { %v1245_v29 = vmul.f32 %v2519_v9, %v1244_v26  ;;  %v1240_v59 = vsel %vm3674_vm12, %v1239_v51, %v1235_v60  ;;  %v1280_v13 = vsel %vm1279_vm5, %v2513_v36, %v1276_v63  ;;  %v1313_v48 = vmul.f32 %v2517_v62, %v1270_v23  ;;  %vm1294_vm12 = vmor %vm1292_vm9, %vm1293_vm7 }
 0x39e   :  { %v1290_v18 = vmul.f32 %v2521_v52, %v1289_v55  ;;  %v1285_v5 = vsel %vm3690_vm3, %v1284_v40, %v1280_v13  ;;  %v1310_v39 = vmul.f32 %v4265_v49, %v1240_v59  ;;  %v4266_v24 = vrot.slane %v3583_v1, 7  ;;  %v4277_v59 = vld [vmem:[#allocation17_spill] sm:$0xff] }
 0x39f   :  { %v1246_v6 = vadd.f32 %v2519_v9, %v1245_v29  ;;  %v1253_v51 = vand.u32 2147483648, %v3651_v38  ;;  %vm1247_vm10 = vweird.f32 %v3651_v38  ;;  %v1251_v1 = vand.u32 2147483647, %v3651_v38 }
 0x3a0   :  { %v1311_v47 = vmul.f32 %v4266_v24, %v1285_v5  ;;  %v3710_v19 = vadd.f32 %v1312_v14, %v1310_v39  ;;  %v1291_v62 = vadd.f32 %v2521_v52, %v1290_v18  ;;  %vm1249_vm11 = vmor %vm1247_vm10, %vm1248_vm6  ;;  %v1296_v40 = vand.u32 2147483647, %v3654_v37 }
 0x3a1   :  { %v1250_v36 = vsel %vm1249_vm11, %v2519_v9, %v1246_v6  ;;  %v1254_v61 = vor.u32 1.1754944e-38, %v1253_v51  ;;  %vm1252_vm13 = vcmp.eq.f32.partialorder %v1251_v1, 8.507059e+37  ;;  %v1299_v18 = vor.u32 1.1754944e-38, %v1298_v31 }
 0x3a2   :  { %v3712_v15 = vadd.f32 %v1313_v48, %v1311_v47  ;;  %2522 = vtanh.f32 %v3710_v19  ;;  %v1295_v50 = vsel %vm1294_vm12, %v2521_v52, %v1291_v62  ;;  %vm1297_vm14 = vcmp.eq.f32.partialorder %v1296_v40, 8.507059e+37  ;;  %v4278_v48 = vld [vmem:[#allocation18_spill] sm:$0xff] }
 0x3a3   :  { %v1255_v27 = vsel %vm1252_vm13, %v1254_v61, %v1250_v36  ;;  %v1300_v0 = vsel %vm1297_vm14, %v1299_v18, %v1295_v50  ;;  %v4279_v18 = vld [vmem:[#allocation19_spill] sm:$0xff] }
 0x3a4   :  { %2524 = vtanh.f32 %v3712_v15 }
 0x3a8   :  { %v2523_v56 = vpop.eup %2522 }
 0x3a9   :  { %v1318_v43 = vmul.f32 %v2523_v56, %v1255_v27 }
 0x3aa   :  { %v2525_v35 = vpop.eup %2524 }
 0x3ab   :  { %v1319_v26 = vmul.f32 %v2525_v35, %v1300_v0  ;;  %v1320_v30 = vpack.c.bf16 %v1318_v43, %v1318_v43  ;;  %v4280_v35 = vld [vmem:[#allocation20_spill] sm:$0xff] }
 0x3ad   :  { %v1321_v38 = vpack.c.bf16 %v1319_v26, %v1319_v26  ;;  %v1324_v44 = vunpack.c.l.b16 %v1320_v30  ;;  %v1529_v30 = vrot.slane %v3710_v19, 7 }
 0x3af   :  { %v1325_v63 = vunpack.c.l.b16 %v1321_v38  ;;  %v1326_v55 = vrot.slane %v1324_v44, 4 }
 0x3b1   :  { %v1327_v60 = vrot.slane %v1325_v63, 3  ;;  %v1530_v63 = vrot.slane %v3712_v15, 7 }
 0x3b3   :  { %v1328_v37 = vsel %vm440_vm8, %v1327_v60, %v1326_v55 }
 0x3b4   :  { %v1329_v9 = vpack.c.b16 %v1328_v37, %v1328_v37 }
 0x3b6   :  { %1339 = vmatmul.bf16.vlgmr.msrb.gmra.mxu0 %v1329_v9  ;;  %1352 = vmatmul.bf16.vlgmr.msrb.gmra.mxu1 %v1329_v9 }
 0x3b7   :  { %1365 = vmatmul.bf16.vlgmr.msrb.gmra.mxu2 %v1329_v9  ;;  %1378 = vmatmul.bf16.vlgmr.msrb.gmra.mxu3 %v1329_v9 }
 0x3b8   :  { %1777 = vmatpush.bf16.msrb.mxu0 %v2700_v3  ;;  %1790 = vmatpush.bf16.msrb.mxu1 %v2711_v7  ;;  %v4267_v3 = vld [vmem:[#allocation7_spill] sm:$0xff]  ;;  %v4268_v7 = vld [vmem:[#allocation9_spill] sm:$0xff] }
 0x3b9   :  { %1803 = vmatpush.bf16.msrb.mxu2 %v2713_v8  ;;  %1816 = vmatpush.bf16.msrb.mxu3 %v2751_v21  ;;  %v4269_v8 = vld [vmem:[#allocation8_spill] sm:$0xff] }
 0x3bc   :  { %1778 = vmatpush.bf16.msrb.mxu0 %v2725_v12  ;;  %1791 = vmatpush.bf16.msrb.mxu1 %v2738_v16  ;;  %v4270_v12 = vld [vmem:[#allocation10_spill] sm:$0xff]  ;;  %v4271_v16 = vld [vmem:[#allocation11_spill] sm:$0xff] }
 0x3bd   :  { %1804 = vmatpush.bf16.msrb.mxu2 %v2740_v17  ;;  %1817 = vmatpush.bf16.msrb.mxu3 %v2790_v34  ;;  %v4272_v17 = vld [vmem:[#allocation12_spill] sm:$0xff] }
 0x3c0   :  { %1779 = vmatpush.bf16.msrb.mxu0 %v2773_v28  ;;  %1792 = vmatpush.bf16.msrb.mxu1 %v2786_v32 }
 0x3c1   :  { %1805 = vmatpush.bf16.msrb.mxu2 %v2788_v33  ;;  %1818 = vmatpush.bf16.msrb.mxu3 %v2814_v42  ;;  %v4273_v42 = vld [vmem:[#allocation13_spill] sm:$0xff] }
 0x3c4   :  { %1780 = vmatpush.bf16.msrb.mxu0 %v2812_v41  ;;  %1793 = vmatpush.bf16.msrb.mxu1 %v2824_v45 }
 0x3c5   :  { %1806 = vmatpush.bf16.msrb.mxu2 %v2826_v46  ;;  %1819 = vmatpush.bf16.msrb.mxu3 %v2850_v54  ;;  %v4274_v46 = vld [vmem:[#allocation15_spill] sm:$0xff]  ;;  %v4275_v54 = vld [vmem:[#allocation14_spill] sm:$0xff] }
 0x3c8   :  { %1781 = vmatpush.bf16.msrb.mxu0 %v2848_v53  ;;  %1794 = vmatpush.bf16.msrb.mxu1 %v2860_v57 }
 0x3c9   :  { %1807 = vmatpush.bf16.msrb.mxu2 %v2862_v58  ;;  %1820 = vmatpush.bf16.msrb.mxu3 %v2889_v4  ;;  %v4276_v58 = vld [vmem:[#allocation16_spill] sm:$0xff] }
 0x3cc   :  { %1782 = vmatpush.bf16.msrb.mxu0 %v2887_v2  ;;  %1795 = vmatpush.bf16.msrb.mxu1 %v2902_v10 }
 0x3cd   :  { %1808 = vmatpush.bf16.msrb.mxu2 %v2904_v11  ;;  %1821 = vmatpush.bf16.msrb.mxu3 %v2922_v22 }
 0x3d0   :  { %1783 = vmatpush.bf16.msrb.mxu0 %v2920_v20  ;;  %1796 = vmatpush.bf16.msrb.mxu1 %v2932_v25 }
 0x3d1   :  { %1809 = vmatpush.bf16.msrb.mxu2 %v4267_v3  ;;  %1822 = vmatpush.bf16.msrb.mxu3 %v4268_v7 }
 0x3d4   :  { %1784 = vmatpush.bf16.msrb.mxu0 %v4269_v8  ;;  %1797 = vmatpush.bf16.msrb.mxu1 %v4270_v12 }
 0x3d5   :  { %1810 = vmatpush.bf16.msrb.mxu2 %v4271_v16  ;;  %1823 = vmatpush.bf16.msrb.mxu3 %v4272_v17 }
 0x433   :  { %v1340_v21 = vpop.f32.mrf.mxu0  ;;  %v1353_v28 = vpop.f32.mrf.mxu1 }
 0x434   :  { %v1387_v32 = vrot.slane %v1340_v21, 3  ;;  %v1391_v33 = vrot.slane %v1340_v21, 4  ;;  %v1388_v34 = vrot.slane %v1353_v28, 3  ;;  %v1392_v41 = vrot.slane %v1353_v28, 4 }
 0x436   :  { %v1403_v45 = vadd.f32 %v4273_v42, %v1387_v32  ;;  %v1407_v53 = vadd.f32 %v4274_v46, %v1391_v33  ;;  %v1404_v57 = vadd.f32 %v4275_v54, %v1388_v34  ;;  %v1408_v2 = vadd.f32 %v4276_v58, %v1392_v41 }
 0x438   :  { %v2273_v4 = vmul.f32 -1.442695, %v1403_v45  ;;  %v2276_v10 = vmul.f32 -1.442695, %v1407_v53  ;;  %v2274_v11 = vmul.f32 -1.442695, %v1404_v57 }
 0x439   :  { %v2277_v20 = vmul.f32 -1.442695, %v1408_v2 }
 0x43a   :  { %2526 = vpow2.f32 %v2273_v4  ;;  %v1366_v22 = vpop.f32.mrf.mxu2  ;;  %v1379_v25 = vpop.f32.mrf.mxu3 }
 0x43b   :  { %2528 = vpow2.f32 %v2276_v10  ;;  %v1389_v52 = vrot.slane %v1366_v22, 3  ;;  %v1393_v23 = vrot.slane %v1366_v22, 4  ;;  %v1342_v14 = vpop.f32.mrf.mxu0  ;;  %v1355_v29 = vpop.f32.mrf.mxu1  ;;  %v1390_v24 = vrot.slane %v1379_v25, 3 }
 0x43c   :  { %2530 = vpow2.f32 %v2274_v11  ;;  %v1394_v6 = vrot.slane %v1379_v25, 4  ;;  %v3855_v11 = vld [vmem:[%s4112_s0] sm:$0xff] }
 0x43d   :  { %2532 = vpow2.f32 %v2277_v20  ;;  %v1405_v13 = vadd.f32 %v4277_v59, %v1389_v52  ;;  %v1409_v5 = vadd.f32 %v4278_v48, %v1393_v23  ;;  %v1406_v56 = vadd.f32 %v4279_v18, %v1390_v24 }
 0x43e   :  { %v1410_v0 = vadd.f32 %v4280_v35, %v1394_v6 }
 0x43f   :  { %v2275_v49 = vmul.f32 -1.442695, %v1405_v13  ;;  %v2278_v39 = vmul.f32 -1.442695, %v1409_v5 }
 0x440   :  { %v2527_v47 = vpop.eup %2526 }
 0x441   :  { %v2529_v51 = vpop.eup %2528  ;;  %v3761_v62 = vadd.f32 1.0, %v2527_v47  ;;  %2534 = vpow2.f32 %v2275_v49 }
 0x442   :  { %v2531_v31 = vpop.eup %2530  ;;  %v3763_v1 = vadd.f32 1.0, %v2529_v51  ;;  %2536 = vpow2.f32 %v2278_v39  ;;  %v1368_v40 = vpop.f32.mrf.mxu2 }
 0x443   :  { %v1381_v36 = vpop.f32.mrf.mxu3  ;;  %v2533_v61 = vpop.eup %2532  ;;  %2538 = vrcp.f32 %v3761_v62  ;;  %v3766_v50 = vadd.f32 1.0, %v2531_v31  ;;  %v1444_v43 = vand.u32 2147483647, %v3761_v62  ;;  %v1446_v38 = vand.u32 2147483648, %v3761_v62 }
 0x444   :  { %2540 = vrcp.f32 %v3763_v1  ;;  %v3770_v27 = vadd.f32 1.0, %v2533_v61  ;;  %vm1440_vm15 = vweird.f32 %v3761_v62  ;;  %vm1485_vm0 = vweird.f32 %v3763_v1 }
 0x445   :  { %2542 = vrcp.f32 %v3766_v50  ;;  %v1461_v55 = vand.u32 2147483648, %v3766_v50  ;;  %vm1455_vm1 = vweird.f32 %v3766_v50  ;;  %vm3790_vm2 = vcmp.eq.f32.partialorder %v1444_v43, 8.507059e+37 }
 0x446   :  { %2544 = vrcp.f32 %v3770_v27  ;;  %v1506_v9 = vand.u32 2147483648, %v3770_v27  ;;  %v1459_v16 = vand.u32 2147483647, %v3766_v50  ;;  %vm1500_vm3 = vweird.f32 %v3770_v27 }
 0x447   :  { %v2535_v26 = vpop.eup %2534  ;;  %2546 = vtanh.f32 %v1406_v56  ;;  %v1447_v28 = vor.u32 1.1754944e-38, %v1446_v38  ;;  %v1489_v32 = vand.u32 2147483647, %v3763_v1  ;;  %v1462_v42 = vor.u32 1.1754944e-38, %v1461_v55 }
 0x448   :  { %v2537_v44 = vpop.eup %2536  ;;  %v3780_v60 = vadd.f32 1.0, %v2535_v26  ;;  %2548 = vtanh.f32 %v1410_v0  ;;  %v1491_v45 = vand.u32 2147483648, %v3763_v1  ;;  %v1507_v57 = vor.u32 1.1754944e-38, %v1506_v9 }
 0x449   :  { %v2539_v37 = vpop.eup %2538  ;;  %v3783_v3 = vadd.f32 1.0, %v2537_v44  ;;  %v1504_v58 = vand.u32 2147483647, %v3770_v27  ;;  %vm3803_vm5 = vcmp.eq.f32.partialorder %v1459_v16, 8.507059e+37  ;;  %vm3807_vm7 = vcmp.eq.f32.partialorder %v1489_v32, 8.507059e+37 }
 0x44a   :  { %v2541_v7 = vpop.eup %2540  ;;  %v1436_v8 = vmul.f32 %v2539_v37, %v3761_v62  ;;  %2550 = vrcp.f32 %v3780_v60  ;;  %vm1441_vm4 = vweird.f32 %v2539_v37  ;;  %v1492_v29 = vor.u32 1.1754944e-38, %v1491_v45 }
 0x44b   :  { %v2543_v17 = vpop.eup %2542  ;;  %v1481_v21 = vmul.f32 %v2541_v7, %v3763_v1  ;;  %2552 = vrcp.f32 %v3783_v3  ;;  %vm1486_vm6 = vweird.f32 %v2541_v7  ;;  %vm1442_vm11 = vmor %vm1440_vm15, %vm1441_vm4  ;;  %vm3819_vm13 = vcmp.eq.f32.partialorder %v1504_v58, 8.507059e+37 }
 0x44c   :  { %v2545_v33 = vpop.eup %2544  ;;  %v1437_v34 = vsub.f32 1.0, %v1436_v8  ;;  %v1451_v41 = vmul.f32 %v2543_v17, %v3766_v50  ;;  %vm1456_vm10 = vweird.f32 %v2543_v17  ;;  %vm1487_vm12 = vmor %vm1485_vm0, %vm1486_vm6  ;;  %v1521_v19 = vand.u32 2147483648, %v3783_v3 }
 0x44d   :  { %v2547_v46 = vpop.eup %2546  ;;  %v1482_v53 = vsub.f32 1.0, %v1481_v21  ;;  %v1496_v54 = vmul.f32 %v2545_v33, %v3770_v27  ;;  %vm1501_vm9 = vweird.f32 %v2545_v33  ;;  %vm1457_vm14 = vmor %vm1455_vm1, %vm1456_vm10  ;;  %v1474_v15 = vand.u32 2147483647, %v3780_v60 }
 0x44e   :  { %v2549_v2 = vpop.eup %2548  ;;  %v1452_v4 = vsub.f32 1.0, %v1451_v41  ;;  %v1438_v10 = vmul.f32 %v2539_v37, %v1437_v34  ;;  %vm1502_vm15 = vmor %vm1500_vm3, %vm1501_vm9  ;;  %vm1515_vm3 = vweird.f32 %v3783_v3  ;;  %v1522_v12 = vor.u32 1.1754944e-38, %v1521_v19  ;;  %v3898_v19 = vld [vmem:[%s4112_s0 + $0x18] sm:$0xff] }
 0x44f   :  { %v1497_v20 = vsub.f32 1.0, %v1496_v54  ;;  %v1483_v22 = vmul.f32 %v2541_v7, %v1482_v53  ;;  %vm1475_vm6 = vcmp.eq.f32.partialorder %v1474_v15, 8.507059e+37 }
 0x450   :  { %v2551_v52 = vpop.eup %2550  ;;  %v1453_v23 = vmul.f32 %v2543_v17, %v1452_v4  ;;  %v1439_v14 = vadd.f32 %v2539_v37, %v1438_v10 }
 0x451   :  { %v2553_v59 = vpop.eup %2552  ;;  %v1498_v13 = vmul.f32 %v2545_v33, %v1497_v20  ;;  %v1466_v48 = vmul.f32 %v2551_v52, %v3780_v60  ;;  %v1484_v5 = vadd.f32 %v2541_v7, %v1483_v22  ;;  %vm1471_vm0 = vweird.f32 %v2551_v52  ;;  %v3861_v22 = vld [vmem:[%s4112_s0 + $0x20] sm:$0xff] }
 0x452   :  { %v1511_v49 = vmul.f32 %v2553_v59, %v3783_v3  ;;  %v1443_v39 = vsel %vm1442_vm11, %v2539_v37, %v1439_v14  ;;  %v1454_v24 = vadd.f32 %v2543_v17, %v1453_v23  ;;  %v1476_v37 = vand.u32 2147483648, %v3780_v60  ;;  %v3873_v14 = vld [vmem:[%s4112_s0 + $0x28] sm:$0xff] }
 0x453   :  { %v1467_v6 = vsub.f32 1.0, %v1466_v48  ;;  %v1448_v51 = vsel %vm3790_vm2, %v1447_v28, %v1443_v39  ;;  %v1488_v62 = vsel %vm1487_vm12, %v2541_v7, %v1484_v5  ;;  %v1499_v31 = vadd.f32 %v2545_v33, %v1498_v13 }
 0x454   :  { %v1512_v40 = vsub.f32 1.0, %v1511_v49  ;;  %v1458_v36 = vsel %vm1457_vm14, %v2543_v17, %v1454_v24  ;;  %v1493_v1 = vsel %vm3807_vm7, %v1492_v29, %v1488_v62  ;;  %v1535_v61 = vmul.f32 %v2547_v46, %v1448_v51  ;;  %v3879_v62 = vld [vmem:[%s4112_s0 + $0x10] sm:$0xff] }
 0x455   :  { %v1468_v18 = vmul.f32 %v2551_v52, %v1467_v6  ;;  %v1463_v50 = vsel %vm3803_vm5, %v1462_v42, %v1458_v36  ;;  %v1503_v56 = vsel %vm1502_vm15, %v2545_v33, %v1499_v31  ;;  %v1536_v35 = vmul.f32 %v2549_v2, %v1493_v1 }
 0x456   :  { %v1513_v0 = vmul.f32 %v2553_v59, %v1512_v40  ;;  %v1508_v43 = vsel %vm3819_vm13, %v1507_v57, %v1503_v56  ;;  %v1533_v27 = vmul.f32 %v1529_v30, %v1463_v50  ;;  %vm1516_vm1 = vweird.f32 %v2553_v59  ;;  %v3885_v40 = vld [vmem:[%s4112_s0 + $0x30] sm:$0xff] }
 0x457   :  { %v1534_v26 = vmul.f32 %v1530_v63, %v1508_v43  ;;  %v1469_v55 = vadd.f32 %v2551_v52, %v1468_v18  ;;  %vm1470_vm2 = vweird.f32 %v3780_v60  ;;  %v1519_v30 = vand.u32 2147483647, %v3783_v3  ;;  %vm1517_vm5 = vmor %vm1515_vm3, %vm1516_vm1 }
 0x458   :  { %v3839_v38 = vadd.f32 %v1535_v61, %v1533_v27  ;;  %v1514_v9 = vadd.f32 %v2553_v59, %v1513_v0  ;;  %vm1472_vm4 = vmor %vm1470_vm2, %vm1471_vm0  ;;  %v1477_v7 = vor.u32 1.1754944e-38, %v1476_v37 }
 0x459   :  { %v3841_v44 = vadd.f32 %v1536_v35, %v1534_v26  ;;  %v1473_v63 = vsel %vm1472_vm4, %v2551_v52, %v1469_v55  ;;  %vm1520_vm7 = vcmp.eq.f32.partialorder %v1519_v30, 8.507059e+37  ;;  %v3867_v52 = vld [vmem:[%s4112_s0 + $0x8] sm:$0xff] }
 0x45a   :  { %2554 = vtanh.f32 %v3839_v38  ;;  %v1518_v8 = vsel %vm1517_vm5, %v2553_v59, %v1514_v9  ;;  %v1478_v17 = vsel %vm1475_vm6, %v1477_v7, %v1473_v63  ;;  %v3907_v63 = vld [vmem:[%s4112_s0 + $0x38] sm:$0xff] }
 0x45b   :  { %2556 = vtanh.f32 %v3841_v44  ;;  %v1523_v28 = vsel %vm1520_vm7, %v1522_v12, %v1518_v8 }
 0x460   :  { %v2555_v16 = vpop.eup %2554 }
 0x461   :  { %v2557_v21 = vpop.eup %2556  ;;  %v1541_v32 = vmul.f32 %v2555_v16, %v1478_v17  ;;  %v1752_v16 = vrot.slane %v3839_v38, 7 }
 0x462   :  { %v1542_v33 = vmul.f32 %v2557_v21, %v1523_v28  ;;  %v1753_v28 = vrot.slane %v3841_v44, 7 }
 0x463   :  { %v1543_v34 = vpack.c.bf16 %v1541_v32, %v1541_v32 }
 0x464   :  { %v1544_v60 = vpack.c.bf16 %v1542_v33, %v1542_v33 }
 0x465   :  { %v1547_v41 = vunpack.c.l.b16 %v1543_v34 }
 0x466   :  { %v1548_v42 = vunpack.c.l.b16 %v1544_v60 }
 0x467   :  { %v1549_v45 = vrot.slane %v1547_v41, 5 }
 0x468   :  { %v1550_v46 = vrot.slane %v1548_v42, 4 }
 0x46a   :  { %v1551_v3 = vsel %vm440_vm8, %v1550_v46, %v1549_v45 }
 0x46b   :  { %v1552_v53 = vpack.c.b16 %v1551_v3, %v1551_v3 }
 0x46d   :  { %1562 = vmatmul.bf16.vlgmr.msra.gmra.mxu0 %v1552_v53  ;;  %1575 = vmatmul.bf16.vlgmr.msra.gmra.mxu1 %v1552_v53 }
 0x46e   :  { %1588 = vmatmul.bf16.vlgmr.msra.gmra.mxu2 %v1552_v53  ;;  %1601 = vmatmul.bf16.vlgmr.msra.gmra.mxu3 %v1552_v53 }
 0x4ea   :  { %v1563_v54 = vpop.f32.mrf.mxu0  ;;  %v1576_v57 = vpop.f32.mrf.mxu1 }
 0x4eb   :  { %v1610_v58 = vrot.slane %v1563_v54, 2  ;;  %v1614_v2 = vrot.slane %v1563_v54, 3  ;;  %v1611_v4 = vrot.slane %v1576_v57, 2  ;;  %v1615_v10 = vrot.slane %v1576_v57, 3 }
 0x4ed   :  { %v1626_v20 = vadd.f32 %v3855_v11, %v1610_v58  ;;  %v1630_v25 = vadd.f32 %v3861_v22, %v1614_v2  ;;  %v1627_v23 = vadd.f32 %v3867_v52, %v1611_v4  ;;  %v1631_v29 = vadd.f32 %v3873_v14, %v1615_v10 }
 0x4ef   :  { %v2279_v59 = vmul.f32 -1.442695, %v1626_v20  ;;  %v2282_v13 = vmul.f32 -1.442695, %v1630_v25  ;;  %v2280_v48 = vmul.f32 -1.442695, %v1627_v23 }
 0x4f0   :  { %v2283_v5 = vmul.f32 -1.442695, %v1631_v29 }
 0x4f1   :  { %2558 = vpow2.f32 %v2279_v59  ;;  %v1589_v49 = vpop.f32.mrf.mxu2  ;;  %v1602_v39 = vpop.f32.mrf.mxu3 }
 0x4f2   :  { %2560 = vpow2.f32 %v2282_v13  ;;  %v1612_v24 = vrot.slane %v1589_v49, 2  ;;  %v1616_v47 = vrot.slane %v1589_v49, 3  ;;  %v1565_v6 = vpop.f32.mrf.mxu0  ;;  %v1578_v51 = vpop.f32.mrf.mxu1  ;;  %v1613_v18 = vrot.slane %v1602_v39, 2 }
 0x4f3   :  { %2562 = vpow2.f32 %v2280_v48  ;;  %v1617_v56 = vrot.slane %v1602_v39, 3 }
 0x4f4   :  { %2564 = vpow2.f32 %v2283_v5  ;;  %v1628_v31 = vadd.f32 %v3879_v62, %v1612_v24  ;;  %v1632_v36 = vadd.f32 %v3885_v40, %v1616_v47  ;;  %v1629_v15 = vadd.f32 %v3898_v19, %v1613_v18 }
 0x4f5   :  { %v1633_v7 = vadd.f32 %v3907_v63, %v1617_v56 }
 0x4f6   :  { %v2281_v1 = vmul.f32 -1.442695, %v1628_v31  ;;  %v2284_v61 = vmul.f32 -1.442695, %v1632_v36 }
 0x4f7   :  { %v2559_v50 = vpop.eup %2558 }
 0x4f8   :  { %v2561_v35 = vpop.eup %2560  ;;  %v3888_v0 = vadd.f32 1.0, %v2559_v50  ;;  %2566 = vpow2.f32 %v2281_v1 }
 0x4f9   :  { %v2563_v43 = vpop.eup %2562  ;;  %v3890_v27 = vadd.f32 1.0, %v2561_v35  ;;  %2568 = vpow2.f32 %v2284_v61  ;;  %v1591_v26 = vpop.f32.mrf.mxu2 }
 0x4fa   :  { %v1604_v55 = vpop.f32.mrf.mxu3  ;;  %v2565_v37 = vpop.eup %2564  ;;  %2570 = vrcp.f32 %v3888_v0  ;;  %v3893_v9 = vadd.f32 1.0, %v2563_v43  ;;  %v1667_v8 = vand.u32 2147483647, %v3888_v0  ;;  %v1669_v17 = vand.u32 2147483648, %v3888_v0 }
 0x4fb   :  { %2572 = vrcp.f32 %v3890_v27  ;;  %v3902_v30 = vadd.f32 1.0, %v2565_v37  ;;  %vm1663_vm10 = vweird.f32 %v3888_v0  ;;  %vm1708_vm9 = vweird.f32 %v3890_v27 }
 0x4fc   :  { %2574 = vrcp.f32 %v3893_v9  ;;  %v1684_v32 = vand.u32 2147483648, %v3893_v9  ;;  %vm1678_vm11 = vweird.f32 %v3893_v9  ;;  %vm3927_vm12 = vcmp.eq.f32.partialorder %v1667_v8, 8.507059e+37 }
 0x4fd   :  { %2576 = vrcp.f32 %v3902_v30  ;;  %v1729_v60 = vand.u32 2147483648, %v3902_v30  ;;  %v1682_v3 = vand.u32 2147483647, %v3893_v9  ;;  %vm1723_vm13 = vweird.f32 %v3902_v30 }
 0x4fe   :  { %v2567_v12 = vpop.eup %2566  ;;  %2578 = vtanh.f32 %v1629_v15  ;;  %v1670_v57 = vor.u32 1.1754944e-38, %v1669_v17  ;;  %v1712_v58 = vand.u32 2147483647, %v3890_v27  ;;  %v1685_v20 = vor.u32 1.1754944e-38, %v1684_v32 }
 0x4ff   :  { %v2569_v21 = vpop.eup %2568  ;;  %v3917_v33 = vadd.f32 1.0, %v2567_v12  ;;  %2580 = vtanh.f32 %v1633_v7  ;;  %v1714_v25 = vand.u32 2147483648, %v3890_v27  ;;  %v1730_v13 = vor.u32 1.1754944e-38, %v1729_v60 }
 0x500   :  { %v2571_v34 = vpop.eup %2570  ;;  %v3920_v41 = vadd.f32 1.0, %v2569_v21  ;;  %v1727_v48 = vand.u32 2147483647, %v3902_v30  ;;  %vm3940_vm15 = vcmp.eq.f32.partialorder %v1682_v3, 8.507059e+37  ;;  %vm3944_vm1 = vcmp.eq.f32.partialorder %v1712_v58, 8.507059e+37 }
 0x501   :  { %v2573_v42 = vpop.eup %2572  ;;  %v1659_v45 = vmul.f32 %v2571_v34, %v3888_v0  ;;  %2582 = vrcp.f32 %v3917_v33  ;;  %vm1664_vm14 = vweird.f32 %v2571_v34  ;;  %v1715_v61 = vor.u32 1.1754944e-38, %v1714_v25 }
 0x502   :  { %v2575_v53 = vpop.eup %2574  ;;  %v1704_v54 = vmul.f32 %v2573_v42, %v3890_v27  ;;  %2584 = vrcp.f32 %v3920_v41  ;;  %vm1709_vm0 = vweird.f32 %v2573_v42  ;;  %vm1665_vm4 = vmor %vm1663_vm10, %vm1664_vm14  ;;  %vm3956_vm6 = vcmp.eq.f32.partialorder %v1727_v48, 8.507059e+37 }
 0x503   :  { %v2577_v2 = vpop.eup %2576  ;;  %v1660_v4 = vsub.f32 1.0, %v1659_v45  ;;  %v1674_v10 = vmul.f32 %v2575_v53, %v3893_v9  ;;  %vm1679_vm2 = vweird.f32 %v2575_v53  ;;  %vm1710_vm5 = vmor %vm1708_vm9, %vm1709_vm0  ;;  %v1744_v38 = vand.u32 2147483648, %v3920_v41 }
 0x504   :  { %v2579_v23 = vpop.eup %2578  ;;  %v1705_v29 = vsub.f32 1.0, %v1704_v54  ;;  %v1719_v59 = vmul.f32 %v2577_v2, %v3902_v30  ;;  %vm1724_vm3 = vweird.f32 %v2577_v2  ;;  %vm1680_vm7 = vmor %vm1678_vm11, %vm1679_vm2  ;;  %v1697_v44 = vand.u32 2147483647, %v3917_v33 }
 0x505   :  { %v2581_v5 = vpop.eup %2580  ;;  %v1675_v49 = vsub.f32 1.0, %v1674_v10  ;;  %v1661_v39 = vmul.f32 %v2571_v34, %v1660_v4  ;;  %vm1725_vm10 = vmor %vm1723_vm13, %vm1724_vm3  ;;  %vm1738_vm13 = vweird.f32 %v3920_v41  ;;  %v1745_v10 = vor.u32 1.1754944e-38, %v1744_v38 }
 0x506   :  { %v1720_v47 = vsub.f32 1.0, %v1719_v59  ;;  %v1706_v6 = vmul.f32 %v2573_v42, %v1705_v29  ;;  %vm1698_vm0 = vcmp.eq.f32.partialorder %v1697_v44, 8.507059e+37 }
 0x507   :  { %v2583_v31 = vpop.eup %2582  ;;  %v1676_v36 = vmul.f32 %v2575_v53, %v1675_v49  ;;  %v1662_v1 = vadd.f32 %v2571_v34, %v1661_v39 }
 0x508   :  { %v2585_v18 = vpop.eup %2584  ;;  %v1721_v50 = vmul.f32 %v2577_v2, %v1720_v47  ;;  %v1689_v56 = vmul.f32 %v2583_v31, %v3917_v33  ;;  %v1707_v35 = vadd.f32 %v2573_v42, %v1706_v6  ;;  %vm1694_vm9 = vweird.f32 %v2583_v31 }
 0x509   :  { %v1734_v43 = vmul.f32 %v2585_v18, %v3920_v41  ;;  %v1666_v26 = vsel %vm1665_vm4, %v2571_v34, %v1662_v1  ;;  %v1677_v55 = vadd.f32 %v2575_v53, %v1676_v36  ;;  %vm1739_vm11 = vweird.f32 %v2585_v18 }
 0x50a   :  { %v1690_v15 = vsub.f32 1.0, %v1689_v56  ;;  %v1671_v0 = vsel %vm3927_vm12, %v1670_v57, %v1666_v26  ;;  %v1711_v7 = vsel %vm1710_vm5, %v2573_v42, %v1707_v35  ;;  %v1722_v8 = vadd.f32 %v2577_v2, %v1721_v50  ;;  %v2361_v26 = vld [vmem:[%s4114_s2 + $0x30] sm:$0xff] }
 0x50b   :  { %v1735_v12 = vsub.f32 1.0, %v1734_v43  ;;  %v1681_v17 = vsel %vm1680_vm7, %v2575_v53, %v1677_v55  ;;  %v1716_v27 = vsel %vm3944_vm1, %v1715_v61, %v1711_v7  ;;  %v1758_v21 = vmul.f32 %v2579_v23, %v1671_v0 }
 0x50c   :  { %v1691_v32 = vmul.f32 %v2583_v31, %v1690_v15  ;;  %v1686_v9 = vsel %vm3940_vm15, %v1685_v20, %v1681_v17  ;;  %v1726_v34 = vsel %vm1725_vm10, %v2577_v2, %v1722_v8  ;;  %v1759_v60 = vmul.f32 %v2581_v5, %v1716_v27  ;;  %vm1740_vm15 = vmor %vm1738_vm13, %vm1739_vm11 }
 0x50d   :  { %v1736_v45 = vmul.f32 %v2585_v18, %v1735_v12  ;;  %v1731_v42 = vsel %vm3956_vm6, %v1730_v13, %v1726_v34  ;;  %v1756_v30 = vmul.f32 %v1752_v16, %v1686_v9  ;;  %v1699_v57 = vand.u32 2147483648, %v3917_v33 }
 0x50e   :  { %v1757_v46 = vmul.f32 %v1753_v28, %v1731_v42  ;;  %v1692_v54 = vadd.f32 %v2583_v31, %v1691_v32  ;;  %vm1693_vm12 = vweird.f32 %v3917_v33  ;;  %v1742_v16 = vand.u32 2147483647, %v3920_v41 }
 0x50f   :  { %v3976_v3 = vadd.f32 %v1758_v21, %v1756_v30  ;;  %v1737_v58 = vadd.f32 %v2585_v18, %v1736_v45  ;;  %vm1695_vm14 = vmor %vm1693_vm12, %vm1694_vm9  ;;  %v1700_v2 = vor.u32 1.1754944e-38, %v1699_v57  ;;  %v2359_v21 = vld [vmem:[%s4114_s2 + $0x20] sm:$0xff] }
 0x510   :  { %v3978_v53 = vadd.f32 %v1759_v60, %v1757_v46  ;;  %v1696_v28 = vsel %vm1695_vm14, %v2583_v31, %v1692_v54  ;;  %vm1743_vm1 = vcmp.eq.f32.partialorder %v1742_v16, 8.507059e+37  ;;  %v2362_v31 = vld [vmem:[%s4114_s2 + $0x38] sm:$0xff] }
 0x511   :  { %2586 = vtanh.f32 %v3976_v3  ;;  %v1741_v4 = vsel %vm1740_vm15, %v2585_v18, %v1737_v58  ;;  %v1701_v25 = vsel %vm1698_vm0, %v1700_v2, %v1696_v28  ;;  %2085 = vmatpush.bf16.msra.mxu0 %v2362_v31  ;;  %v2357_v2 = vld [vmem:[%s4114_s2 + $0x10] sm:$0xff] }
 0x512   :  { %2588 = vtanh.f32 %v3978_v53  ;;  %v1746_v29 = vsel %vm1743_vm1, %v1745_v10, %v1741_v4 }
 0x515   :  { %2086 = vmatpush.bf16.msra.mxu0 %v2361_v26 }
 0x517   :  { %v2587_v20 = vpop.eup %2586 }
 0x518   :  { %v2589_v23 = vpop.eup %2588  ;;  %v1764_v59 = vmul.f32 %v2587_v20, %v1701_v25 }
 0x519   :  { %v1765_v13 = vmul.f32 %v2589_v23, %v1746_v29 }
 0x51a   :  { %v1766_v48 = vpack.c.bf16 %v1764_v59, %v1764_v59 }
 0x51b   :  { %v1767_v33 = vpack.c.bf16 %v1765_v13, %v1765_v13 }
 0x51c   :  { %v1770_v5 = vunpack.c.l.b16 %v1766_v48 }
 0x51d   :  { %v1771_v49 = vunpack.c.l.b16 %v1767_v33  ;;  %v2356_v33 = vld [vmem:[%s4114_s2 + $0x8] sm:$0xff] }
 0x51e   :  { %v1772_v39 = vrot.slane %v1770_v5, 6 }
 0x51f   :  { %v1773_v24 = vrot.slane %v1771_v49, 5 }
 0x521   :  { %v1774_v41 = vsel %vm440_vm8, %v1773_v24, %v1772_v39 }
 0x522   :  { %v1775_v47 = vpack.c.b16 %v1774_v41, %v1774_v41 }
 0x524   :  { %1785 = vmatmul.bf16.vlgmr.msrb.gmra.mxu0 %v1775_v47  ;;  %1798 = vmatmul.bf16.vlgmr.msrb.gmra.mxu1 %v1775_v47 }
 0x525   :  { %1811 = vmatmul.bf16.vlgmr.msrb.gmra.mxu2 %v1775_v47  ;;  %1824 = vmatmul.bf16.vlgmr.msrb.gmra.mxu3 %v1775_v47 }
 0x5a1   :  { %v1786_v6 = vpop.f32.mrf.mxu0  ;;  %v1799_v51 = vpop.f32.mrf.mxu1 }
 0x5a2   :  { %v1833_v36 = vrot.slane %v1786_v6, 1  ;;  %v1837_v1 = vrot.slane %v1786_v6, 2  ;;  %v1834_v61 = vrot.slane %v1799_v51, 1  ;;  %v1838_v18 = vrot.slane %v1799_v51, 2 }
 0x5a4   :  { %v1849_v50 = vadd.f32 %v3855_v11, %v1833_v36  ;;  %v1853_v56 = vadd.f32 %v3861_v22, %v1837_v1  ;;  %v1850_v35 = vadd.f32 %v3867_v52, %v1834_v61  ;;  %v1854_v43 = vadd.f32 %v3873_v14, %v1838_v18  ;;  %v2360_v52 = vld [vmem:[%s4114_s2 + $0x28] sm:$0xff] }
 0x5a5   :  { %2087 = vmatpush.bf16.msra.mxu0 %v2360_v52 }
 0x5a6   :  { %v2285_v55 = vmul.f32 -1.442695, %v1849_v50  ;;  %v2288_v37 = vmul.f32 -1.442695, %v1853_v56  ;;  %v2286_v15 = vmul.f32 -1.442695, %v1850_v35 }
 0x5a7   :  { %v2289_v0 = vmul.f32 -1.442695, %v1854_v43 }
 0x5a8   :  { %2590 = vpow2.f32 %v2285_v55  ;;  %v1812_v7 = vpop.f32.mrf.mxu2  ;;  %v1825_v8 = vpop.f32.mrf.mxu3  ;;  %v2355_v55 = vld [vmem:[%s4114_s2] sm:$0xff] }
 0x5a9   :  { %2592 = vpow2.f32 %v2288_v37  ;;  %v1835_v11 = vrot.slane %v1812_v7, 1  ;;  %v1839_v12 = vrot.slane %v1812_v7, 2  ;;  %v1788_v22 = vpop.f32.mrf.mxu0  ;;  %v1801_v17 = vpop.f32.mrf.mxu1  ;;  %v1836_v34 = vrot.slane %v1825_v8, 1  ;;  %2088 = vmatpush.bf16.msra.mxu0 %v2359_v21 }
 0x5aa   :  { %2594 = vpow2.f32 %v2286_v15  ;;  %v1840_v45 = vrot.slane %v1825_v8, 2 }
 0x5ab   :  { %2596 = vpow2.f32 %v2289_v0  ;;  %v1851_v14 = vadd.f32 %v3879_v62, %v1835_v11  ;;  %v1855_v27 = vadd.f32 %v3885_v40, %v1839_v12  ;;  %v2358_v62 = vld [vmem:[%s4114_s2 + $0x18] sm:$0xff]  ;;  %v1852_v44 = vadd.f32 %v3898_v19, %v1836_v34 }
 0x5ac   :  { %v1856_v28 = vadd.f32 %v3907_v63, %v1840_v45  ;;  %v1975_v19 = vrot.slane %v3976_v3, 7  ;;  %v1976_v63 = vrot.slane %v3978_v53, 7 }
 0x5ad   :  { %v2287_v32 = vmul.f32 -1.442695, %v1851_v14  ;;  %v2290_v9 = vmul.f32 -1.442695, %v1855_v27  ;;  %2089 = vmatpush.bf16.msra.mxu0 %v2358_v62 }
 0x5ae   :  { %v2591_v60 = vpop.eup %2590 }
 0x5af   :  { %v2593_v42 = vpop.eup %2592  ;;  %v4007_v30 = vadd.f32 1.0, %v2591_v60  ;;  %2598 = vpow2.f32 %v2287_v32 }
 0x5b0   :  { %v2595_v40 = vpop.eup %2594  ;;  %v4012_v46 = vadd.f32 1.0, %v2593_v42  ;;  %2600 = vpow2.f32 %v2290_v9  ;;  %v1814_v54 = vpop.f32.mrf.mxu2 }
 0x5b1   :  { %v1827_v57 = vpop.f32.mrf.mxu3  ;;  %v2597_v58 = vpop.eup %2596  ;;  %2602 = vrcp.f32 %v4007_v30  ;;  %v4015_v38 = vadd.f32 1.0, %v2595_v40  ;;  %v1890_v4 = vand.u32 2147483647, %v4007_v30  ;;  %v1892_v20 = vand.u32 2147483648, %v4007_v30  ;;  %2090 = vmatpush.bf16.msra.mxu0 %v2357_v2 }
 0x5b2   :  { %2604 = vrcp.f32 %v4012_v46  ;;  %v4019_v16 = vadd.f32 1.0, %v2597_v58  ;;  %vm1886_vm2 = vweird.f32 %v4007_v30  ;;  %vm1931_vm3 = vweird.f32 %v4012_v46 }
 0x5b3   :  { %2606 = vrcp.f32 %v4015_v38  ;;  %v1907_v23 = vand.u32 2147483648, %v4015_v38  ;;  %vm1901_vm4 = vweird.f32 %v4015_v38  ;;  %vm4045_vm5 = vcmp.eq.f32.partialorder %v1890_v4, 8.507059e+37 }
 0x5b4   :  { %2608 = vrcp.f32 %v4019_v16  ;;  %v1952_v13 = vand.u32 2147483648, %v4019_v16  ;;  %v1905_v24 = vand.u32 2147483647, %v4015_v38  ;;  %vm1946_vm6 = vweird.f32 %v4019_v16 }
 0x5b5   :  { %v2599_v10 = vpop.eup %2598  ;;  %2610 = vtanh.f32 %v1852_v44  ;;  %v1893_v6 = vor.u32 1.1754944e-38, %v1892_v20  ;;  %v1935_v51 = vand.u32 2147483647, %v4012_v46  ;;  %v1908_v61 = vor.u32 1.1754944e-38, %v1907_v23  ;;  %2091 = vmatpush.bf16.msra.mxu0 %v2356_v33 }
 0x5b6   :  { %v2601_v25 = vpop.eup %2600  ;;  %v4032_v29 = vadd.f32 1.0, %v2599_v10  ;;  %2612 = vtanh.f32 %v1856_v28  ;;  %v1937_v18 = vand.u32 2147483648, %v4012_v46  ;;  %v1953_v43 = vor.u32 1.1754944e-38, %v1952_v13 }
 0x5b7   :  { %v2603_v59 = vpop.eup %2602  ;;  %v4035_v48 = vadd.f32 1.0, %v2601_v25  ;;  %v1950_v26 = vand.u32 2147483647, %v4019_v16  ;;  %vm4061_vm10 = vcmp.eq.f32.partialorder %v1905_v24, 8.507059e+37  ;;  %vm4065_vm11 = vcmp.eq.f32.partialorder %v1935_v51, 8.507059e+37 }
 0x5b8   :  { %v2605_v5 = vpop.eup %2604  ;;  %v1882_v49 = vmul.f32 %v2603_v59, %v4007_v30  ;;  %2614 = vrcp.f32 %v4032_v29  ;;  %vm1887_vm7 = vweird.f32 %v2603_v59  ;;  %v1938_v14 = vor.u32 1.1754944e-38, %v1937_v18 }
 0x5b9   :  { %v2607_v41 = vpop.eup %2606  ;;  %v1927_v47 = vmul.f32 %v2605_v5, %v4012_v46  ;;  %2616 = vrcp.f32 %v4035_v48  ;;  %vm1932_vm9 = vweird.f32 %v2605_v5  ;;  %vm1888_vm14 = vmor %vm1886_vm2, %vm1887_vm7  ;;  %2092 = vmatpush.bf16.msra.mxu0 %v2355_v55  ;;  %vm4077_vm0 = vcmp.eq.f32.partialorder %v1950_v26, 8.507059e+37  ;;  %v2365_v55 = vld [vmem:[%s4115_s3] ss:$0 sm:$0xff] }
 0x5ba   :  { %v2609_v31 = vpop.eup %2608  ;;  %v1883_v36 = vsub.f32 1.0, %v1882_v49  ;;  %v1897_v1 = vmul.f32 %v2607_v41, %v4015_v38  ;;  %vm1902_vm12 = vweird.f32 %v2607_v41  ;;  %vm1933_vm15 = vmor %vm1931_vm3, %vm1932_vm9  ;;  %vm1916_vm3 = vweird.f32 %v4032_v29 }
 0x5bb   :  { %v2611_v50 = vpop.eup %2610  ;;  %v1928_v56 = vsub.f32 1.0, %v1927_v47  ;;  %v1942_v35 = vmul.f32 %v2609_v31, %v4019_v16  ;;  %vm1947_vm13 = vweird.f32 %v2609_v31  ;;  %vm1903_vm1 = vmor %vm1901_vm4, %vm1902_vm12  ;;  %v1922_v33 = vand.u32 2147483648, %v4032_v29 }
 0x5bc   :  { %v2613_v37 = vpop.eup %2612  ;;  %v1898_v15 = vsub.f32 1.0, %v1897_v1  ;;  %v1884_v0 = vmul.f32 %v2603_v59, %v1883_v36  ;;  %vm1948_vm2 = vmor %vm1946_vm6, %vm1947_vm13  ;;  %v1967_v49 = vand.u32 2147483648, %v4035_v48  ;;  %vm1961_vm7 = vweird.f32 %v4035_v48 }
 0x5bd   :  { %v1943_v8 = vsub.f32 1.0, %v1942_v35  ;;  %v1929_v11 = vmul.f32 %v2605_v5, %v1928_v56  ;;  %v1965_v53 = vand.u32 2147483647, %v4035_v48  ;;  %v1923_v39 = vor.u32 1.1754944e-38, %v1922_v33 }
 0x5be   :  { %v2615_v22 = vpop.eup %2614  ;;  %v1899_v17 = vmul.f32 %v2607_v41, %v1898_v15  ;;  %v1885_v52 = vadd.f32 %v2603_v59, %v1884_v0 }
 0x5bf   :  { %v2617_v27 = vpop.eup %2616  ;;  %v1944_v21 = vmul.f32 %v2609_v31, %v1943_v8  ;;  %v1912_v32 = vmul.f32 %v2615_v22, %v4032_v29  ;;  %v1930_v9 = vadd.f32 %v2605_v5, %v1929_v11  ;;  %vm1917_vm4 = vweird.f32 %v2615_v22 }
 0x5c0   :  { %v1957_v34 = vmul.f32 %v2617_v27, %v4035_v48  ;;  %v1889_v60 = vsel %vm1888_vm14, %v2603_v59, %v1885_v52  ;;  %v1900_v45 = vadd.f32 %v2607_v41, %v1899_v17  ;;  %vm1918_vm6 = vmor %vm1916_vm3, %vm1917_vm4 }
 0x5c1   :  { %v1913_v30 = vsub.f32 1.0, %v1912_v32  ;;  %v1894_v62 = vsel %vm4045_vm5, %v1893_v6, %v1889_v60  ;;  %v1934_v40 = vsel %vm1933_vm15, %v2605_v5, %v1930_v9  ;;  %v1945_v54 = vadd.f32 %v2609_v31, %v1944_v21 }
 0x5c2   :  { %v1958_v46 = vsub.f32 1.0, %v1957_v34  ;;  %v1904_v57 = vsel %vm1903_vm1, %v2607_v41, %v1900_v45  ;;  %v1939_v58 = vsel %vm4065_vm11, %v1938_v14, %v1934_v40  ;;  %v1981_v44 = vmul.f32 %v2611_v50, %v1894_v62 }
 0x5c3   :  { %v1914_v28 = vmul.f32 %v2615_v22, %v1913_v30  ;;  %v1909_v38 = vsel %vm4061_vm10, %v1908_v61, %v1904_v57  ;;  %v1949_v2 = vsel %vm1948_vm2, %v2609_v31, %v1945_v54  ;;  %v1982_v4 = vmul.f32 %v2613_v37, %v1939_v58 }
 0x5c4   :  { %v1959_v10 = vmul.f32 %v2617_v27, %v1958_v46  ;;  %v1954_v20 = vsel %vm4077_vm0, %v1953_v43, %v1949_v2  ;;  %v1979_v16 = vmul.f32 %v1975_v19, %v1909_v38  ;;  %vm1962_vm5 = vweird.f32 %v2617_v27 }
 0x5c5   :  { %v1980_v25 = vmul.f32 %v1976_v63, %v1954_v20  ;;  %v1915_v13 = vadd.f32 %v2615_v22, %v1914_v28  ;;  %v1920_v19 = vand.u32 2147483647, %v4032_v29  ;;  %vm1963_vm10 = vmor %vm1961_vm7, %vm1962_vm5  ;;  %v1968_v41 = vor.u32 1.1754944e-38, %v1967_v49 }
 0x5c6   :  { %v1983_v23 = vadd.f32 %v1981_v44, %v1979_v16  ;;  %v1960_v5 = vadd.f32 %v2617_v27, %v1959_v10  ;;  %vm1966_vm11 = vcmp.eq.f32.partialorder %v1965_v53, 8.507059e+37 }
 0x5c7   :  { %v1984_v59 = vadd.f32 %v1982_v4, %v1980_v25  ;;  %v1919_v63 = vsel %vm1918_vm6, %v2615_v22, %v1915_v13  ;;  %vm1921_vm9 = vcmp.eq.f32.partialorder %v1920_v19, 8.507059e+37 }
 0x5c8   :  { %2618 = vtanh.f32 %v1983_v23  ;;  %2001 = vst [vmem:[#allocation3 - $0x7] sm:$0x80] %v1983_v23  ;;  %v1964_v24 = vsel %vm1963_vm10, %v2617_v27, %v1960_v5  ;;  %v1924_v6 = vsel %vm1921_vm9, %v1923_v39, %v1919_v63 }
 0x5c9   :  { %2620 = vtanh.f32 %v1984_v59  ;;  %v1998_v3 = vrot.slane %v1984_v59, 7  ;;  %v1969_v31 = vsel %vm1966_vm11, %v1968_v41, %v1964_v24 }
 0x5cb   :  { %2002 = vst [vmem:[#allocation3 + $0x1] sm:$0x1] %v1998_v3 }
 0x5ce   :  { %v2619_v47 = vpop.eup %2618 }
 0x5cf   :  { %v2621_v51 = vpop.eup %2620  ;;  %v1987_v36 = vmul.f32 %v2619_v47, %v1924_v6 }
 0x5d0   :  { %v1988_v1 = vmul.f32 %v2621_v51, %v1969_v31 }
 0x5d1   :  { %1994 = vst [vmem:[#allocation2 - $0x7] sm:$0x80] %v1987_v36  ;;  %v2006_v29 = vpack.c.bf16 %v1987_v36, %v1987_v36 }
 0x5d2   :  { %v1991_v61 = vrot.slane %v1988_v1, 7  ;;  %v2007_v18 = vpack.c.bf16 %v1988_v1, %v1988_v1 }
 0x5d3   :  { %v2030_v50 = vunpack.c.l.b16 %v2006_v29 }
 0x5d4   :  { %1995 = vst [vmem:[#allocation2 + $0x1] sm:$0x1] %v1991_v61  ;;  %v2031_v48 = vunpack.c.l.b16 %v2007_v18 }
 0x5d5   :  { %v2032_v56 = vrot.slane %v2030_v50, 7 }
 0x5d6   :  { %v2033_v35 = vrot.slane %v2031_v48, 6 }
 0x5d8   :  { %v2034_v43 = vsel %vm440_vm8, %v2033_v35, %v2032_v56 }
 0x5d9   :  { %v2035_v26 = vpack.c.b16 %v2034_v43, %v2034_v43 }
 0x5db   :  { %2093 = vmatmul.bf16.vlgmr.msra.gmra.mxu0 %v2035_v26 }
 0x658   :  { %v2094_v37 = vpop.f32.mrf.mxu0 }
 0x659   :  { %v2095_v15 = vadd.f32 %v2365_v55, %v2094_v37 }
 0x65b   :  { %2098 = vst [vmem:[#allocation4] sm:$0x3] %v2095_v15 }
 0x65c   :  { %2109 = dma.vmem_to_hbm [thread:$0]  %s2105_s23, 32, %s2107_s26, [#allocation5]  }
 0x660   :  { %v2096_v0 = vpop.f32.mrf.mxu0 }
 0x661   :  { %2662 = dma.done.wait [#allocation5], 32  }
 0x662   :  { %2663 = vsyncadd [#allocation5], 4294967264 }
 0x663   :  { %2114 = vsyncpa [#allocation5], 1 }

</bundles_post_ra>
